<compile_context>
chip_gen: v7x
topology: tpu7x:2x2x1
jax: 0.10.0
libtpu: 0.0.40
codegen_flags: <defaults>
</compile_context>

<pallas_src>
import numpy as np

import jax
import jax.numpy as jnp
from jax.experimental import pallas as pl
from jax.experimental.pallas import tpu as pltpu

FEATURE_DIM = 960
NUM_BINS = 90
HIDDEN = 256
BIN_PAD = 128          # lane-dense padding per head output (90 -> 128)


def _hardswish(x):
    return x * jnp.clip(x + 3.0, 0.0, 6.0) * (1.0 / 6.0)


def _hardsigmoid(x):
    return jnp.clip(x + 3.0, 0.0, 6.0) * (1.0 / 6.0)


# ----------------------------------------------------------------------------
# Fused kernel: everything for one image, all intermediates VMEM-resident.
# ----------------------------------------------------------------------------
def _l2cs_fused_kernel(patches_ref, sel_ref,
                       stem_w, stem_b, exp_w, exp_b,
                       dw_w, dw_b,
                       se_w1, se_b1, se_w2, se_b2,
                       proj_w, proj_b, last_w, last_b,
                       head_w1, head_b1, head_w2, head_b2,
                       out_ref):
    f32 = jnp.float32
    n_out = sel_ref.shape[1]                    # H2*W2 spatial positions

    # --- stem 3x3/s2 conv (im2col patches) + hardswish -----------------------
    x = patches_ref[0]                                            # [HW1, 27]
    h = jnp.dot(x, stem_w[...], preferred_element_type=f32) + stem_b[...]
    h = _hardswish(h)                                             # [HW1, 16]

    # --- expand 1x1 + ReLU ----------------------------------------------------
    h = jnp.dot(h, exp_w[...], preferred_element_type=f32) + exp_b[...]
    h = jnp.maximum(h, 0.0)                                       # [HW1, 64]

    # --- depthwise 3x3/s2: 9 gather-matmuls + per-channel MAC + ReLU ---------
    # sel_ref[t] is a 0/1 [HW2, HW1] matrix selecting the t-th tap's source
    # pixel per output position (all-zero rows where the tap hits padding).
    dwv = dw_w[...]                                               # [9, 64]
    acc = jnp.zeros((n_out, dwv.shape[1]), f32)
    for t in range(dwv.shape[0]):
        g = jnp.dot(sel_ref[t], h, preferred_element_type=f32)    # [HW2, 64]
        acc = acc + g * dwv[t:t + 1]
    dw = jnp.maximum(acc + dw_b[...], 0.0)                        # [HW2, 64]

    # --- Squeeze-Excite (GAP -> FC -> ReLU -> FC -> hardsigmoid), fused scale -
    s = jnp.sum(dw, axis=0, keepdims=True) * (1.0 / n_out)        # [1, 64]
    s = jnp.dot(s, se_w1[...], preferred_element_type=f32) + se_b1[...]
    s = jnp.maximum(s, 0.0)
    s = jnp.dot(s, se_w2[...], preferred_element_type=f32) + se_b2[...]
    dw = dw * _hardsigmoid(s)                                     # [HW2, 64]

    # --- project 1x1 (linear) -> last 1x1 conv to FEATURE_DIM + hardswish ----
    y = jnp.dot(dw, proj_w[...], preferred_element_type=f32) + proj_b[...]
    y = jnp.dot(y, last_w[...], preferred_element_type=f32) + last_b[...]
    y = _hardswish(y)                                             # [HW2, 960]

    # --- global average pool + fused yaw/pitch heads (lane-dense weights) ----
    feat = jnp.sum(y, axis=0, keepdims=True) * (1.0 / n_out)      # [1, 960]
    z = jnp.dot(feat, head_w1[...], preferred_element_type=f32) + head_b1[...]
    z = jnp.maximum(z, 0.0)                                       # [1, 512]
    o = jnp.dot(z, head_w2[...], preferred_element_type=f32) + head_b2[...]
    out_ref[...] = o[None].astype(out_ref.dtype)                  # [1, 1, 256]


# ----------------------------------------------------------------------------
# Wrapper-side layout plumbing (plain JAX / numpy, no hot compute)
# ----------------------------------------------------------------------------
def _im2col(x, ksize, stride, pad):
    """x: [B,H,W,C] NHWC -> ([B, Ho*Wo, ksize*ksize*C], (Ho, Wo))."""
    B, H, W, C = x.shape
    xp = jnp.pad(x, ((0, 0), (pad, pad), (pad, pad), (0, 0)))
    Ho = (H + 2 * pad - ksize) // stride + 1
    Wo = (W + 2 * pad - ksize) // stride + 1
    cols = []
    for ky in range(ksize):
        for kx in range(ksize):
            cols.append(xp[:, ky:ky + stride * (Ho - 1) + 1:stride,
                           kx:kx + stride * (Wo - 1) + 1:stride, :])
    patches = jnp.concatenate(cols, axis=-1)                      # [B,Ho,Wo,kkC]
    return patches.reshape(B, Ho * Wo, ksize * ksize * C), (Ho, Wo)


def _dw_select_mats(H1, W1, ksize=3, stride=2, pad=1):
    """0/1 selection matrices turning a stride-2 depthwise conv into matmuls."""
    Ho = (H1 + 2 * pad - ksize) // stride + 1
    Wo = (W1 + 2 * pad - ksize) // stride + 1
    S = np.zeros((ksize * ksize, Ho * Wo, H1 * W1), np.float32)
    for ky in range(ksize):
        for kx in range(ksize):
            t = ky * ksize + kx
            for oy in range(Ho):
                iy = stride * oy + ky - pad
                if not (0 <= iy < H1):
                    continue
                for ox in range(Wo):
                    ix = stride * ox + kx - pad
                    if 0 <= ix < W1:
                        S[t, oy * Wo + ox, iy * W1 + ix] = 1.0
    return S, (Ho, Wo)


def pack_params(p):
    """One-time repack of module params for the fused kernel (outside jit)."""
    r = lambda b: jnp.asarray(b, jnp.float32).reshape(1, -1)
    head_w1 = jnp.concatenate([p["yaw_w1"], p["pitch_w1"]], axis=1)        # [960,512]
    head_b1 = jnp.concatenate([p["yaw_b1"], p["pitch_b1"]]).reshape(1, -1)  # [1,512]
    head_w2 = jnp.zeros((2 * HIDDEN, 2 * BIN_PAD), jnp.float32)
    head_w2 = head_w2.at[:HIDDEN, :NUM_BINS].set(p["yaw_w2"])
    head_w2 = head_w2.at[HIDDEN:, BIN_PAD:BIN_PAD + NUM_BINS].set(p["pitch_w2"])
    head_b2 = jnp.zeros((1, 2 * BIN_PAD), jnp.float32)
    head_b2 = head_b2.at[0, :NUM_BINS].set(p["yaw_b2"])
    head_b2 = head_b2.at[0, BIN_PAD:BIN_PAD + NUM_BINS].set(p["pitch_b2"])
    return {
        "stem_w": p["stem_w"], "stem_b": r(p["stem_b"]),
        "exp_w": p["exp_w"], "exp_b": r(p["exp_b"]),
        "dw_w": p["dw_w"], "dw_b": r(p["dw_b"]),
        "se_w1": p["se_w1"], "se_b1": r(p["se_b1"]),
        "se_w2": p["se_w2"], "se_b2": r(p["se_b2"]),
        "proj_w": p["proj_w"], "proj_b": r(p["proj_b"]),
        "last_w": p["last_w"], "last_b": r(p["last_b"]),
        "head_w1": head_w1, "head_b1": head_b1,
        "head_w2": head_w2, "head_b2": head_b2,
    }


# ----------------------------------------------------------------------------
# Forward pass
# ----------------------------------------------------------------------------
def l2cs_mobile_forward(x_nchw, kp):
    """x_nchw: [B, 3, H, W] float32 -> (pitch, yaw), each [B, NUM_BINS]."""
    x = jnp.transpose(x_nchw, (0, 2, 3, 1)).astype(jnp.float32)   # NHWC
    B = x.shape[0]

    patches, (H1, W1) = _im2col(x, 3, 2, 1)                       # [B, HW1, 27]
    sel_np, (H2, W2) = _dw_select_mats(H1, W1)                    # [9, HW2, HW1]
    HW1, HW2 = H1 * W1, H2 * W2
    KK = patches.shape[-1]

    def const_spec(shape):
        nd = len(shape)
        return pl.BlockSpec(shape, lambda b, _nd=nd: (0,) * _nd)

    out = pl.pallas_call(
        _l2cs_fused_kernel,
        out_shape=jax.ShapeDtypeStruct((B, 1, 2 * BIN_PAD), jnp.float32),
        grid=(B,),
        in_specs=[
            pl.BlockSpec((1, HW1, KK), lambda b: (b, 0, 0)),      # per-image patches
            const_spec((9, HW2, HW1)),                            # dw selection mats
            const_spec(kp["stem_w"].shape), const_spec(kp["stem_b"].shape),
            const_spec(kp["exp_w"].shape), const_spec(kp["exp_b"].shape),
            const_spec(kp["dw_w"].shape), const_spec(kp["dw_b"].shape),
            const_spec(kp["se_w1"].shape), const_spec(kp["se_b1"].shape),
            const_spec(kp["se_w2"].shape), const_spec(kp["se_b2"].shape),
            const_spec(kp["proj_w"].shape), const_spec(kp["proj_b"].shape),
            const_spec(kp["last_w"].shape), const_spec(kp["last_b"].shape),
            const_spec(kp["head_w1"].shape), const_spec(kp["head_b1"].shape),
            const_spec(kp["head_w2"].shape), const_spec(kp["head_b2"].shape),
        ],
        out_specs=pl.BlockSpec((1, 1, 2 * BIN_PAD), lambda b: (b, 0, 0)),
        compiler_params=pltpu.CompilerParams(
            dimension_semantics=("parallel",)),
    )(
        patches, jnp.asarray(sel_np),
        kp["stem_w"], kp["stem_b"], kp["exp_w"], kp["exp_b"],
        kp["dw_w"], kp["dw_b"],
        kp["se_w1"], kp["se_b1"], kp["se_w2"], kp["se_b2"],
        kp["proj_w"], kp["proj_b"], kp["last_w"], kp["last_b"],
        kp["head_w1"], kp["head_b1"], kp["head_w2"], kp["head_b2"],
    )

    out = out[:, 0]                                               # [B, 256]
    yaw = out[:, :NUM_BINS]
    pitch = out[:, BIN_PAD:BIN_PAD + NUM_BINS]
    return pitch, yaw


# ----------------------------------------------------------------------------
# Pure-JAX reference (independent of the kernel's selection-matrix trick)
# ----------------------------------------------------------------------------
def _ref_depthwise_s2(x, w, b):
    """x: [B,H,W,C]; 3x3 depthwise conv, stride 2, pad 1, + bias + ReLU."""
    B, H, W, C = x.shape
    xp = jnp.pad(x, ((0, 0), (1, 1), (1, 1), (0, 0)))
    Ho = (H + 2 - 3) // 2 + 1
    Wo = (W + 2 - 3) // 2 + 1
    out = jnp.zeros((B, Ho, Wo, C), jnp.float32)
    for ky in range(3):
        for kx in range(3):
            tap = xp[:, ky:ky + 2 * (Ho - 1) + 1:2, kx:kx + 2 * (Wo - 1) + 1:2, :]
            out = out + tap * w[ky * 3 + kx]
    return jnp.maximum(out + b, 0.0)


def _reference_forward(x_nchw, p):
    P = jax.lax.Precision.HIGHEST
    x = jnp.transpose(x_nchw, (0, 2, 3, 1)).astype(jnp.float32)
    B = x.shape[0]
    patches, (H1, W1) = _im2col(x, 3, 2, 1)
    h = _hardswish(jnp.dot(patches, p["stem_w"], precision=P) + p["stem_b"])
    h = jnp.maximum(jnp.dot(h, p["exp_w"], precision=P) + p["exp_b"], 0.0)
    h = h.reshape(B, H1, W1, -1)
    h = _ref_depthwise_s2(h, p["dw_w"], p["dw_b"])
    _, H2, W2, C = h.shape
    h = h.reshape(B, H2 * W2, C)
    s = jnp.mean(h, axis=1)
    s = jnp.maximum(jnp.dot(s, p["se_w1"], precision=P) + p["se_b1"], 0.0)
    s = jnp.dot(s, p["se_w2"], precision=P) + p["se_b2"]
    h = h * _hardsigmoid(s)[:, None, :]
    h = jnp.dot(h, p["proj_w"], precision=P) + p["proj_b"]
    h = _hardswish(jnp.dot(h, p["last_w"], precision=P) + p["last_b"])
    feat = jnp.mean(h, axis=1)

    def head(w1, b1, w2, b2):
        z = jnp.maximum(jnp.dot(feat, w1, precision=P) + b1, 0.0)
        return jnp.dot(z, w2, precision=P) + b2

    yaw = head(p["yaw_w1"], p["yaw_b1"], p["yaw_w2"], p["yaw_b2"])
    pitch = head(p["pitch_w1"], p["pitch_b1"], p["pitch_w2"], p["pitch_b2"])
    return pitch, yaw


# ----------------------------------------------------------------------------
# Params
# ----------------------------------------------------------------------------
def init_params(key):
    def rnd(k, shape, scale=0.05):
        return scale * jax.random.normal(k, shape, jnp.float32)

    ks = jax.random.split(key, 16)
    z = lambda n: jnp.zeros((n,), jnp.float32)
    return {
        "stem_w": rnd(ks[0], (27, 16)), "stem_b": z(16),
        "exp_w": rnd(ks[1], (16, 64)), "exp_b": z(64),
        "dw_w": rnd(ks[2], (9, 64)), "dw_b": z(64),
        "se_w1": rnd(ks[3], (64, 16)), "se_b1": z(16),
        "se_w2": rnd(ks[4], (16, 64)), "se_b2": z(64),
        "proj_w": rnd(ks[5], (64, 24)), "proj_b": z(24),
        "last_w": rnd(ks[6], (24, FEATURE_DIM)), "last_b": z(FEATURE_DIM),
        # L2CS heads (exact shapes from the module):
        "yaw_w1": rnd(ks[7], (FEATURE_DIM, HIDDEN)), "yaw_b1": rnd(ks[8], (HIDDEN,)),
        "yaw_w2": rnd(ks[9], (HIDDEN, NUM_BINS)), "yaw_b2": rnd(ks[10], (NUM_BINS,)),
        "pitch_w1": rnd(ks[11], (FEATURE_DIM, HIDDEN)), "pitch_b1": rnd(ks[12], (HIDDEN,)),
        "pitch_w2": rnd(ks[13], (HIDDEN, NUM_BINS)), "pitch_b2": rnd(ks[14], (NUM_BINS,)),
    }


if __name__ == "__main__":
    key = jax.random.PRNGKey(0)
    k_param, k_x = jax.random.split(key)
    params = init_params(k_param)
    kparams = pack_params(params)              # one-time repack, outside jit

    x = jax.random.normal(k_x, (2, 3, 32, 32), jnp.float32)

    fwd = jax.jit(l2cs_mobile_forward)
    pitch, yaw = fwd(x, kparams)
    jax.block_until_ready((pitch, yaw))

    assert pitch.shape == (2, NUM_BINS) and yaw.shape == (2, NUM_BINS)
    assert bool(jnp.all(jnp.isfinite(pitch))) and bool(jnp.all(jnp.isfinite(yaw)))

    # Numerical cross-check against an independent pure-JAX reference.
    pitch_ref, yaw_ref = _reference_forward(x, params)
    assert bool(jnp.allclose(pitch, pitch_ref, rtol=5e-2, atol=5e-3)), "pitch mismatch"
    assert bool(jnp.allclose(yaw, yaw_ref, rtol=5e-2, atol=5e-3)), "yaw mismatch"

    print("KERNEL_OK")
</pallas_src>

<mosaic_0001>
module attributes {stable_mosaic.version = 11 : i64} {
  func.func @_l2cs_fused_kernel(%arg0: i32, %arg1: memref<1x256x27xf32, #tpu.memory_space<vmem>>, %arg2: memref<9x64x256xf32, #tpu.memory_space<vmem>>, %arg3: memref<27x16xf32, #tpu.memory_space<vmem>>, %arg4: memref<1x16xf32, #tpu.memory_space<vmem>>, %arg5: memref<16x64xf32, #tpu.memory_space<vmem>>, %arg6: memref<1x64xf32, #tpu.memory_space<vmem>>, %arg7: memref<9x64xf32, #tpu.memory_space<vmem>>, %arg8: memref<1x64xf32, #tpu.memory_space<vmem>>, %arg9: memref<64x16xf32, #tpu.memory_space<vmem>>, %arg10: memref<1x16xf32, #tpu.memory_space<vmem>>, %arg11: memref<16x64xf32, #tpu.memory_space<vmem>>, %arg12: memref<1x64xf32, #tpu.memory_space<vmem>>, %arg13: memref<64x24xf32, #tpu.memory_space<vmem>>, %arg14: memref<1x24xf32, #tpu.memory_space<vmem>>, %arg15: memref<24x960xf32, #tpu.memory_space<vmem>>, %arg16: memref<1x960xf32, #tpu.memory_space<vmem>>, %arg17: memref<960x512xf32, #tpu.memory_space<vmem>>, %arg18: memref<1x512xf32, #tpu.memory_space<vmem>>, %arg19: memref<512x256xf32, #tpu.memory_space<vmem>>, %arg20: memref<1x256xf32, #tpu.memory_space<vmem>>, %arg21: memref<1x1x256xf32, #tpu.memory_space<vmem>>) attributes {dimension_semantics = [#tpu.dimension_semantics<parallel>], iteration_bounds = array<i64: 2>, scalar_prefetch = 0 : i64, scratch_operands = 0 : i64, tpu.core_type = #tpu.core_type<tc>, window_params = [{transform_indices = @transform_0, window_bounds = array<i64: 1, 256, 27>}, {pipeline_mode = #tpu.pipeline_mode<synchronous>, transform_indices = @transform_1, window_bounds = array<i64: 9, 64, 256>}, {pipeline_mode = #tpu.pipeline_mode<synchronous>, transform_indices = @transform_2, window_bounds = array<i64: 27, 16>}, {pipeline_mode = #tpu.pipeline_mode<synchronous>, transform_indices = @transform_3, window_bounds = array<i64: 1, 16>}, {pipeline_mode = #tpu.pipeline_mode<synchronous>, transform_indices = @transform_4, window_bounds = array<i64: 16, 64>}, {pipeline_mode = #tpu.pipeline_mode<synchronous>, transform_indices = @transform_5, window_bounds = array<i64: 1, 64>}, {pipeline_mode = #tpu.pipeline_mode<synchronous>, transform_indices = @transform_6, window_bounds = array<i64: 9, 64>}, {pipeline_mode = #tpu.pipeline_mode<synchronous>, transform_indices = @transform_7, window_bounds = array<i64: 1, 64>}, {pipeline_mode = #tpu.pipeline_mode<synchronous>, transform_indices = @transform_8, window_bounds = array<i64: 64, 16>}, {pipeline_mode = #tpu.pipeline_mode<synchronous>, transform_indices = @transform_9, window_bounds = array<i64: 1, 16>}, {pipeline_mode = #tpu.pipeline_mode<synchronous>, transform_indices = @transform_10, window_bounds = array<i64: 16, 64>}, {pipeline_mode = #tpu.pipeline_mode<synchronous>, transform_indices = @transform_11, window_bounds = array<i64: 1, 64>}, {pipeline_mode = #tpu.pipeline_mode<synchronous>, transform_indices = @transform_12, window_bounds = array<i64: 64, 24>}, {pipeline_mode = #tpu.pipeline_mode<synchronous>, transform_indices = @transform_13, window_bounds = array<i64: 1, 24>}, {pipeline_mode = #tpu.pipeline_mode<synchronous>, transform_indices = @transform_14, window_bounds = array<i64: 24, 960>}, {pipeline_mode = #tpu.pipeline_mode<synchronous>, transform_indices = @transform_15, window_bounds = array<i64: 1, 960>}, {pipeline_mode = #tpu.pipeline_mode<synchronous>, transform_indices = @transform_16, window_bounds = array<i64: 960, 512>}, {pipeline_mode = #tpu.pipeline_mode<synchronous>, transform_indices = @transform_17, window_bounds = array<i64: 1, 512>}, {pipeline_mode = #tpu.pipeline_mode<synchronous>, transform_indices = @transform_18, window_bounds = array<i64: 512, 256>}, {pipeline_mode = #tpu.pipeline_mode<synchronous>, transform_indices = @transform_19, window_bounds = array<i64: 1, 256>}, {transform_indices = @transform_20, window_bounds = array<i64: 1, 1, 256>}]} {
    %c0 = arith.constant 0 : index
    %c0_0 = arith.constant 0 : index
    %c0_1 = arith.constant 0 : index
    %0 = vector.load %arg1[%c0, %c0_0, %c0_1] : memref<1x256x27xf32, #tpu.memory_space<vmem>>, vector<1x256x27xf32>
    %1 = vector.shape_cast %0 : vector<1x256x27xf32> to vector<256x27xf32>
    %c0_2 = arith.constant 0 : index
    %c0_3 = arith.constant 0 : index
    %2 = vector.load %arg3[%c0_2, %c0_3] : memref<27x16xf32, #tpu.memory_space<vmem>>, vector<27x16xf32>
    %cst = arith.constant dense<0.000000e+00> : vector<256x16xf32>
    %3 = tpu.matmul %1, %2, %cst {dimension_numbers = #tpu.dot_dimension_numbers<[1], [0], [0], [1], [0, 0, 1, 1], [], []>} : vector<256x27xf32>, vector<27x16xf32>, vector<256x16xf32> -> vector<256x16xf32>
    %c0_4 = arith.constant 0 : index
    %c0_5 = arith.constant 0 : index
    %4 = vector.load %arg4[%c0_4, %c0_5] : memref<1x16xf32, #tpu.memory_space<vmem>>, vector<1x16xf32>
    %5 = vector.broadcast %4 : vector<1x16xf32> to vector<256x16xf32>
    %6 = arith.addf %3, %5 : vector<256x16xf32>
    %cst_6 = arith.constant 3.000000e+00 : f32
    %7 = vector.broadcast %cst_6 : f32 to vector<256x16xf32>
    %8 = arith.addf %6, %7 : vector<256x16xf32>
    %cst_7 = arith.constant 0.000000e+00 : f32
    %cst_8 = arith.constant 6.000000e+00 : f32
    %9 = vector.broadcast %cst_7 : f32 to vector<256x16xf32>
    %10 = arith.maximumf %9, %8 : vector<256x16xf32>
    %11 = vector.broadcast %cst_8 : f32 to vector<256x16xf32>
    %12 = arith.minimumf %11, %10 : vector<256x16xf32>
    %13 = arith.mulf %6, %12 : vector<256x16xf32>
    %cst_9 = arith.constant 0.166666672 : f32
    %14 = vector.broadcast %cst_9 : f32 to vector<256x16xf32>
    %15 = arith.mulf %13, %14 : vector<256x16xf32>
    %c0_10 = arith.constant 0 : index
    %c0_11 = arith.constant 0 : index
    %16 = vector.load %arg5[%c0_10, %c0_11] : memref<16x64xf32, #tpu.memory_space<vmem>>, vector<16x64xf32>
    %cst_12 = arith.constant dense<0.000000e+00> : vector<256x64xf32>
    %17 = tpu.matmul %15, %16, %cst_12 {dimension_numbers = #tpu.dot_dimension_numbers<[1], [0], [0], [1], [0, 0, 1, 1], [], []>} : vector<256x16xf32>, vector<16x64xf32>, vector<256x64xf32> -> vector<256x64xf32>
    %c0_13 = arith.constant 0 : index
    %c0_14 = arith.constant 0 : index
    %18 = vector.load %arg6[%c0_13, %c0_14] : memref<1x64xf32, #tpu.memory_space<vmem>>, vector<1x64xf32>
    %19 = vector.broadcast %18 : vector<1x64xf32> to vector<256x64xf32>
    %20 = arith.addf %17, %19 : vector<256x64xf32>
    %cst_15 = arith.constant 0.000000e+00 : f32
    %21 = vector.broadcast %cst_15 : f32 to vector<256x64xf32>
    %22 = arith.maximumf %20, %21 : vector<256x64xf32>
    %c0_16 = arith.constant 0 : index
    %c0_17 = arith.constant 0 : index
    %23 = vector.load %arg7[%c0_16, %c0_17] : memref<9x64xf32, #tpu.memory_space<vmem>>, vector<9x64xf32>
    %cst_18 = arith.constant 0.000000e+00 : f32
    %24 = vector.broadcast %cst_18 : f32 to vector<64x64xf32>
    %c0_19 = arith.constant 0 : index
    %c0_20 = arith.constant 0 : index
    %c0_21 = arith.constant 0 : index
    %25 = vector.load %arg2[%c0_19, %c0_20, %c0_21] : memref<9x64x256xf32, #tpu.memory_space<vmem>>, vector<1x64x256xf32>
    %26 = vector.shape_cast %25 : vector<1x64x256xf32> to vector<64x256xf32>
    %cst_22 = arith.constant dense<0.000000e+00> : vector<64x64xf32>
    %27 = tpu.matmul %26, %22, %cst_22 {dimension_numbers = #tpu.dot_dimension_numbers<[1], [0], [0], [1], [0, 0, 1, 1], [], []>} : vector<64x256xf32>, vector<256x64xf32>, vector<64x64xf32> -> vector<64x64xf32>
    %28 = vector.extract_strided_slice %23 {offsets = [0, 0], sizes = [1, 64], strides = [1, 1]} : vector<9x64xf32> to vector<1x64xf32>
    %29 = vector.broadcast %28 : vector<1x64xf32> to vector<64x64xf32>
    %30 = arith.mulf %27, %29 : vector<64x64xf32>
    %31 = arith.addf %24, %30 : vector<64x64xf32>
    %c1 = arith.constant 1 : index
    %c0_23 = arith.constant 0 : index
    %c0_24 = arith.constant 0 : index
    %32 = vector.load %arg2[%c1, %c0_23, %c0_24] : memref<9x64x256xf32, #tpu.memory_space<vmem>>, vector<1x64x256xf32>
    %33 = vector.shape_cast %32 : vector<1x64x256xf32> to vector<64x256xf32>
    %cst_25 = arith.constant dense<0.000000e+00> : vector<64x64xf32>
    %34 = tpu.matmul %33, %22, %cst_25 {dimension_numbers = #tpu.dot_dimension_numbers<[1], [0], [0], [1], [0, 0, 1, 1], [], []>} : vector<64x256xf32>, vector<256x64xf32>, vector<64x64xf32> -> vector<64x64xf32>
    %35 = vector.extract_strided_slice %23 {offsets = [1, 0], sizes = [1, 64], strides = [1, 1]} : vector<9x64xf32> to vector<1x64xf32>
    %36 = vector.broadcast %35 : vector<1x64xf32> to vector<64x64xf32>
    %37 = arith.mulf %34, %36 : vector<64x64xf32>
    %38 = arith.addf %31, %37 : vector<64x64xf32>
    %c2 = arith.constant 2 : index
    %c0_26 = arith.constant 0 : index
    %c0_27 = arith.constant 0 : index
    %39 = vector.load %arg2[%c2, %c0_26, %c0_27] : memref<9x64x256xf32, #tpu.memory_space<vmem>>, vector<1x64x256xf32>
    %40 = vector.shape_cast %39 : vector<1x64x256xf32> to vector<64x256xf32>
    %cst_28 = arith.constant dense<0.000000e+00> : vector<64x64xf32>
    %41 = tpu.matmul %40, %22, %cst_28 {dimension_numbers = #tpu.dot_dimension_numbers<[1], [0], [0], [1], [0, 0, 1, 1], [], []>} : vector<64x256xf32>, vector<256x64xf32>, vector<64x64xf32> -> vector<64x64xf32>
    %42 = vector.extract_strided_slice %23 {offsets = [2, 0], sizes = [1, 64], strides = [1, 1]} : vector<9x64xf32> to vector<1x64xf32>
    %43 = vector.broadcast %42 : vector<1x64xf32> to vector<64x64xf32>
    %44 = arith.mulf %41, %43 : vector<64x64xf32>
    %45 = arith.addf %38, %44 : vector<64x64xf32>
    %c3 = arith.constant 3 : index
    %c0_29 = arith.constant 0 : index
    %c0_30 = arith.constant 0 : index
    %46 = vector.load %arg2[%c3, %c0_29, %c0_30] : memref<9x64x256xf32, #tpu.memory_space<vmem>>, vector<1x64x256xf32>
    %47 = vector.shape_cast %46 : vector<1x64x256xf32> to vector<64x256xf32>
    %cst_31 = arith.constant dense<0.000000e+00> : vector<64x64xf32>
    %48 = tpu.matmul %47, %22, %cst_31 {dimension_numbers = #tpu.dot_dimension_numbers<[1], [0], [0], [1], [0, 0, 1, 1], [], []>} : vector<64x256xf32>, vector<256x64xf32>, vector<64x64xf32> -> vector<64x64xf32>
    %49 = vector.extract_strided_slice %23 {offsets = [3, 0], sizes = [1, 64], strides = [1, 1]} : vector<9x64xf32> to vector<1x64xf32>
    %50 = vector.broadcast %49 : vector<1x64xf32> to vector<64x64xf32>
    %51 = arith.mulf %48, %50 : vector<64x64xf32>
    %52 = arith.addf %45, %51 : vector<64x64xf32>
    %c4 = arith.constant 4 : index
    %c0_32 = arith.constant 0 : index
    %c0_33 = arith.constant 0 : index
    %53 = vector.load %arg2[%c4, %c0_32, %c0_33] : memref<9x64x256xf32, #tpu.memory_space<vmem>>, vector<1x64x256xf32>
    %54 = vector.shape_cast %53 : vector<1x64x256xf32> to vector<64x256xf32>
    %cst_34 = arith.constant dense<0.000000e+00> : vector<64x64xf32>
    %55 = tpu.matmul %54, %22, %cst_34 {dimension_numbers = #tpu.dot_dimension_numbers<[1], [0], [0], [1], [0, 0, 1, 1], [], []>} : vector<64x256xf32>, vector<256x64xf32>, vector<64x64xf32> -> vector<64x64xf32>
    %56 = vector.extract_strided_slice %23 {offsets = [4, 0], sizes = [1, 64], strides = [1, 1]} : vector<9x64xf32> to vector<1x64xf32>
    %57 = vector.broadcast %56 : vector<1x64xf32> to vector<64x64xf32>
    %58 = arith.mulf %55, %57 : vector<64x64xf32>
    %59 = arith.addf %52, %58 : vector<64x64xf32>
    %c5 = arith.constant 5 : index
    %c0_35 = arith.constant 0 : index
    %c0_36 = arith.constant 0 : index
    %60 = vector.load %arg2[%c5, %c0_35, %c0_36] : memref<9x64x256xf32, #tpu.memory_space<vmem>>, vector<1x64x256xf32>
    %61 = vector.shape_cast %60 : vector<1x64x256xf32> to vector<64x256xf32>
    %cst_37 = arith.constant dense<0.000000e+00> : vector<64x64xf32>
    %62 = tpu.matmul %61, %22, %cst_37 {dimension_numbers = #tpu.dot_dimension_numbers<[1], [0], [0], [1], [0, 0, 1, 1], [], []>} : vector<64x256xf32>, vector<256x64xf32>, vector<64x64xf32> -> vector<64x64xf32>
    %63 = vector.extract_strided_slice %23 {offsets = [5, 0], sizes = [1, 64], strides = [1, 1]} : vector<9x64xf32> to vector<1x64xf32>
    %64 = vector.broadcast %63 : vector<1x64xf32> to vector<64x64xf32>
    %65 = arith.mulf %62, %64 : vector<64x64xf32>
    %66 = arith.addf %59, %65 : vector<64x64xf32>
    %c6 = arith.constant 6 : index
    %c0_38 = arith.constant 0 : index
    %c0_39 = arith.constant 0 : index
    %67 = vector.load %arg2[%c6, %c0_38, %c0_39] : memref<9x64x256xf32, #tpu.memory_space<vmem>>, vector<1x64x256xf32>
    %68 = vector.shape_cast %67 : vector<1x64x256xf32> to vector<64x256xf32>
    %cst_40 = arith.constant dense<0.000000e+00> : vector<64x64xf32>
    %69 = tpu.matmul %68, %22, %cst_40 {dimension_numbers = #tpu.dot_dimension_numbers<[1], [0], [0], [1], [0, 0, 1, 1], [], []>} : vector<64x256xf32>, vector<256x64xf32>, vector<64x64xf32> -> vector<64x64xf32>
    %70 = vector.extract_strided_slice %23 {offsets = [6, 0], sizes = [1, 64], strides = [1, 1]} : vector<9x64xf32> to vector<1x64xf32>
    %71 = vector.broadcast %70 : vector<1x64xf32> to vector<64x64xf32>
    %72 = arith.mulf %69, %71 : vector<64x64xf32>
    %73 = arith.addf %66, %72 : vector<64x64xf32>
    %c7 = arith.constant 7 : index
    %c0_41 = arith.constant 0 : index
    %c0_42 = arith.constant 0 : index
    %74 = vector.load %arg2[%c7, %c0_41, %c0_42] : memref<9x64x256xf32, #tpu.memory_space<vmem>>, vector<1x64x256xf32>
    %75 = vector.shape_cast %74 : vector<1x64x256xf32> to vector<64x256xf32>
    %cst_43 = arith.constant dense<0.000000e+00> : vector<64x64xf32>
    %76 = tpu.matmul %75, %22, %cst_43 {dimension_numbers = #tpu.dot_dimension_numbers<[1], [0], [0], [1], [0, 0, 1, 1], [], []>} : vector<64x256xf32>, vector<256x64xf32>, vector<64x64xf32> -> vector<64x64xf32>
    %77 = vector.extract_strided_slice %23 {offsets = [7, 0], sizes = [1, 64], strides = [1, 1]} : vector<9x64xf32> to vector<1x64xf32>
    %78 = vector.broadcast %77 : vector<1x64xf32> to vector<64x64xf32>
    %79 = arith.mulf %76, %78 : vector<64x64xf32>
    %80 = arith.addf %73, %79 : vector<64x64xf32>
    %c8 = arith.constant 8 : index
    %c0_44 = arith.constant 0 : index
    %c0_45 = arith.constant 0 : index
    %81 = vector.load %arg2[%c8, %c0_44, %c0_45] : memref<9x64x256xf32, #tpu.memory_space<vmem>>, vector<1x64x256xf32>
    %82 = vector.shape_cast %81 : vector<1x64x256xf32> to vector<64x256xf32>
    %cst_46 = arith.constant dense<0.000000e+00> : vector<64x64xf32>
    %83 = tpu.matmul %82, %22, %cst_46 {dimension_numbers = #tpu.dot_dimension_numbers<[1], [0], [0], [1], [0, 0, 1, 1], [], []>} : vector<64x256xf32>, vector<256x64xf32>, vector<64x64xf32> -> vector<64x64xf32>
    %84 = vector.extract_strided_slice %23 {offsets = [8, 0], sizes = [1, 64], strides = [1, 1]} : vector<9x64xf32> to vector<1x64xf32>
    %85 = vector.broadcast %84 : vector<1x64xf32> to vector<64x64xf32>
    %86 = arith.mulf %83, %85 : vector<64x64xf32>
    %87 = arith.addf %80, %86 : vector<64x64xf32>
    %c0_47 = arith.constant 0 : index
    %c0_48 = arith.constant 0 : index
    %88 = vector.load %arg8[%c0_47, %c0_48] : memref<1x64xf32, #tpu.memory_space<vmem>>, vector<1x64xf32>
    %89 = vector.broadcast %88 : vector<1x64xf32> to vector<64x64xf32>
    %90 = arith.addf %87, %89 : vector<64x64xf32>
    %cst_49 = arith.constant 0.000000e+00 : f32
    %91 = vector.broadcast %cst_49 : f32 to vector<64x64xf32>
    %92 = arith.maximumf %90, %91 : vector<64x64xf32>
    %cst_50 = arith.constant dense<0.000000e+00> : vector<64xf32>
    %93 = vector.multi_reduction <add>, %92, %cst_50 [0] : vector<64x64xf32> to vector<64xf32>
    %94 = vector.shape_cast %93 : vector<64xf32> to vector<1x64xf32>
    %cst_51 = arith.constant 1.562500e-02 : f32
    %95 = vector.broadcast %cst_51 : f32 to vector<1x64xf32>
    %96 = arith.mulf %94, %95 : vector<1x64xf32>
    %c0_52 = arith.constant 0 : index
    %c0_53 = arith.constant 0 : index
    %97 = vector.load %arg9[%c0_52, %c0_53] : memref<64x16xf32, #tpu.memory_space<vmem>>, vector<64x16xf32>
    %cst_54 = arith.constant dense<0.000000e+00> : vector<1x16xf32>
    %98 = tpu.matmul %96, %97, %cst_54 {dimension_numbers = #tpu.dot_dimension_numbers<[1], [0], [0], [1], [0, 0, 1, 1], [], []>} : vector<1x64xf32>, vector<64x16xf32>, vector<1x16xf32> -> vector<1x16xf32>
    %c0_55 = arith.constant 0 : index
    %c0_56 = arith.constant 0 : index
    %99 = vector.load %arg10[%c0_55, %c0_56] : memref<1x16xf32, #tpu.memory_space<vmem>>, vector<1x16xf32>
    %100 = arith.addf %98, %99 : vector<1x16xf32>
    %cst_57 = arith.constant 0.000000e+00 : f32
    %101 = vector.broadcast %cst_57 : f32 to vector<1x16xf32>
    %102 = arith.maximumf %100, %101 : vector<1x16xf32>
    %c0_58 = arith.constant 0 : index
    %c0_59 = arith.constant 0 : index
    %103 = vector.load %arg11[%c0_58, %c0_59] : memref<16x64xf32, #tpu.memory_space<vmem>>, vector<16x64xf32>
    %cst_60 = arith.constant dense<0.000000e+00> : vector<1x64xf32>
    %104 = tpu.matmul %102, %103, %cst_60 {dimension_numbers = #tpu.dot_dimension_numbers<[1], [0], [0], [1], [0, 0, 1, 1], [], []>} : vector<1x16xf32>, vector<16x64xf32>, vector<1x64xf32> -> vector<1x64xf32>
    %c0_61 = arith.constant 0 : index
    %c0_62 = arith.constant 0 : index
    %105 = vector.load %arg12[%c0_61, %c0_62] : memref<1x64xf32, #tpu.memory_space<vmem>>, vector<1x64xf32>
    %106 = arith.addf %104, %105 : vector<1x64xf32>
    %cst_63 = arith.constant 3.000000e+00 : f32
    %107 = vector.broadcast %cst_63 : f32 to vector<1x64xf32>
    %108 = arith.addf %106, %107 : vector<1x64xf32>
    %cst_64 = arith.constant 0.000000e+00 : f32
    %cst_65 = arith.constant 6.000000e+00 : f32
    %109 = vector.broadcast %cst_64 : f32 to vector<1x64xf32>
    %110 = arith.maximumf %109, %108 : vector<1x64xf32>
    %111 = vector.broadcast %cst_65 : f32 to vector<1x64xf32>
    %112 = arith.minimumf %111, %110 : vector<1x64xf32>
    %cst_66 = arith.constant 0.166666672 : f32
    %113 = vector.broadcast %cst_66 : f32 to vector<1x64xf32>
    %114 = arith.mulf %112, %113 : vector<1x64xf32>
    %115 = vector.broadcast %114 : vector<1x64xf32> to vector<64x64xf32>
    %116 = arith.mulf %92, %115 : vector<64x64xf32>
    %c0_67 = arith.constant 0 : index
    %c0_68 = arith.constant 0 : index
    %117 = vector.load %arg13[%c0_67, %c0_68] : memref<64x24xf32, #tpu.memory_space<vmem>>, vector<64x24xf32>
    %cst_69 = arith.constant dense<0.000000e+00> : vector<64x24xf32>
    %118 = tpu.matmul %116, %117, %cst_69 {dimension_numbers = #tpu.dot_dimension_numbers<[1], [0], [0], [1], [0, 0, 1, 1], [], []>} : vector<64x64xf32>, vector<64x24xf32>, vector<64x24xf32> -> vector<64x24xf32>
    %c0_70 = arith.constant 0 : index
    %c0_71 = arith.constant 0 : index
    %119 = vector.load %arg14[%c0_70, %c0_71] : memref<1x24xf32, #tpu.memory_space<vmem>>, vector<1x24xf32>
    %120 = vector.broadcast %119 : vector<1x24xf32> to vector<64x24xf32>
    %121 = arith.addf %118, %120 : vector<64x24xf32>
    %c0_72 = arith.constant 0 : index
    %c0_73 = arith.constant 0 : index
    %122 = vector.load %arg15[%c0_72, %c0_73] : memref<24x960xf32, #tpu.memory_space<vmem>>, vector<24x960xf32>
    %cst_74 = arith.constant dense<0.000000e+00> : vector<64x960xf32>
    %123 = tpu.matmul %121, %122, %cst_74 {dimension_numbers = #tpu.dot_dimension_numbers<[1], [0], [0], [1], [0, 0, 1, 1], [], []>} : vector<64x24xf32>, vector<24x960xf32>, vector<64x960xf32> -> vector<64x960xf32>
    %c0_75 = arith.constant 0 : index
    %c0_76 = arith.constant 0 : index
    %124 = vector.load %arg16[%c0_75, %c0_76] : memref<1x960xf32, #tpu.memory_space<vmem>>, vector<1x960xf32>
    %125 = vector.broadcast %124 : vector<1x960xf32> to vector<64x960xf32>
    %126 = arith.addf %123, %125 : vector<64x960xf32>
    %cst_77 = arith.constant 3.000000e+00 : f32
    %127 = vector.broadcast %cst_77 : f32 to vector<64x960xf32>
    %128 = arith.addf %126, %127 : vector<64x960xf32>
    %cst_78 = arith.constant 0.000000e+00 : f32
    %cst_79 = arith.constant 6.000000e+00 : f32
    %129 = vector.broadcast %cst_78 : f32 to vector<64x960xf32>
    %130 = arith.maximumf %129, %128 : vector<64x960xf32>
    %131 = vector.broadcast %cst_79 : f32 to vector<64x960xf32>
    %132 = arith.minimumf %131, %130 : vector<64x960xf32>
    %133 = arith.mulf %126, %132 : vector<64x960xf32>
    %cst_80 = arith.constant 0.166666672 : f32
    %134 = vector.broadcast %cst_80 : f32 to vector<64x960xf32>
    %135 = arith.mulf %133, %134 : vector<64x960xf32>
    %cst_81 = arith.constant dense<0.000000e+00> : vector<960xf32>
    %136 = vector.multi_reduction <add>, %135, %cst_81 [0] : vector<64x960xf32> to vector<960xf32>
    %137 = vector.shape_cast %136 : vector<960xf32> to vector<1x960xf32>
    %cst_82 = arith.constant 1.562500e-02 : f32
    %138 = vector.broadcast %cst_82 : f32 to vector<1x960xf32>
    %139 = arith.mulf %137, %138 : vector<1x960xf32>
    %c0_83 = arith.constant 0 : index
    %c0_84 = arith.constant 0 : index
    %140 = vector.load %arg17[%c0_83, %c0_84] : memref<960x512xf32, #tpu.memory_space<vmem>>, vector<960x512xf32>
    %cst_85 = arith.constant dense<0.000000e+00> : vector<1x512xf32>
    %141 = tpu.matmul %139, %140, %cst_85 {dimension_numbers = #tpu.dot_dimension_numbers<[1], [0], [0], [1], [0, 0, 1, 1], [], []>} : vector<1x960xf32>, vector<960x512xf32>, vector<1x512xf32> -> vector<1x512xf32>
    %c0_86 = arith.constant 0 : index
    %c0_87 = arith.constant 0 : index
    %142 = vector.load %arg18[%c0_86, %c0_87] : memref<1x512xf32, #tpu.memory_space<vmem>>, vector<1x512xf32>
    %143 = arith.addf %141, %142 : vector<1x512xf32>
    %cst_88 = arith.constant 0.000000e+00 : f32
    %144 = vector.broadcast %cst_88 : f32 to vector<1x512xf32>
    %145 = arith.maximumf %143, %144 : vector<1x512xf32>
    %c0_89 = arith.constant 0 : index
    %c0_90 = arith.constant 0 : index
    %146 = vector.load %arg19[%c0_89, %c0_90] : memref<512x256xf32, #tpu.memory_space<vmem>>, vector<512x256xf32>
    %cst_91 = arith.constant dense<0.000000e+00> : vector<1x256xf32>
    %147 = tpu.matmul %145, %146, %cst_91 {dimension_numbers = #tpu.dot_dimension_numbers<[1], [0], [0], [1], [0, 0, 1, 1], [], []>} : vector<1x512xf32>, vector<512x256xf32>, vector<1x256xf32> -> vector<1x256xf32>
    %c0_92 = arith.constant 0 : index
    %c0_93 = arith.constant 0 : index
    %148 = vector.load %arg20[%c0_92, %c0_93] : memref<1x256xf32, #tpu.memory_space<vmem>>, vector<1x256xf32>
    %149 = arith.addf %147, %148 : vector<1x256xf32>
    %150 = vector.shape_cast %149 : vector<1x256xf32> to vector<1x1x256xf32>
    %c0_94 = arith.constant 0 : index
    %c0_95 = arith.constant 0 : index
    %c0_96 = arith.constant 0 : index
    %151 = vector.load %arg21[%c0_94, %c0_95, %c0_96] : memref<1x1x256xf32, #tpu.memory_space<vmem>>, vector<1x1x256xf32>
    tpu.vector_store %arg21[%c0_94, %c0_95, %c0_96], %150 {strides = array<i32>} : memref<1x1x256xf32, #tpu.memory_space<vmem>>, vector<1x1x256xf32>,
    return
  }
  func.func @transform_0(%arg0: i32) -> (i32, i32, i32) {
    %c0_i32 = arith.constant 0 : i32
    %c0_i32_0 = arith.constant 0 : i32
    %c0_i32_1 = arith.constant 0 : i32
    return %arg0, %c0_i32, %c0_i32_0 : i32, i32, i32
  }
  func.func @transform_1(%arg0: i32) -> (i32, i32, i32) {
    %c0_i32 = arith.constant 0 : i32
    %c0_i32_0 = arith.constant 0 : i32
    %c0_i32_1 = arith.constant 0 : i32
    %c0_i32_2 = arith.constant 0 : i32
    return %c0_i32, %c0_i32_0, %c0_i32_1 : i32, i32, i32
  }
  func.func @transform_2(%arg0: i32) -> (i32, i32) {
    %c0_i32 = arith.constant 0 : i32
    %c0_i32_0 = arith.constant 0 : i32
    %c0_i32_1 = arith.constant 0 : i32
    return %c0_i32, %c0_i32_0 : i32, i32
  }
  func.func @transform_3(%arg0: i32) -> (i32, i32) {
    %c0_i32 = arith.constant 0 : i32
    %c0_i32_0 = arith.constant 0 : i32
    %c0_i32_1 = arith.constant 0 : i32
    return %c0_i32, %c0_i32_0 : i32, i32
  }
  func.func @transform_4(%arg0: i32) -> (i32, i32) {
    %c0_i32 = arith.constant 0 : i32
    %c0_i32_0 = arith.constant 0 : i32
    %c0_i32_1 = arith.constant 0 : i32
    return %c0_i32, %c0_i32_0 : i32, i32
  }
  func.func @transform_5(%arg0: i32) -> (i32, i32) {
    %c0_i32 = arith.constant 0 : i32
    %c0_i32_0 = arith.constant 0 : i32
    %c0_i32_1 = arith.constant 0 : i32
    return %c0_i32, %c0_i32_0 : i32, i32
  }
  func.func @transform_6(%arg0: i32) -> (i32, i32) {
    %c0_i32 = arith.constant 0 : i32
    %c0_i32_0 = arith.constant 0 : i32
    %c0_i32_1 = arith.constant 0 : i32
    return %c0_i32, %c0_i32_0 : i32, i32
  }
  func.func @transform_7(%arg0: i32) -> (i32, i32) {
    %c0_i32 = arith.constant 0 : i32
    %c0_i32_0 = arith.constant 0 : i32
    %c0_i32_1 = arith.constant 0 : i32
    return %c0_i32, %c0_i32_0 : i32, i32
  }
  func.func @transform_8(%arg0: i32) -> (i32, i32) {
    %c0_i32 = arith.constant 0 : i32
    %c0_i32_0 = arith.constant 0 : i32
    %c0_i32_1 = arith.constant 0 : i32
    return %c0_i32, %c0_i32_0 : i32, i32
  }
  func.func @transform_9(%arg0: i32) -> (i32, i32) {
    %c0_i32 = arith.constant 0 : i32
    %c0_i32_0 = arith.constant 0 : i32
    %c0_i32_1 = arith.constant 0 : i32
    return %c0_i32, %c0_i32_0 : i32, i32
  }
  func.func @transform_10(%arg0: i32) -> (i32, i32) {
    %c0_i32 = arith.constant 0 : i32
    %c0_i32_0 = arith.constant 0 : i32
    %c0_i32_1 = arith.constant 0 : i32
    return %c0_i32, %c0_i32_0 : i32, i32
  }
  func.func @transform_11(%arg0: i32) -> (i32, i32) {
    %c0_i32 = arith.constant 0 : i32
    %c0_i32_0 = arith.constant 0 : i32
    %c0_i32_1 = arith.constant 0 : i32
    return %c0_i32, %c0_i32_0 : i32, i32
  }
  func.func @transform_12(%arg0: i32) -> (i32, i32) {
    %c0_i32 = arith.constant 0 : i32
    %c0_i32_0 = arith.constant 0 : i32
    %c0_i32_1 = arith.constant 0 : i32
    return %c0_i32, %c0_i32_0 : i32, i32
  }
  func.func @transform_13(%arg0: i32) -> (i32, i32) {
    %c0_i32 = arith.constant 0 : i32
    %c0_i32_0 = arith.constant 0 : i32
    %c0_i32_1 = arith.constant 0 : i32
    return %c0_i32, %c0_i32_0 : i32, i32
  }
  func.func @transform_14(%arg0: i32) -> (i32, i32) {
    %c0_i32 = arith.constant 0 : i32
    %c0_i32_0 = arith.constant 0 : i32
    %c0_i32_1 = arith.constant 0 : i32
    return %c0_i32, %c0_i32_0 : i32, i32
  }
  func.func @transform_15(%arg0: i32) -> (i32, i32) {
    %c0_i32 = arith.constant 0 : i32
    %c0_i32_0 = arith.constant 0 : i32
    %c0_i32_1 = arith.constant 0 : i32
    return %c0_i32, %c0_i32_0 : i32, i32
  }
  func.func @transform_16(%arg0: i32) -> (i32, i32) {
    %c0_i32 = arith.constant 0 : i32
    %c0_i32_0 = arith.constant 0 : i32
    %c0_i32_1 = arith.constant 0 : i32
    return %c0_i32, %c0_i32_0 : i32, i32
  }
  func.func @transform_17(%arg0: i32) -> (i32, i32) {
    %c0_i32 = arith.constant 0 : i32
    %c0_i32_0 = arith.constant 0 : i32
    %c0_i32_1 = arith.constant 0 : i32
    return %c0_i32, %c0_i32_0 : i32, i32
  }
  func.func @transform_18(%arg0: i32) -> (i32, i32) {
    %c0_i32 = arith.constant 0 : i32
    %c0_i32_0 = arith.constant 0 : i32
    %c0_i32_1 = arith.constant 0 : i32
    return %c0_i32, %c0_i32_0 : i32, i32
  }
  func.func @transform_19(%arg0: i32) -> (i32, i32) {
    %c0_i32 = arith.constant 0 : i32
    %c0_i32_0 = arith.constant 0 : i32
    %c0_i32_1 = arith.constant 0 : i32
    return %c0_i32, %c0_i32_0 : i32, i32
  }
  func.func @transform_20(%arg0: i32) -> (i32, i32, i32) {
    %c0_i32 = arith.constant 0 : i32
    %c0_i32_0 = arith.constant 0 : i32
    %c0_i32_1 = arith.constant 0 : i32
    return %arg0, %c0_i32, %c0_i32_0 : i32, i32, i32
  }
}

</mosaic_0001>

<bundles_post_ra>
// kernel: l2cs_mobile_forward.1
= control target key start
LH: loop header
LB: loop body
LE: loop exit
PB: predicated region body
PF: predicated region fallthrough
CT: control target
= control target key end

     0   :  { %s10935_s0 = inlined_call_operand.vmem [shape: f32[2,256,27], index: 0, kind: input, shape index: {}]   ;;  %s10936_s1 = inlined_call_operand.vmem [shape: f32[9,64,256], index: 1, kind: input, shape index: {}]   ;;  %s10937_s2 = inlined_call_operand.vmem [shape: f32[27,16], index: 2, kind: input, shape index: {}]   ;;  %s10938_s3 = inlined_call_operand.vmem [shape: f32[1,16], index: 3, kind: input, shape index: {}]   ;;  %s10939_s4 = inlined_call_operand.vmem [shape: f32[16,64], index: 4, kind: input, shape index: {}]   ;;  %s10940_s5 = inlined_call_operand.vmem [shape: f32[1,64], index: 5, kind: input, shape index: {}]   ;;  %s10941_s6 = inlined_call_operand.vmem [shape: f32[9,64], index: 6, kind: input, shape index: {}]   ;;  %s10942_s7 = inlined_call_operand.vmem [shape: f32[1,64], index: 7, kind: input, shape index: {}]   ;;  %s10943_s8 = inlined_call_operand.vmem [shape: f32[64,16], index: 8, kind: input, shape index: {}]   ;;  %s10944_s9 = inlined_call_operand.vmem [shape: f32[1,16], index: 9, kind: input, shape index: {}]   ;;  %s10945_s10 = inlined_call_operand.vmem [shape: f32[16,64], index: 10, kind: input, shape index: {}]   ;;  %s10946_s11 = inlined_call_operand.vmem [shape: f32[1,64], index: 11, kind: input, shape index: {}]   ;;  %s10947_s12 = inlined_call_operand.vmem [shape: f32[64,24], index: 12, kind: input, shape index: {}]   ;;  %s10948_s13 = inlined_call_operand.vmem [shape: f32[1,24], index: 13, kind: input, shape index: {}]   ;;  %s10949_s14 = inlined_call_operand.vmem [shape: f32[24,960], index: 14, kind: input, shape index: {}]   ;;  %s10950_s15 = inlined_call_operand.vmem [shape: f32[1,960], index: 15, kind: input, shape index: {}]   ;;  %s10951_s16 = inlined_call_operand.vmem [shape: f32[960,512], index: 16, kind: input, shape index: {}]   ;;  %s10952_s17 = inlined_call_operand.vmem [shape: f32[1,512], index: 17, kind: input, shape index: {}]   ;;  %s10953_s18 = inlined_call_operand.hbm [shape: f32[512,256], index: 18, kind: input, shape index: {}]   ;;  %s10954_s19 = inlined_call_operand.vmem [shape: f32[1,256], index: 19, kind: input, shape index: {}]   ;;  %s10955_s20 = inlined_call_operand.vmem [shape: f32[2,1,256], index: 20, kind: output, shape index: {}]  }
   0x1   :  { %10974 = sst [smem:[#allocation16_spill]] %s10935_s0 }
   0x2   :  { %10975 = sst [smem:[#allocation17_spill]] %s10936_s1 }
   0x3   :  { %10976 = sst [smem:[#allocation18_spill]] %s10937_s2 }
   0x4   :  { %10977 = sst [smem:[#allocation19_spill]] %s10938_s3 }
   0x5   :  { %10978 = sst [smem:[#allocation20_spill]] %s10939_s4 }
   0x6   :  { %25 = vsyncpa [#allocation3], 0  ;;  %s7784_s1 = smov 0  }
   0x7 LB: > { %s7790_s22 = sadd.s32 4294967295, %s7669_s1   ;;  %p5611_p0 = scmp.ge.s32.totalorder %s7669_s1, 1  ;;  %s7669_s1 = sphi %s7784_s1, %s31_s1  }
   0x8   : > { %p487_p1 = scmp.lt.s32.totalorder %s7669_s1, 3  ;;  %s7671_s23 = smov [#allocation2]  }
   0x9   : > { %s550_s24 = sshll.u32 %s7671_s23, 4  ;;  %p10959_p3 = scmp.eq.s32.totalorder %s7790_s22, 0  ;;  %s551_s24 = int_to_ptr.vmem [resolvable:$true] %s550_s24 }
   0xa   : > { %p7794_p2 = pnand %p5611_p0, %p487_p1  ;;  %s7631_s27 = scalar_lea.hbm %s10953_s18, 16384 }
   0xb   : > { %p7632_p6 = scmp.ne.s32.totalorder %s10953_s18, %s7631_s27  ;;  %p7638_p10 = scmp.lt.u32.totalorder %s7631_s27, %s10953_s18 }
   0xc   : > { %s10979_s2 = scalar_select %p7794_p2, 1, 0 }
   0xd   : > { %p7609_p4 = pneg %p7794_p2 }
   0xf   : > { %p7803_p5 = pnand %p10959_p3, %p7609_p4 }
  0x11   : > { %p7633_p7 = pneg %p7803_p5 }
  0x13   : > { %p7634_p8 = pnand %p7633_p7, %p7632_p6 }
  0x15   : > { %p7635_p9 = pneg %p7634_p8 }
  0x17   : > { %p7640_p11 = pnand %p7638_p10, %p7635_p9 }
  0x19   : > { %7643 = shalt.err (!%p7640_p11)
}
  0x1a   : > { %s7644_s0 = scalar_lea.vmem %s551_s24, 16384  ;;  %p7652_p1 = scmp.lt.s32.totalorder %s551_s24, %s551_s24 }
  0x1b   : > { %p7645_p12 = scmp.ne.s32.totalorder %s551_s24, %s7644_s0  ;;  %p7653_p4 = scmp.lt.s32.totalorder %s7644_s0, %s7644_s0 }
  0x1d   : > { %p7647_p13 = pnand %p7645_p12, %p7633_p7  ;;  %p7654_p3 = por %p7653_p4, %p7652_p1 }
  0x1f   : > { %p7648_p0 = pneg %p7647_p13 }
  0x21   : > { %p7655_p2 = pnand %p7654_p3, %p7648_p0 }
  0x23   : > { %7658 = shalt.err (!%p7655_p2)
}
  0x24   : > { %s7672_s21 = smov 256   ;;  %s7673_s23 = smov 16  }
  0x25   : > { %7612 = dma.hbm_to_vmem [thread:$0]  (!%p7803_p5), %s10953_s18, 16384, %s551_s24, [#allocation3], %s7672_s21, %s7672_s21, %s7673_s23  }
  0x26   : > { %p10981_p6 = scmp.ne.s32.totalorder %s10979_s2, 0 }
  0x28   : > { %577 = sbr.rel (%p10981_p6) target bundleno = 2642 (0xa52), region = 100 }
  0x2f   : > { %p10982_p8 = scmp.eq.s32.totalorder %s7790_s22, 0 }
  0x31   : > { %7664 = dma.done.wait (%p10982_p8), [#allocation3], 16384   ;;  %p10983_p7 = pmov %p10982_p8 }
  0x32   : > { %p634_p2 = scmp.lt.s32.totalorder %s7790_s22, 1  ;;  %s10984_s4 = sld [smem:[#allocation16_spill]]  ;;  %vm783_vm0 = vcmask 1042432   ;;  %vm686_vm1 = vcmask 220160   ;;  %vm7674_vm2 = vmmov 1   ;;  %vm1181_vm4 = vcmask 130048  }
  0x33   : > { %7666 = vsyncadd (%p10983_p7), [#allocation3], 4294950912  ;;  %s10985_s30 = sld [smem:[#allocation18_spill]]  ;;  %s10987_s23 = sld [smem:[#allocation19_spill]]  ;;  %vm7676_vm5 = vmmov 0   ;;  %vm2837_vm6 = vcmask 523264  }
  0x34   : > { %s11016_s22 = smov (!%p634_p2, %s7790_s22), 1  ;;  %vm6633_vm3 = vmpackc.low %vm783_vm0, %vm7674_vm2  ;;  %s10988_s26 = sld [smem:[#allocation17_spill]]  ;;  %vm3245_vm7 = vcmask 195584  }
  0x35   : > { %s5863_s25 = sshll.u32 %s11016_s22, 8 }
  0x38   : > { %s7837_s24 = scalar_lea.vmem %s10984_s4, %s5863_s25  ;;  %s10986_s4 = sld [smem:[#allocation20_spill]] }
  0x39   : > { %v675_v0 = vld [vmem:[%s10985_s30] sm:$0xff]  ;;  %v676_v1 = vld [vmem:[%s10985_s30 + $0x8] sm:$0xff]  ;;  %v677_v2 = vld [vmem:[%s10985_s30 + $0x10] sm:$0xff] }
  0x3a   : > { %v6628_v3 = vpack.c.bf16 %v676_v1, %v675_v0  ;;  %v678_v4 = vld [vmem:[%s10985_s30 + $0x18] sm:$0x7]  ;;  %v643_v5 = vld [vmem:[%s7837_s24] sm:$0xff]  ;;  %v644_v7 = vld [vmem:[%s7837_s24 + $0x8] sm:$0xff] }
  0x3b   : > { %v6632_v6 = vpack.c.bf16 %v678_v4, %v677_v2  ;;  %6474 = vmatprep.mubr.msk.f32.mxu0 %vm686_vm1, %v643_v5  ;;  %v645_v8 = vld [vmem:[%s7837_s24 + $0x10] sm:$0xff]  ;;  %v646_v9 = vld [vmem:[%s7837_s24 + $0x18] sm:$0xff]  ;;  %v647_v10 = vld [vmem:[%s7837_s24 + $0x20] sm:$0xff] }
  0x3c   : > { %6629 = vmatprep.subr.bf16.mxu0 %v6628_v3  ;;  %v648_v11 = vld [vmem:[%s7837_s24 + $0x28] sm:$0xff]  ;;  %v649_v12 = vld [vmem:[%s7837_s24 + $0x30] sm:$0xff]  ;;  %v650_v13 = vld [vmem:[%s7837_s24 + $0x38] sm:$0xff] }
  0x3d   : > { %6631 = vmatpush3.bf16.msra.mxu0 %v6628_v3  ;;  %v651_v14 = vld [vmem:[%s7837_s24 + $0x40] sm:$0xff]  ;;  %v652_v15 = vld [vmem:[%s7837_s24 + $0x48] sm:$0xff]  ;;  %v653_v16 = vld [vmem:[%s7837_s24 + $0x50] sm:$0xff] }
  0x3e   : > { %6634 = vmatprep.subr.msk.bf16.mxu0 %vm6633_vm3, %v6632_v6  ;;  %v654_v17 = vld [vmem:[%s7837_s24 + $0x58] sm:$0xff]  ;;  %v655_v18 = vld [vmem:[%s7837_s24 + $0x60] sm:$0xff]  ;;  %v656_v19 = vld [vmem:[%s7837_s24 + $0x68] sm:$0xff] }
  0x3f   : > { %v657_v20 = vld [vmem:[%s7837_s24 + $0x70] sm:$0xff]  ;;  %v658_v21 = vld [vmem:[%s7837_s24 + $0x78] sm:$0xff]  ;;  %v659_v22 = vld [vmem:[%s7837_s24 + $0x80] sm:$0xff] }
  0x40   : > { %v660_v23 = vld [vmem:[%s7837_s24 + $0x88] sm:$0xff]  ;;  %v661_v24 = vld [vmem:[%s7837_s24 + $0x90] sm:$0xff]  ;;  %v662_v25 = vld [vmem:[%s7837_s24 + $0x98] sm:$0xff] }
  0x41   : > { %6637 = vmatpush3.bf16.msk.msra.mxu0 %vm6633_vm3, %v6632_v6  ;;  %v663_v26 = vld [vmem:[%s7837_s24 + $0xa0] sm:$0xff]  ;;  %v664_v27 = vld [vmem:[%s7837_s24 + $0xa8] sm:$0xff]  ;;  %v665_v28 = vld [vmem:[%s7837_s24 + $0xb0] sm:$0xff] }
  0x42   : > { %v666_v29 = vld [vmem:[%s7837_s24 + $0xb8] sm:$0xff]  ;;  %v667_v30 = vld [vmem:[%s7837_s24 + $0xc0] sm:$0xff]  ;;  %v668_v31 = vld [vmem:[%s7837_s24 + $0xc8] sm:$0xff] }
  0x43   : > { %v669_v32 = vld [vmem:[%s7837_s24 + $0xd0] sm:$0xff]  ;;  %v670_v33 = vld [vmem:[%s7837_s24 + $0xd8] sm:$0xff]  ;;  %v671_v34 = vld [vmem:[%s7837_s24 + $0xe0] sm:$0xff] }
  0x44   : > { %6475 = vmatmul.mubr.msk.f32.vlgmr.msra.gmra.mrb[0].mxu0 %vm686_vm1, %v644_v7  ;;  %v672_v35 = vld [vmem:[%s7837_s24 + $0xe8] sm:$0xff]  ;;  %v673_v36 = vld [vmem:[%s7837_s24 + $0xf0] sm:$0xff]  ;;  %v674_v37 = vld [vmem:[%s7837_s24 + $0xf8] sm:$0xff] }
  0x45   : > { %6477 = vmatprep.mubr.msk.f32.mxu0 %vm686_vm1, %v645_v8  ;;  %v1172_v38 = vld [vmem:[%s10986_s4] sm:$0xff]  ;;  %v1173_v39 = vld [vmem:[%s10986_s4 + $0x8] sm:$0xff] }
  0x46   : > { %v6638_v40 = vpack.c.bf16 %v1173_v39, %v1172_v38  ;;  %v7924_v41 = vld [vmem:[%s10987_s23] ss:$0 sm:$0xff]  ;;  %s5618_s23 = sshll.u32 %s11016_s22, 1 }
  0x47   : > { %s642_s25 = scalar_lea.vmem %s10955_s20, %s5618_s23 }
  0x48   : > { %6478 = vmatmul.mubr.msk.f32.gmra.mrb[2].mxu0 %vm686_vm1, %v646_v9  ;;  %6639 = vmatprep.subr.bf16.mxu1 %v6638_v40 }
  0x49   : > { %6480 = vmatprep.mubr.msk.f32.mxu0 %vm686_vm1, %v647_v10  ;;  %6641 = vmatpush3.bf16.msra.mxu1 %v6638_v40 }
  0x4c   : > { %6481 = vmatmul.mubr.msk.f32.gmra.mrb[4].mxu0 %vm686_vm1, %v648_v11 }
  0x4d   : > { %6483 = vmatprep.mubr.msk.f32.mxu0 %vm686_vm1, %v649_v12 }
  0x50   : > { %6484 = vmatmul.mubr.msk.f32.gmra.mrb[6].mxu0 %vm686_vm1, %v650_v13 }
  0x51   : > { %6486 = vmatprep.mubr.msk.f32.mxu0 %vm686_vm1, %v651_v14 }
  0x54   : > { %6487 = vmatmul.mubr.msk.f32.gmra.mrb[8].mxu0 %vm686_vm1, %v652_v15 }
  0x55   : > { %6489 = vmatprep.mubr.msk.f32.mxu0 %vm686_vm1, %v653_v16 }
  0x58   : > { %6490 = vmatmul.mubr.msk.f32.gmra.mrb[10].mxu0 %vm686_vm1, %v654_v17 }
  0x59   : > { %6492 = vmatprep.mubr.msk.f32.mxu0 %vm686_vm1, %v655_v18 }
  0x5c   : > { %6493 = vmatmul.mubr.msk.f32.gmra.mrb[12].mxu0 %vm686_vm1, %v656_v19 }
  0x5d   : > { %6495 = vmatprep.mubr.msk.f32.mxu0 %vm686_vm1, %v657_v20 }
  0x60   : > { %6496 = vmatmul.mubr.msk.f32.gmra.mrb[14].mxu0 %vm686_vm1, %v658_v21 }
  0x61   : > { %6498 = vmatprep.mubr.msk.f32.mxu0 %vm686_vm1, %v659_v22 }
  0x64   : > { %6499 = vmatmul.mubr.msk.f32.gmra.mrb[16].mxu0 %vm686_vm1, %v660_v23 }
  0x65   : > { %6501 = vmatprep.mubr.msk.f32.mxu0 %vm686_vm1, %v661_v24 }
  0x68   : > { %6502 = vmatmul.mubr.msk.f32.gmra.mrb[18].mxu0 %vm686_vm1, %v662_v25 }
  0x69   : > { %6504 = vmatprep.mubr.msk.f32.mxu0 %vm686_vm1, %v663_v26 }
  0x6c   : > { %6505 = vmatmul.mubr.msk.f32.gmra.mrb[20].mxu0 %vm686_vm1, %v664_v27 }
  0x6d   : > { %6507 = vmatprep.mubr.msk.f32.mxu0 %vm686_vm1, %v665_v28 }
  0x70   : > { %6508 = vmatmul.mubr.msk.f32.gmra.mrb[22].mxu0 %vm686_vm1, %v666_v29 }
  0x71   : > { %6510 = vmatprep.mubr.msk.f32.mxu0 %vm686_vm1, %v667_v30 }
  0x74   : > { %6511 = vmatmul.mubr.msk.f32.gmra.mrb[24].mxu0 %vm686_vm1, %v668_v31 }
  0x75   : > { %6513 = vmatprep.mubr.msk.f32.mxu0 %vm686_vm1, %v669_v32 }
  0x78   : > { %6514 = vmatmul.mubr.msk.f32.gmra.mrb[26].mxu0 %vm686_vm1, %v670_v33 }
  0x79   : > { %6516 = vmatprep.mubr.msk.f32.mxu0 %vm686_vm1, %v671_v34 }
  0x7c   : > { %6517 = vmatmul.mubr.msk.f32.gmra.mrb[28].mxu0 %vm686_vm1, %v672_v35 }
  0x7d   : > { %6519 = vmatprep.mubr.msk.f32.mxu0 %vm686_vm1, %v673_v36 }
  0x80   : > { %6520 = vmatmul.mubr.msk.f32.gmra.mrb[30].mxu0 %vm686_vm1, %v674_v37 }
 0x117   : > { %v6476_v42 = vpop.f32.mrb[0].mxu0 }
 0x118   : > { %v859_v43 = vadd.f32 %v6476_v42, %v7924_v41  ;;  %v853_v44 = vpop.f32.mrb[1].mxu0 }
 0x119   : > { %v854_v45 = vadd.f32 %v7924_v41, %v853_v44 }
 0x11a   : > { %v1013_v46 = vadd.f32 3.0, %v859_v43 }
 0x11b   : > { %v1012_v47 = vadd.f32 3.0, %v854_v45  ;;  %v6479_v48 = vpop.f32.mrb[2].mxu0 }
 0x11c   : > { %v1045_v49 = vmax.f32 %v1013_v46, 0.0  ;;  %v869_v50 = vadd.f32 %v6479_v48, %v7924_v41  ;;  %v863_v51 = vpop.f32.mrb[3].mxu0 }
 0x11d   : > { %v1044_v52 = vmax.f32 %v1012_v47, 0.0  ;;  %v864_v53 = vadd.f32 %v7924_v41, %v863_v51 }
 0x11e   : > { %v1077_v54 = vmin.f32 %v1045_v49, 6.0  ;;  %v1015_v55 = vadd.f32 3.0, %v869_v50 }
 0x11f   : > { %v1076_v56 = vmin.f32 %v1044_v52, 6.0  ;;  %v1014_v57 = vadd.f32 3.0, %v864_v53  ;;  %v6482_v58 = vpop.f32.mrb[4].mxu0 }
 0x120   : > { %v1109_v59 = vmul.f32 %v1077_v54, %v859_v43  ;;  %v1047_v60 = vmax.f32 %v1015_v55, 0.0  ;;  %v879_v61 = vadd.f32 %v6482_v58, %v7924_v41  ;;  %v873_v62 = vpop.f32.mrb[5].mxu0 }
 0x121   : > { %v1046_v63 = vmax.f32 %v1014_v57, 0.0  ;;  %v874_v0 = vadd.f32 %v7924_v41, %v873_v62  ;;  %v1108_v1 = vmul.f32 %v1076_v56, %v854_v45 }
 0x122   : > { %v1079_v2 = vmin.f32 %v1047_v60, 6.0  ;;  %v1017_v3 = vadd.f32 3.0, %v879_v61  ;;  %v1141_v8 = vmul.f32 0.16666667, %v1109_v59 }
 0x123   : > { %v1078_v4 = vmin.f32 %v1046_v63, 6.0  ;;  %v1016_v5 = vadd.f32 3.0, %v874_v0  ;;  %v6485_v6 = vpop.f32.mrb[6].mxu0  ;;  %v1140_v7 = vmul.f32 0.16666667, %v1108_v1 }
 0x124   : > { %v1111_v9 = vmul.f32 %v1079_v2, %v869_v50  ;;  %v1049_v10 = vmax.f32 %v1017_v3, 0.0  ;;  %v889_v11 = vadd.f32 %v6485_v6, %v7924_v41  ;;  %v883_v12 = vpop.f32.mrb[7].mxu0 }
 0x125   : > { %v1110_v13 = vmul.f32 %v1078_v4, %v864_v53  ;;  %v1048_v14 = vmax.f32 %v1016_v5, 0.0  ;;  %v884_v15 = vadd.f32 %v7924_v41, %v883_v12  ;;  %6526 = vmatprep.mubr.msk.f32.mxu1 %vm1181_vm4, %v1140_v7 }
 0x126   : > { %v1081_v16 = vmin.f32 %v1049_v10, 6.0  ;;  %v1019_v17 = vadd.f32 3.0, %v889_v11  ;;  %6527 = vmatmul.mubr.msk.f32.vlgmr.msra.gmra.mrb[0].mxu1 %vm1181_vm4, %v1141_v8  ;;  %v1143_v22 = vmul.f32 0.16666667, %v1111_v9 }
 0x127   : > { %v1142_v18 = vmul.f32 0.16666667, %v1110_v13  ;;  %v1080_v19 = vmin.f32 %v1048_v14, 6.0  ;;  %v1018_v20 = vadd.f32 3.0, %v884_v15  ;;  %v6488_v21 = vpop.f32.mrb[8].mxu0 }
 0x128   : > { %v1113_v23 = vmul.f32 %v1081_v16, %v879_v61  ;;  %v1051_v24 = vmax.f32 %v1019_v17, 0.0  ;;  %v899_v25 = vadd.f32 %v6488_v21, %v7924_v41  ;;  %v893_v26 = vpop.f32.mrb[9].mxu0 }
 0x129   : > { %v1112_v27 = vmul.f32 %v1080_v19, %v874_v0  ;;  %v1050_v28 = vmax.f32 %v1018_v20, 0.0  ;;  %v894_v29 = vadd.f32 %v7924_v41, %v893_v26  ;;  %6529 = vmatprep.mubr.msk.f32.mxu1 %vm1181_vm4, %v1142_v18 }
 0x12a   : > { %v1083_v30 = vmin.f32 %v1051_v24, 6.0  ;;  %v1021_v31 = vadd.f32 3.0, %v899_v25  ;;  %6530 = vmatmul.mubr.msk.f32.gmra.mrb[2].mxu1 %vm1181_vm4, %v1143_v22  ;;  %v1145_v36 = vmul.f32 0.16666667, %v1113_v23 }
 0x12b   : > { %v1144_v32 = vmul.f32 0.16666667, %v1112_v27  ;;  %v1082_v33 = vmin.f32 %v1050_v28, 6.0  ;;  %v1020_v34 = vadd.f32 3.0, %v894_v29  ;;  %v6491_v35 = vpop.f32.mrb[10].mxu0 }
 0x12c   : > { %v1115_v37 = vmul.f32 %v1083_v30, %v889_v11  ;;  %v1053_v38 = vmax.f32 %v1021_v31, 0.0  ;;  %v909_v39 = vadd.f32 %v6491_v35, %v7924_v41  ;;  %v903_v40 = vpop.f32.mrb[11].mxu0 }
 0x12d   : > { %v1114_v42 = vmul.f32 %v1082_v33, %v884_v15  ;;  %v1052_v43 = vmax.f32 %v1020_v34, 0.0  ;;  %v904_v44 = vadd.f32 %v7924_v41, %v903_v40  ;;  %6532 = vmatprep.mubr.msk.f32.mxu1 %vm1181_vm4, %v1144_v32 }
 0x12e   : > { %v1085_v45 = vmin.f32 %v1053_v38, 6.0  ;;  %v1023_v46 = vadd.f32 3.0, %v909_v39  ;;  %6533 = vmatmul.mubr.msk.f32.gmra.mrb[4].mxu1 %vm1181_vm4, %v1145_v36  ;;  %v1147_v51 = vmul.f32 0.16666667, %v1115_v37 }
 0x12f   : > { %v1146_v47 = vmul.f32 0.16666667, %v1114_v42  ;;  %v1084_v48 = vmin.f32 %v1052_v43, 6.0  ;;  %v1022_v49 = vadd.f32 3.0, %v904_v44  ;;  %v6494_v50 = vpop.f32.mrb[12].mxu0 }
 0x130   : > { %v1117_v52 = vmul.f32 %v1085_v45, %v899_v25  ;;  %v1055_v53 = vmax.f32 %v1023_v46, 0.0  ;;  %v919_v54 = vadd.f32 %v6494_v50, %v7924_v41  ;;  %v913_v55 = vpop.f32.mrb[13].mxu0 }
 0x131   : > { %v1116_v56 = vmul.f32 %v1084_v48, %v894_v29  ;;  %v1054_v57 = vmax.f32 %v1022_v49, 0.0  ;;  %v914_v58 = vadd.f32 %v7924_v41, %v913_v55  ;;  %6535 = vmatprep.mubr.msk.f32.mxu1 %vm1181_vm4, %v1146_v47 }
 0x132   : > { %v1087_v59 = vmin.f32 %v1055_v53, 6.0  ;;  %v1025_v60 = vadd.f32 3.0, %v919_v54  ;;  %6536 = vmatmul.mubr.msk.f32.gmra.mrb[6].mxu1 %vm1181_vm4, %v1147_v51  ;;  %v1149_v1 = vmul.f32 0.16666667, %v1117_v52 }
 0x133   : > { %v1148_v61 = vmul.f32 0.16666667, %v1116_v56  ;;  %v1086_v62 = vmin.f32 %v1054_v57, 6.0  ;;  %v1024_v63 = vadd.f32 3.0, %v914_v58  ;;  %v6497_v0 = vpop.f32.mrb[14].mxu0 }
 0x134   : > { %v1119_v2 = vmul.f32 %v1087_v59, %v909_v39  ;;  %v1057_v3 = vmax.f32 %v1025_v60, 0.0  ;;  %v929_v4 = vadd.f32 %v6497_v0, %v7924_v41  ;;  %v923_v5 = vpop.f32.mrb[15].mxu0 }
 0x135   : > { %v1118_v6 = vmul.f32 %v1086_v62, %v904_v44  ;;  %v1056_v7 = vmax.f32 %v1024_v63, 0.0  ;;  %v924_v8 = vadd.f32 %v7924_v41, %v923_v5  ;;  %6538 = vmatprep.mubr.msk.f32.mxu1 %vm1181_vm4, %v1148_v61 }
 0x136   : > { %v1089_v9 = vmin.f32 %v1057_v3, 6.0  ;;  %v1027_v10 = vadd.f32 3.0, %v929_v4  ;;  %6539 = vmatmul.mubr.msk.f32.gmra.mrb[8].mxu1 %vm1181_vm4, %v1149_v1  ;;  %v1151_v15 = vmul.f32 0.16666667, %v1119_v2 }
 0x137   : > { %v1150_v11 = vmul.f32 0.16666667, %v1118_v6  ;;  %v1088_v12 = vmin.f32 %v1056_v7, 6.0  ;;  %v1026_v13 = vadd.f32 3.0, %v924_v8  ;;  %v6500_v14 = vpop.f32.mrb[16].mxu0 }
 0x138   : > { %v1121_v16 = vmul.f32 %v1089_v9, %v919_v54  ;;  %v1059_v17 = vmax.f32 %v1027_v10, 0.0  ;;  %v939_v18 = vadd.f32 %v6500_v14, %v7924_v41  ;;  %v933_v19 = vpop.f32.mrb[17].mxu0 }
 0x139   : > { %v1120_v20 = vmul.f32 %v1088_v12, %v914_v58  ;;  %v1058_v21 = vmax.f32 %v1026_v13, 0.0  ;;  %v934_v22 = vadd.f32 %v7924_v41, %v933_v19  ;;  %6541 = vmatprep.mubr.msk.f32.mxu1 %vm1181_vm4, %v1150_v11 }
 0x13a   : > { %v1091_v23 = vmin.f32 %v1059_v17, 6.0  ;;  %v1029_v24 = vadd.f32 3.0, %v939_v18  ;;  %6542 = vmatmul.mubr.msk.f32.gmra.mrb[10].mxu1 %vm1181_vm4, %v1151_v15  ;;  %v1153_v29 = vmul.f32 0.16666667, %v1121_v16 }
 0x13b   : > { %v1152_v25 = vmul.f32 0.16666667, %v1120_v20  ;;  %v1090_v26 = vmin.f32 %v1058_v21, 6.0  ;;  %v1028_v27 = vadd.f32 3.0, %v934_v22  ;;  %v6503_v28 = vpop.f32.mrb[18].mxu0 }
 0x13c   : > { %v1123_v30 = vmul.f32 %v1091_v23, %v929_v4  ;;  %v1061_v31 = vmax.f32 %v1029_v24, 0.0  ;;  %v949_v32 = vadd.f32 %v6503_v28, %v7924_v41  ;;  %v943_v33 = vpop.f32.mrb[19].mxu0 }
 0x13d   : > { %v1122_v34 = vmul.f32 %v1090_v26, %v924_v8  ;;  %v1060_v35 = vmax.f32 %v1028_v27, 0.0  ;;  %v944_v36 = vadd.f32 %v7924_v41, %v943_v33  ;;  %6544 = vmatprep.mubr.msk.f32.mxu1 %vm1181_vm4, %v1152_v25 }
 0x13e   : > { %v1093_v37 = vmin.f32 %v1061_v31, 6.0  ;;  %v1031_v38 = vadd.f32 3.0, %v949_v32  ;;  %6545 = vmatmul.mubr.msk.f32.gmra.mrb[12].mxu1 %vm1181_vm4, %v1153_v29  ;;  %v1155_v44 = vmul.f32 0.16666667, %v1123_v30 }
 0x13f   : > { %v1154_v39 = vmul.f32 0.16666667, %v1122_v34  ;;  %v1092_v40 = vmin.f32 %v1060_v35, 6.0  ;;  %v1030_v42 = vadd.f32 3.0, %v944_v36  ;;  %v6506_v43 = vpop.f32.mrb[20].mxu0 }
 0x140   : > { %v1125_v45 = vmul.f32 %v1093_v37, %v939_v18  ;;  %v1063_v46 = vmax.f32 %v1031_v38, 0.0  ;;  %v959_v47 = vadd.f32 %v6506_v43, %v7924_v41  ;;  %v953_v48 = vpop.f32.mrb[21].mxu0 }
 0x141   : > { %v1124_v49 = vmul.f32 %v1092_v40, %v934_v22  ;;  %v1062_v50 = vmax.f32 %v1030_v42, 0.0  ;;  %v954_v51 = vadd.f32 %v7924_v41, %v953_v48  ;;  %6547 = vmatprep.mubr.msk.f32.mxu1 %vm1181_vm4, %v1154_v39 }
 0x142   : > { %v1095_v52 = vmin.f32 %v1063_v46, 6.0  ;;  %v1033_v53 = vadd.f32 3.0, %v959_v47  ;;  %6548 = vmatmul.mubr.msk.f32.gmra.mrb[14].mxu1 %vm1181_vm4, %v1155_v44  ;;  %v1157_v58 = vmul.f32 0.16666667, %v1125_v45 }
 0x143   : > { %v1156_v54 = vmul.f32 0.16666667, %v1124_v49  ;;  %v1094_v55 = vmin.f32 %v1062_v50, 6.0  ;;  %v1032_v56 = vadd.f32 3.0, %v954_v51  ;;  %v6509_v57 = vpop.f32.mrb[22].mxu0 }
 0x144   : > { %v1127_v59 = vmul.f32 %v1095_v52, %v949_v32  ;;  %v1065_v60 = vmax.f32 %v1033_v53, 0.0  ;;  %v969_v61 = vadd.f32 %v6509_v57, %v7924_v41  ;;  %v963_v62 = vpop.f32.mrb[23].mxu0 }
 0x145   : > { %v1126_v63 = vmul.f32 %v1094_v55, %v944_v36  ;;  %v1064_v0 = vmax.f32 %v1032_v56, 0.0  ;;  %v964_v1 = vadd.f32 %v7924_v41, %v963_v62  ;;  %6550 = vmatprep.mubr.msk.f32.mxu1 %vm1181_vm4, %v1156_v54 }
 0x146   : > { %v1097_v2 = vmin.f32 %v1065_v60, 6.0  ;;  %v1035_v3 = vadd.f32 3.0, %v969_v61  ;;  %6551 = vmatmul.mubr.msk.f32.gmra.mrb[16].mxu1 %vm1181_vm4, %v1157_v58  ;;  %v1159_v8 = vmul.f32 0.16666667, %v1127_v59 }
 0x147   : > { %v1158_v4 = vmul.f32 0.16666667, %v1126_v63  ;;  %v1096_v5 = vmin.f32 %v1064_v0, 6.0  ;;  %v1034_v6 = vadd.f32 3.0, %v964_v1  ;;  %v6512_v7 = vpop.f32.mrb[24].mxu0 }
 0x148   : > { %v1129_v9 = vmul.f32 %v1097_v2, %v959_v47  ;;  %v1067_v10 = vmax.f32 %v1035_v3, 0.0  ;;  %v979_v11 = vadd.f32 %v6512_v7, %v7924_v41  ;;  %v973_v12 = vpop.f32.mrb[25].mxu0 }
 0x149   : > { %v1128_v13 = vmul.f32 %v1096_v5, %v954_v51  ;;  %v1066_v14 = vmax.f32 %v1034_v6, 0.0  ;;  %v974_v15 = vadd.f32 %v7924_v41, %v973_v12  ;;  %6553 = vmatprep.mubr.msk.f32.mxu1 %vm1181_vm4, %v1158_v4  ;;  %v1538_v12 = vld [vmem:[%s10988_s26 + $0x8] sm:$0xff] }
 0x14a   : > { %v1099_v16 = vmin.f32 %v1067_v10, 6.0  ;;  %v1037_v17 = vadd.f32 3.0, %v979_v11  ;;  %6554 = vmatmul.mubr.msk.f32.gmra.mrb[18].mxu1 %vm1181_vm4, %v1159_v8  ;;  %v1161_v22 = vmul.f32 0.16666667, %v1129_v9 }
 0x14b   : > { %v1160_v18 = vmul.f32 0.16666667, %v1128_v13  ;;  %v1098_v19 = vmin.f32 %v1066_v14, 6.0  ;;  %v1036_v20 = vadd.f32 3.0, %v974_v15  ;;  %v6515_v21 = vpop.f32.mrb[26].mxu0  ;;  %v5687_v13 = vld [vmem:[%s10988_s26 + $0x88] sm:$0xff] }
 0x14c   : > { %v1131_v23 = vmul.f32 %v1099_v16, %v969_v61  ;;  %v1069_v24 = vmax.f32 %v1037_v17, 0.0  ;;  %v989_v25 = vadd.f32 %v6515_v21, %v7924_v41  ;;  %v983_v26 = vpop.f32.mrb[27].mxu0  ;;  %1759 = vmatprep.mubr.f32.mxu0 %v5687_v13  ;;  %v7999_v14 = vld [vmem:[%s10940_s5] ss:$0 sm:$0xff] }
 0x14d   : > { %v1130_v27 = vmul.f32 %v1098_v19, %v964_v1  ;;  %v1068_v28 = vmax.f32 %v1036_v20, 0.0  ;;  %v984_v29 = vadd.f32 %v7924_v41, %v983_v26  ;;  %6556 = vmatprep.mubr.msk.f32.mxu1 %vm1181_vm4, %v1160_v18 }
 0x14e   : > { %v1101_v30 = vmin.f32 %v1069_v24, 6.0  ;;  %v1039_v31 = vadd.f32 3.0, %v989_v25  ;;  %6557 = vmatmul.mubr.msk.f32.gmra.mrb[20].mxu1 %vm1181_vm4, %v1161_v22  ;;  %v1163_v36 = vmul.f32 0.16666667, %v1131_v23 }
 0x14f   : > { %v1162_v32 = vmul.f32 0.16666667, %v1130_v27  ;;  %v1100_v33 = vmin.f32 %v1068_v28, 6.0  ;;  %v1038_v34 = vadd.f32 3.0, %v984_v29  ;;  %v6518_v35 = vpop.f32.mrb[28].mxu0 }
 0x150   : > { %v1133_v37 = vmul.f32 %v1101_v30, %v979_v11  ;;  %v1071_v38 = vmax.f32 %v1039_v31, 0.0  ;;  %v999_v39 = vadd.f32 %v6518_v35, %v7924_v41  ;;  %v993_v40 = vpop.f32.mrb[29].mxu0 }
 0x151   : > { %v1132_v42 = vmul.f32 %v1100_v33, %v974_v15  ;;  %v1070_v43 = vmax.f32 %v1038_v34, 0.0  ;;  %v994_v44 = vadd.f32 %v7924_v41, %v993_v40  ;;  %6559 = vmatprep.mubr.msk.f32.mxu1 %vm1181_vm4, %v1162_v32 }
 0x152   : > { %v1103_v45 = vmin.f32 %v1071_v38, 6.0  ;;  %v1041_v46 = vadd.f32 3.0, %v999_v39  ;;  %6560 = vmatmul.mubr.msk.f32.gmra.mrb[22].mxu1 %vm1181_vm4, %v1163_v36  ;;  %v1165_v51 = vmul.f32 0.16666667, %v1133_v37 }
 0x153   : > { %v1164_v47 = vmul.f32 0.16666667, %v1132_v42  ;;  %v1102_v48 = vmin.f32 %v1070_v43, 6.0  ;;  %v1040_v49 = vadd.f32 3.0, %v994_v44  ;;  %v6521_v50 = vpop.f32.mrb[30].mxu0 }
 0x154   : > { %v1135_v52 = vmul.f32 %v1103_v45, %v989_v25  ;;  %v1073_v53 = vmax.f32 %v1041_v46, 0.0  ;;  %v1009_v54 = vadd.f32 %v6521_v50, %v7924_v41  ;;  %v1003_v55 = vpop.f32.mrb[31].mxu0 }
 0x155   : > { %v1134_v56 = vmul.f32 %v1102_v48, %v984_v29  ;;  %v1072_v57 = vmax.f32 %v1040_v49, 0.0  ;;  %v1004_v58 = vadd.f32 %v7924_v41, %v1003_v55  ;;  %6562 = vmatprep.mubr.msk.f32.mxu1 %vm1181_vm4, %v1164_v47 }
 0x156   : > { %v1105_v59 = vmin.f32 %v1073_v53, 6.0  ;;  %v1043_v60 = vadd.f32 3.0, %v1009_v54  ;;  %6563 = vmatmul.mubr.msk.f32.gmra.mrb[24].mxu1 %vm1181_vm4, %v1165_v51  ;;  %v1167_v0 = vmul.f32 0.16666667, %v1135_v52 }
 0x157   : > { %v1166_v61 = vmul.f32 0.16666667, %v1134_v56  ;;  %v1104_v62 = vmin.f32 %v1072_v57, 6.0  ;;  %v1042_v63 = vadd.f32 3.0, %v1004_v58 }
 0x158   : > { %v1137_v1 = vmul.f32 %v1105_v59, %v999_v39  ;;  %v1075_v2 = vmax.f32 %v1043_v60, 0.0 }
 0x159   : > { %v1136_v3 = vmul.f32 %v1104_v62, %v994_v44  ;;  %v1074_v4 = vmax.f32 %v1042_v63, 0.0  ;;  %6565 = vmatprep.mubr.msk.f32.mxu1 %vm1181_vm4, %v1166_v61 }
 0x15a   : > { %v1107_v5 = vmin.f32 %v1075_v2, 6.0  ;;  %6566 = vmatmul.mubr.msk.f32.gmra.mrb[26].mxu1 %vm1181_vm4, %v1167_v0  ;;  %v1169_v7 = vmul.f32 0.16666667, %v1137_v1 }
 0x15b   : > { %v1168_v41 = vmul.f32 0.16666667, %v1136_v3  ;;  %v1106_v6 = vmin.f32 %v1074_v4, 6.0 }
 0x15c   : > { %v1139_v8 = vmul.f32 %v1107_v5, %v1009_v54 }
 0x15d   : > { %v1138_v9 = vmul.f32 %v1106_v6, %v1004_v58  ;;  %6568 = vmatprep.mubr.msk.f32.mxu1 %vm1181_vm4, %v1168_v41 }
 0x15e   : > { %6569 = vmatmul.mubr.msk.f32.gmra.mrb[28].mxu1 %vm1181_vm4, %v1169_v7  ;;  %v1171_v11 = vmul.f32 0.16666667, %v1139_v8 }
 0x15f   : > { %v1170_v10 = vmul.f32 0.16666667, %v1138_v9 }
 0x161   : > { %6571 = vmatprep.mubr.msk.f32.mxu1 %vm1181_vm4, %v1170_v10 }
 0x162   : > { %6572 = vmatmul.mubr.msk.f32.gmra.mrb[30].mxu1 %vm1181_vm4, %v1171_v11 }
 0x163   : > { %1617 = vmatprep.mubr.f32.mxu1 %v1538_v12 }
 0x1f9   : > { %v6528_v15 = vpop.f32.mrb[0].mxu1 }
 0x1fa   : > { %v1350_v16 = vadd.f32 %v6528_v15, %v7999_v14  ;;  %v1344_v17 = vpop.f32.mrb[1].mxu1 }
 0x1fb   : > { %v1345_v18 = vadd.f32 %v7999_v14, %v1344_v17 }
 0x1fc   : > { %v1504_v19 = vmax.f32 %v1350_v16, 0.0 }
 0x1fd   : > { %v1503_v20 = vmax.f32 %v1345_v18, 0.0  ;;  %v6531_v21 = vpop.f32.mrb[2].mxu1 }
 0x1fe   : > { %v1360_v22 = vadd.f32 %v6531_v21, %v7999_v14  ;;  %v1354_v23 = vpop.f32.mrb[3].mxu1 }
 0x1ff   : > { %v8004_v24 = vpack.c.bf16 %v1504_v19, %v1503_v20  ;;  %v1355_v25 = vadd.f32 %v7999_v14, %v1354_v23 }
 0x200   : > { %v1506_v26 = vmax.f32 %v1360_v22, 0.0 }
 0x201   : > { %v1505_v27 = vmax.f32 %v1355_v25, 0.0  ;;  %v6534_v28 = vpop.f32.mrb[4].mxu1 }
 0x202   : > { %v1370_v29 = vadd.f32 %v6534_v28, %v7999_v14  ;;  %v1364_v30 = vpop.f32.mrb[5].mxu1 }
 0x203   : > { %v8008_v31 = vpack.c.bf16 %v1506_v26, %v1505_v27  ;;  %v1365_v32 = vadd.f32 %v7999_v14, %v1364_v30 }
 0x204   : > { %v1508_v33 = vmax.f32 %v1370_v29, 0.0 }
 0x205   : > { %v1507_v34 = vmax.f32 %v1365_v32, 0.0  ;;  %v6537_v35 = vpop.f32.mrb[6].mxu1 }
 0x206   : > { %v1380_v36 = vadd.f32 %v6537_v35, %v7999_v14  ;;  %v1374_v37 = vpop.f32.mrb[7].mxu1 }
 0x207   : > { %v8012_v38 = vpack.c.bf16 %v1508_v33, %v1507_v34  ;;  %v1375_v39 = vadd.f32 %v7999_v14, %v1374_v37 }
 0x208   : > { %v1510_v40 = vmax.f32 %v1380_v36, 0.0 }
 0x209   : > { %v1509_v42 = vmax.f32 %v1375_v39, 0.0  ;;  %v6540_v43 = vpop.f32.mrb[8].mxu1 }
 0x20a   : > { %v1390_v44 = vadd.f32 %v6540_v43, %v7999_v14  ;;  %v1384_v45 = vpop.f32.mrb[9].mxu1 }
 0x20b   : > { %v8016_v46 = vpack.c.bf16 %v1510_v40, %v1509_v42  ;;  %v1385_v47 = vadd.f32 %v7999_v14, %v1384_v45 }
 0x20c   : > { %v1512_v48 = vmax.f32 %v1390_v44, 0.0 }
 0x20d   : > { %v1511_v49 = vmax.f32 %v1385_v47, 0.0  ;;  %v6543_v50 = vpop.f32.mrb[10].mxu1 }
 0x20e   : > { %v1400_v51 = vadd.f32 %v6543_v50, %v7999_v14  ;;  %v1394_v52 = vpop.f32.mrb[11].mxu1 }
 0x20f   : > { %v8020_v53 = vpack.c.bf16 %v1512_v48, %v1511_v49  ;;  %v1395_v54 = vadd.f32 %v7999_v14, %v1394_v52 }
 0x210   : > { %v1514_v55 = vmax.f32 %v1400_v51, 0.0 }
 0x211   : > { %v1513_v56 = vmax.f32 %v1395_v54, 0.0  ;;  %v6546_v57 = vpop.f32.mrb[12].mxu1 }
 0x212   : > { %v1410_v58 = vadd.f32 %v6546_v57, %v7999_v14  ;;  %v1404_v59 = vpop.f32.mrb[13].mxu1 }
 0x213   : > { %v8024_v60 = vpack.c.bf16 %v1514_v55, %v1513_v56  ;;  %v1405_v61 = vadd.f32 %v7999_v14, %v1404_v59 }
 0x214   : > { %v1516_v62 = vmax.f32 %v1410_v58, 0.0 }
 0x215   : > { %v1515_v63 = vmax.f32 %v1405_v61, 0.0  ;;  %v6549_v0 = vpop.f32.mrb[14].mxu1 }
 0x216   : > { %v1420_v1 = vadd.f32 %v6549_v0, %v7999_v14  ;;  %v1414_v2 = vpop.f32.mrb[15].mxu1 }
 0x217   : > { %v8028_v3 = vpack.c.bf16 %v1516_v62, %v1515_v63  ;;  %v1415_v4 = vadd.f32 %v7999_v14, %v1414_v2 }
 0x218   : > { %v1518_v5 = vmax.f32 %v1420_v1, 0.0 }
 0x219   : > { %v1517_v41 = vmax.f32 %v1415_v4, 0.0  ;;  %v6552_v6 = vpop.f32.mrb[16].mxu1 }
 0x21a   : > { %v1430_v7 = vadd.f32 %v6552_v6, %v7999_v14  ;;  %v1424_v8 = vpop.f32.mrb[17].mxu1 }
 0x21b   : > { %v8032_v9 = vpack.c.bf16 %v1518_v5, %v1517_v41  ;;  %v1425_v10 = vadd.f32 %v7999_v14, %v1424_v8  ;;  %v1540_v8 = vld [vmem:[%s10988_s26 + $0x18] sm:$0xff] }
 0x21c   : > { %v1520_v11 = vmax.f32 %v1430_v7, 0.0  ;;  %v5686_v7 = vld [vmem:[%s10988_s26 + $0x80] sm:$0xff] }
 0x21d   : > { %v1519_v12 = vmax.f32 %v1425_v10, 0.0  ;;  %v6555_v13 = vpop.f32.mrb[18].mxu1  ;;  %v5689_v10 = vld [vmem:[%s10988_s26 + $0x98] sm:$0xff] }
 0x21e   : > { %v1440_v15 = vadd.f32 %v6555_v13, %v7999_v14  ;;  %v1434_v16 = vpop.f32.mrb[19].mxu1  ;;  %v1542_v13 = vld [vmem:[%s10988_s26 + $0x28] sm:$0xff] }
 0x21f   : > { %v8036_v17 = vpack.c.bf16 %v1520_v11, %v1519_v12  ;;  %v1435_v18 = vadd.f32 %v7999_v14, %v1434_v16  ;;  %v1539_v11 = vld [vmem:[%s10988_s26 + $0x10] sm:$0xff]  ;;  %v1541_v16 = vld [vmem:[%s10988_s26 + $0x20] sm:$0xff] }
 0x220   : > { %v1522_v19 = vmax.f32 %v1440_v15, 0.0  ;;  %v5688_v12 = vld [vmem:[%s10988_s26 + $0x90] sm:$0xff]  ;;  %v5691_v15 = vld [vmem:[%s10988_s26 + $0xa8] sm:$0xff] }
 0x221   : > { %v1521_v20 = vmax.f32 %v1435_v18, 0.0  ;;  %v6558_v21 = vpop.f32.mrb[20].mxu1  ;;  %6643 = vmatprep.subr.bf16.mxu1 %v8036_v17  ;;  %6675 = vmatprep.subr.bf16.mxu0 %v8036_v17  ;;  %v5690_v18 = vld [vmem:[%s10988_s26 + $0xa0] sm:$0xff] }
 0x222   : > { %v1450_v22 = vadd.f32 %v6558_v21, %v7999_v14  ;;  %v1444_v23 = vpop.f32.mrb[21].mxu1  ;;  %6645 = vmatpush3.bf16.msra.mxu1 %v8004_v24  ;;  %6677 = vmatpush3.bf16.msra.mxu0 %v8004_v24  ;;  %v1543_v21 = vld [vmem:[%s10988_s26 + $0x30] sm:$0xff] }
 0x223   : > { %v8044_v25 = vpack.c.bf16 %v1522_v19, %v1521_v20  ;;  %v1445_v26 = vadd.f32 %v7999_v14, %v1444_v23  ;;  %v1544_v19 = vld [vmem:[%s10988_s26 + $0x38] sm:$0xff]  ;;  %v1546_v23 = vld [vmem:[%s10988_s26 + $0x48] sm:$0xff] }
 0x224   : > { %v1524_v27 = vmax.f32 %v1450_v22, 0.0  ;;  %v5693_v20 = vld [vmem:[%s10988_s26 + $0xb8] sm:$0xff]  ;;  %v5692_v22 = vld [vmem:[%s10988_s26 + $0xb0] sm:$0xff] }
 0x225   : > { %v1523_v28 = vmax.f32 %v1445_v26, 0.0  ;;  %v6561_v29 = vpop.f32.mrb[22].mxu1  ;;  %6647 = vmatprep.subr.bf16.mxu1 %v8044_v25  ;;  %6679 = vmatprep.subr.bf16.mxu0 %v8044_v25  ;;  %v5695_v26 = vld [vmem:[%s10988_s26 + $0xc8] sm:$0xff] }
 0x226   : > { %v1460_v30 = vadd.f32 %v6561_v29, %v7999_v14  ;;  %v1454_v32 = vpop.f32.mrb[23].mxu1  ;;  %6649 = vmatpush3.bf16.msra.mxu1 %v8008_v31  ;;  %6681 = vmatpush3.bf16.msra.mxu0 %v8008_v31  ;;  %v1548_v29 = vld [vmem:[%s10988_s26 + $0x58] sm:$0xff] }
 0x227   : > { %v8052_v33 = vpack.c.bf16 %v1524_v27, %v1523_v28  ;;  %v1455_v34 = vadd.f32 %v7999_v14, %v1454_v32  ;;  %v1545_v27 = vld [vmem:[%s10988_s26 + $0x40] sm:$0xff]  ;;  %v1547_v32 = vld [vmem:[%s10988_s26 + $0x50] sm:$0xff] }
 0x228   : > { %v1526_v35 = vmax.f32 %v1460_v30, 0.0  ;;  %v5694_v28 = vld [vmem:[%s10988_s26 + $0xc0] sm:$0xff]  ;;  %v5697_v30 = vld [vmem:[%s10988_s26 + $0xd8] sm:$0xff] }
 0x229   : > { %v1525_v36 = vmax.f32 %v1455_v34, 0.0  ;;  %v6564_v37 = vpop.f32.mrb[24].mxu1  ;;  %6651 = vmatprep.subr.bf16.mxu1 %v8052_v33  ;;  %6683 = vmatprep.subr.bf16.mxu0 %v8052_v33  ;;  %v5696_v34 = vld [vmem:[%s10988_s26 + $0xd0] sm:$0xff] }
 0x22a   : > { %v1470_v39 = vadd.f32 %v6564_v37, %v7999_v14  ;;  %v1464_v40 = vpop.f32.mrb[25].mxu1  ;;  %6653 = vmatpush3.bf16.msra.mxu1 %v8012_v38  ;;  %6685 = vmatpush3.bf16.msra.mxu0 %v8012_v38  ;;  %v1549_v37 = vld [vmem:[%s10988_s26 + $0x60] sm:$0xff] }
 0x22b   : > { %v8060_v42 = vpack.c.bf16 %v1526_v35, %v1525_v36  ;;  %v1465_v43 = vadd.f32 %v7999_v14, %v1464_v40  ;;  %v1550_v35 = vld [vmem:[%s10988_s26 + $0x68] sm:$0xff]  ;;  %v1552_v40 = vld [vmem:[%s10988_s26 + $0x78] sm:$0xff] }
 0x22c   : > { %v1528_v44 = vmax.f32 %v1470_v39, 0.0  ;;  %v5699_v36 = vld [vmem:[%s10988_s26 + $0xe8] sm:$0xff]  ;;  %v5698_v39 = vld [vmem:[%s10988_s26 + $0xe0] sm:$0xff] }
 0x22d   : > { %v1527_v45 = vmax.f32 %v1465_v43, 0.0  ;;  %v6567_v47 = vpop.f32.mrb[26].mxu1  ;;  %6655 = vmatprep.subr.bf16.mxu1 %v8060_v42  ;;  %6687 = vmatprep.subr.bf16.mxu0 %v8060_v42  ;;  %v5701_v43 = vld [vmem:[%s10988_s26 + $0xf8] sm:$0xff] }
 0x22e   : > { %v1480_v48 = vadd.f32 %v6567_v47, %v7999_v14  ;;  %v1474_v49 = vpop.f32.mrb[27].mxu1  ;;  %6657 = vmatpush3.bf16.msra.mxu1 %v8016_v46  ;;  %6689 = vmatpush3.bf16.msra.mxu0 %v8016_v46  ;;  %v5703_v47 = vld [vmem:[%s10988_s26 + $0x108] sm:$0xff] }
 0x22f   : > { %v8068_v50 = vpack.c.bf16 %v1528_v44, %v1527_v45  ;;  %v1475_v51 = vadd.f32 %v7999_v14, %v1474_v49  ;;  %v1551_v44 = vld [vmem:[%s10988_s26 + $0x70] sm:$0xff]  ;;  %v5702_v49 = vld [vmem:[%s10988_s26 + $0x100] sm:$0xff] }
 0x230   : > { %v1530_v52 = vmax.f32 %v1480_v48, 0.0  ;;  %v5700_v45 = vld [vmem:[%s10988_s26 + $0xf0] sm:$0xff]  ;;  %v5719_v48 = vld [vmem:[%s10988_s26 + $0x188] sm:$0xff] }
 0x231   : > { %v1529_v54 = vmax.f32 %v1475_v51, 0.0  ;;  %v6570_v55 = vpop.f32.mrb[28].mxu1  ;;  %6659 = vmatprep.subr.bf16.mxu1 %v8068_v50  ;;  %6691 = vmatprep.subr.bf16.mxu0 %v8068_v50  ;;  %v5718_v51 = vld [vmem:[%s10988_s26 + $0x180] sm:$0xff] }
 0x232   : > { %v1490_v56 = vadd.f32 %v6570_v55, %v7999_v14  ;;  %v1484_v57 = vpop.f32.mrb[29].mxu1  ;;  %6661 = vmatpush3.bf16.msra.mxu1 %v8020_v53  ;;  %6693 = vmatpush3.bf16.msra.mxu0 %v8020_v53  ;;  %v5704_v55 = vld [vmem:[%s10988_s26 + $0x110] sm:$0xff] }
 0x233   : > { %v8076_v58 = vpack.c.bf16 %v1530_v52, %v1529_v54  ;;  %v1485_v59 = vadd.f32 %v7999_v14, %v1484_v57  ;;  %v5705_v52 = vld [vmem:[%s10988_s26 + $0x118] sm:$0xff]  ;;  %v5707_v57 = vld [vmem:[%s10988_s26 + $0x128] sm:$0xff] }
 0x234   : > { %v1532_v61 = vmax.f32 %v1490_v56, 0.0  ;;  %v5721_v54 = vld [vmem:[%s10988_s26 + $0x198] sm:$0xff]  ;;  %v5720_v56 = vld [vmem:[%s10988_s26 + $0x190] sm:$0xff] }
 0x235   : > { %v1531_v62 = vmax.f32 %v1485_v59, 0.0  ;;  %v6573_v63 = vpop.f32.mrb[30].mxu1  ;;  %6663 = vmatprep.subr.bf16.mxu1 %v8076_v58  ;;  %6695 = vmatprep.subr.bf16.mxu0 %v8076_v58  ;;  %v5723_v59 = vld [vmem:[%s10988_s26 + $0x1a8] sm:$0xff] }
 0x236   : > { %v1500_v0 = vadd.f32 %v6573_v63, %v7999_v14  ;;  %v1494_v1 = vpop.f32.mrb[31].mxu1  ;;  %6665 = vmatpush3.bf16.msra.mxu1 %v8024_v60  ;;  %6697 = vmatpush3.bf16.msra.mxu0 %v8024_v60  ;;  %v5709_v63 = vld [vmem:[%s10988_s26 + $0x138] sm:$0xff] }
 0x237   : > { %v8084_v2 = vpack.c.bf16 %v1532_v61, %v1531_v62  ;;  %v1495_v4 = vadd.f32 %v7999_v14, %v1494_v1  ;;  %v1537_v14 = vld [vmem:[%s10988_s26] sm:$0xff]  ;;  %v5708_v1 = vld [vmem:[%s10988_s26 + $0x130] sm:$0xff] }
 0x238   : > { %v1534_v5 = vmax.f32 %v1500_v0, 0.0  ;;  %v5706_v61 = vld [vmem:[%s10988_s26 + $0x120] sm:$0xff]  ;;  %v5725_v0 = vld [vmem:[%s10988_s26 + $0x1b8] sm:$0xff] }
 0x239   : > { %v1533_v41 = vmax.f32 %v1495_v4, 0.0  ;;  %6667 = vmatprep.subr.bf16.mxu1 %v8084_v2  ;;  %6699 = vmatprep.subr.bf16.mxu0 %v8084_v2  ;;  %v5722_v62 = vld [vmem:[%s10988_s26 + $0x1a0] sm:$0xff]  ;;  %v5724_v4 = vld [vmem:[%s10988_s26 + $0x1b0] sm:$0xff] }
 0x23a   : > { %6669 = vmatpush3.bf16.msra.mxu1 %v8028_v3  ;;  %6701 = vmatpush3.bf16.msra.mxu0 %v8028_v3 }
 0x23b   : > { %v8091_v6 = vpack.c.bf16 %v1534_v5, %v1533_v41  ;;  %v5711_v5 = vld [vmem:[%s10988_s26 + $0x148] sm:$0xff] }
 0x23c   : > { %v5727_v41 = vld [vmem:[%s10988_s26 + $0x1c8] sm:$0xff] }
 0x23d   : > { %6671 = vmatprep.subr.bf16.mxu1 %v8091_v6  ;;  %6703 = vmatprep.subr.bf16.mxu0 %v8091_v6 }
 0x23e   : > { %6673 = vmatpush3.bf16.msra.mxu1 %v8032_v9  ;;  %6705 = vmatpush3.bf16.msra.mxu0 %v8032_v9 }
 0x23f   : > { %6707 = vmatprep.subr.bf16.mxu1 %v8036_v17  ;;  %6739 = vmatprep.subr.bf16.mxu0 %v8036_v17 }
 0x241   : > { %1618 = vmatmul.mubr.f32.vlgmr.msra.gmra.mrb[32].mxu1 %v1537_v14  ;;  %1760 = vmatmul.mubr.f32.vlgmr.msra.gmra.mrb[32].mxu0 %v5686_v7  ;;  %v5710_v14 = vld [vmem:[%s10988_s26 + $0x140] sm:$0xff] }
 0x242   : > { %6709 = vmatpush3.bf16.msra.mxu1 %v8004_v24  ;;  %6741 = vmatpush3.bf16.msra.mxu0 %v8004_v24  ;;  %v5726_v7 = vld [vmem:[%s10988_s26 + $0x1c0] sm:$0xff] }
 0x243   : > { %6711 = vmatprep.subr.bf16.mxu1 %v8044_v25  ;;  %6743 = vmatprep.subr.bf16.mxu0 %v8044_v25 }
 0x244   : > { %1622 = vmatprep.mubr.f32.mxu1 %v1540_v8  ;;  %1764 = vmatprep.mubr.f32.mxu0 %v5689_v10  ;;  %v5713_v8 = vld [vmem:[%s10988_s26 + $0x158] sm:$0xff] }
 0x245   : > { %1623 = vmatmul.mubr.f32.gmra.mrb[34].mxu1 %v1539_v11  ;;  %1765 = vmatmul.mubr.f32.gmra.mrb[34].mxu0 %v5688_v12  ;;  %v5729_v10 = vld [vmem:[%s10988_s26 + $0x1d8] sm:$0xff]  ;;  %v5712_v11 = vld [vmem:[%s10988_s26 + $0x150] sm:$0xff] }
 0x246   : > { %6713 = vmatpush3.bf16.msra.mxu1 %v8008_v31  ;;  %6745 = vmatpush3.bf16.msra.mxu0 %v8008_v31  ;;  %v5728_v12 = vld [vmem:[%s10988_s26 + $0x1d0] sm:$0xff] }
 0x247   : > { %6715 = vmatprep.subr.bf16.mxu1 %v8052_v33  ;;  %6747 = vmatprep.subr.bf16.mxu0 %v8052_v33 }
 0x248   : > { %1627 = vmatprep.mubr.f32.mxu1 %v1542_v13  ;;  %1769 = vmatprep.mubr.f32.mxu0 %v5691_v15  ;;  %v5715_v13 = vld [vmem:[%s10988_s26 + $0x168] sm:$0xff] }
 0x249   : > { %1628 = vmatmul.mubr.f32.gmra.mrb[36].mxu1 %v1541_v16  ;;  %1770 = vmatmul.mubr.f32.gmra.mrb[36].mxu0 %v5690_v18  ;;  %v5731_v15 = vld [vmem:[%s10988_s26 + $0x1e8] sm:$0xff]  ;;  %v5714_v16 = vld [vmem:[%s10988_s26 + $0x160] sm:$0xff] }
 0x24a   : > { %6717 = vmatpush3.bf16.msra.mxu1 %v8012_v38  ;;  %6749 = vmatpush3.bf16.msra.mxu0 %v8012_v38  ;;  %v5730_v18 = vld [vmem:[%s10988_s26 + $0x1e0] sm:$0xff] }
 0x24b   : > { %6719 = vmatprep.subr.bf16.mxu1 %v8060_v42  ;;  %6751 = vmatprep.subr.bf16.mxu0 %v8060_v42 }
 0x24c   : > { %1632 = vmatprep.mubr.f32.mxu1 %v1544_v19  ;;  %1774 = vmatprep.mubr.f32.mxu0 %v5693_v20  ;;  %v5717_v19 = vld [vmem:[%s10988_s26 + $0x178] sm:$0xff] }
 0x24d   : > { %1633 = vmatmul.mubr.f32.gmra.mrb[38].mxu1 %v1543_v21  ;;  %1775 = vmatmul.mubr.f32.gmra.mrb[38].mxu0 %v5692_v22  ;;  %v5733_v20 = vld [vmem:[%s10988_s26 + $0x1f8] sm:$0xff]  ;;  %v5716_v21 = vld [vmem:[%s10988_s26 + $0x170] sm:$0xff] }
 0x24e   : > { %6721 = vmatpush3.bf16.msra.mxu1 %v8016_v46  ;;  %6753 = vmatpush3.bf16.msra.mxu0 %v8016_v46  ;;  %v5732_v22 = vld [vmem:[%s10988_s26 + $0x1f0] sm:$0xff] }
 0x24f   : > { %6723 = vmatprep.subr.bf16.mxu1 %v8068_v50  ;;  %6755 = vmatprep.subr.bf16.mxu0 %v8068_v50 }
 0x250   : > { %1637 = vmatprep.mubr.f32.mxu1 %v1546_v23  ;;  %1779 = vmatprep.mubr.f32.mxu0 %v5695_v26  ;;  %v5735_v23 = vld [vmem:[%s10988_s26 + $0x208] sm:$0xff] }
 0x251   : > { %1638 = vmatmul.mubr.f32.gmra.mrb[40].mxu1 %v1545_v27  ;;  %1780 = vmatmul.mubr.f32.gmra.mrb[40].mxu0 %v5694_v28  ;;  %v5751_v26 = vld [vmem:[%s10988_s26 + $0x288] sm:$0xff]  ;;  %v5734_v27 = vld [vmem:[%s10988_s26 + $0x200] sm:$0xff] }
 0x252   : > { %6725 = vmatpush3.bf16.msra.mxu1 %v8020_v53  ;;  %6757 = vmatpush3.bf16.msra.mxu0 %v8020_v53  ;;  %v5750_v28 = vld [vmem:[%s10988_s26 + $0x280] sm:$0xff] }
 0x253   : > { %6727 = vmatprep.subr.bf16.mxu1 %v8076_v58  ;;  %6759 = vmatprep.subr.bf16.mxu0 %v8076_v58 }
 0x254   : > { %1642 = vmatprep.mubr.f32.mxu1 %v1548_v29  ;;  %1784 = vmatprep.mubr.f32.mxu0 %v5697_v30  ;;  %v5737_v29 = vld [vmem:[%s10988_s26 + $0x218] sm:$0xff] }
 0x255   : > { %1643 = vmatmul.mubr.f32.gmra.mrb[42].mxu1 %v1547_v32  ;;  %1785 = vmatmul.mubr.f32.gmra.mrb[42].mxu0 %v5696_v34  ;;  %v5753_v30 = vld [vmem:[%s10988_s26 + $0x298] sm:$0xff]  ;;  %v5736_v32 = vld [vmem:[%s10988_s26 + $0x210] sm:$0xff] }
 0x256   : > { %6729 = vmatpush3.bf16.msra.mxu1 %v8024_v60  ;;  %6761 = vmatpush3.bf16.msra.mxu0 %v8024_v60  ;;  %v5752_v34 = vld [vmem:[%s10988_s26 + $0x290] sm:$0xff] }
 0x257   : > { %6731 = vmatprep.subr.bf16.mxu1 %v8084_v2  ;;  %6763 = vmatprep.subr.bf16.mxu0 %v8084_v2 }
 0x258   : > { %1647 = vmatprep.mubr.f32.mxu1 %v1550_v35  ;;  %1789 = vmatprep.mubr.f32.mxu0 %v5699_v36  ;;  %v5739_v35 = vld [vmem:[%s10988_s26 + $0x228] sm:$0xff] }
 0x259   : > { %1648 = vmatmul.mubr.f32.gmra.mrb[44].mxu1 %v1549_v37  ;;  %1790 = vmatmul.mubr.f32.gmra.mrb[44].mxu0 %v5698_v39  ;;  %v5755_v36 = vld [vmem:[%s10988_s26 + $0x2a8] sm:$0xff]  ;;  %v5738_v37 = vld [vmem:[%s10988_s26 + $0x220] sm:$0xff] }
 0x25a   : > { %6733 = vmatpush3.bf16.msra.mxu1 %v8028_v3  ;;  %6765 = vmatpush3.bf16.msra.mxu0 %v8028_v3  ;;  %v5754_v39 = vld [vmem:[%s10988_s26 + $0x2a0] sm:$0xff] }
 0x25b   : > { %6735 = vmatprep.subr.bf16.mxu1 %v8091_v6  ;;  %6767 = vmatprep.subr.bf16.mxu0 %v8091_v6 }
 0x25c   : > { %1652 = vmatprep.mubr.f32.mxu1 %v1552_v40  ;;  %1794 = vmatprep.mubr.f32.mxu0 %v5701_v43  ;;  %v5741_v40 = vld [vmem:[%s10988_s26 + $0x238] sm:$0xff] }
 0x25d   : > { %1653 = vmatmul.mubr.f32.gmra.mrb[46].mxu1 %v1551_v44  ;;  %1795 = vmatmul.mubr.f32.gmra.mrb[46].mxu0 %v5700_v45  ;;  %v5757_v43 = vld [vmem:[%s10988_s26 + $0x2b8] sm:$0xff]  ;;  %v5740_v44 = vld [vmem:[%s10988_s26 + $0x230] sm:$0xff] }
 0x25e   : > { %6737 = vmatpush3.bf16.msra.mxu1 %v8032_v9  ;;  %6769 = vmatpush3.bf16.msra.mxu0 %v8032_v9  ;;  %v5756_v45 = vld [vmem:[%s10988_s26 + $0x2b0] sm:$0xff] }
 0x25f   : > { %6771 = vmatprep.subr.bf16.mxu1 %v8036_v17  ;;  %6803 = vmatprep.subr.bf16.mxu0 %v8036_v17 }
 0x260   : > { %1901 = vmatprep.mubr.f32.mxu1 %v5703_v47  ;;  %2043 = vmatprep.mubr.f32.mxu0 %v5719_v48  ;;  %v5743_v47 = vld [vmem:[%s10988_s26 + $0x248] sm:$0xff] }
 0x261   : > { %1902 = vmatmul.mubr.f32.vlgmr.msra.gmra.mrb[48].mxu1 %v5702_v49  ;;  %2044 = vmatmul.mubr.f32.vlgmr.msra.gmra.mrb[48].mxu0 %v5718_v51  ;;  %v5759_v48 = vld [vmem:[%s10988_s26 + $0x2c8] sm:$0xff]  ;;  %v5742_v49 = vld [vmem:[%s10988_s26 + $0x240] sm:$0xff] }
 0x262   : > { %6773 = vmatpush3.bf16.msra.mxu1 %v8004_v24  ;;  %6805 = vmatpush3.bf16.msra.mxu0 %v8004_v24  ;;  %v5758_v51 = vld [vmem:[%s10988_s26 + $0x2c0] sm:$0xff] }
 0x263   : > { %6775 = vmatprep.subr.bf16.mxu1 %v8044_v25  ;;  %6807 = vmatprep.subr.bf16.mxu0 %v8044_v25 }
 0x264   : > { %1906 = vmatprep.mubr.f32.mxu1 %v5705_v52  ;;  %2048 = vmatprep.mubr.f32.mxu0 %v5721_v54  ;;  %v5745_v52 = vld [vmem:[%s10988_s26 + $0x258] sm:$0xff] }
 0x265   : > { %1907 = vmatmul.mubr.f32.gmra.mrb[50].mxu1 %v5704_v55  ;;  %2049 = vmatmul.mubr.f32.gmra.mrb[50].mxu0 %v5720_v56  ;;  %v5761_v54 = vld [vmem:[%s10988_s26 + $0x2d8] sm:$0xff]  ;;  %v5744_v55 = vld [vmem:[%s10988_s26 + $0x250] sm:$0xff] }
 0x266   : > { %6777 = vmatpush3.bf16.msra.mxu1 %v8008_v31  ;;  %6809 = vmatpush3.bf16.msra.mxu0 %v8008_v31  ;;  %v5760_v56 = vld [vmem:[%s10988_s26 + $0x2d0] sm:$0xff] }
 0x267   : > { %6779 = vmatprep.subr.bf16.mxu1 %v8052_v33  ;;  %6811 = vmatprep.subr.bf16.mxu0 %v8052_v33 }
 0x268   : > { %1911 = vmatprep.mubr.f32.mxu1 %v5707_v57  ;;  %2053 = vmatprep.mubr.f32.mxu0 %v5723_v59  ;;  %v5747_v57 = vld [vmem:[%s10988_s26 + $0x268] sm:$0xff] }
 0x269   : > { %1912 = vmatmul.mubr.f32.gmra.mrb[52].mxu1 %v5706_v61  ;;  %2054 = vmatmul.mubr.f32.gmra.mrb[52].mxu0 %v5722_v62  ;;  %v5763_v59 = vld [vmem:[%s10988_s26 + $0x2e8] sm:$0xff]  ;;  %v5746_v61 = vld [vmem:[%s10988_s26 + $0x260] sm:$0xff] }
 0x26a   : > { %6781 = vmatpush3.bf16.msra.mxu1 %v8012_v38  ;;  %6813 = vmatpush3.bf16.msra.mxu0 %v8012_v38  ;;  %v5762_v62 = vld [vmem:[%s10988_s26 + $0x2e0] sm:$0xff] }
 0x26b   : > { %6783 = vmatprep.subr.bf16.mxu1 %v8060_v42  ;;  %6815 = vmatprep.subr.bf16.mxu0 %v8060_v42 }
 0x26c   : > { %1916 = vmatprep.mubr.f32.mxu1 %v5709_v63  ;;  %2058 = vmatprep.mubr.f32.mxu0 %v5725_v0  ;;  %v5749_v63 = vld [vmem:[%s10988_s26 + $0x278] sm:$0xff] }
 0x26d   : > { %1917 = vmatmul.mubr.f32.gmra.mrb[54].mxu1 %v5708_v1  ;;  %2059 = vmatmul.mubr.f32.gmra.mrb[54].mxu0 %v5724_v4  ;;  %v5765_v0 = vld [vmem:[%s10988_s26 + $0x2f8] sm:$0xff]  ;;  %v5748_v1 = vld [vmem:[%s10988_s26 + $0x270] sm:$0xff] }
 0x26e   : > { %6785 = vmatpush3.bf16.msra.mxu1 %v8016_v46  ;;  %6817 = vmatpush3.bf16.msra.mxu0 %v8016_v46  ;;  %v5764_v4 = vld [vmem:[%s10988_s26 + $0x2f0] sm:$0xff] }
 0x26f   : > { %6787 = vmatprep.subr.bf16.mxu1 %v8068_v50  ;;  %6819 = vmatprep.subr.bf16.mxu0 %v8068_v50 }
 0x270   : > { %1921 = vmatprep.mubr.f32.mxu1 %v5711_v5  ;;  %2063 = vmatprep.mubr.f32.mxu0 %v5727_v41  ;;  %v5767_v5 = vld [vmem:[%s10988_s26 + $0x308] sm:$0xff] }
 0x271   : > { %1922 = vmatmul.mubr.f32.gmra.mrb[56].mxu1 %v5710_v14  ;;  %2064 = vmatmul.mubr.f32.gmra.mrb[56].mxu0 %v5726_v7  ;;  %v5783_v41 = vld [vmem:[%s10988_s26 + $0x388] sm:$0xff]  ;;  %v5766_v14 = vld [vmem:[%s10988_s26 + $0x300] sm:$0xff] }
 0x272   : > { %6789 = vmatpush3.bf16.msra.mxu1 %v8020_v53  ;;  %6821 = vmatpush3.bf16.msra.mxu0 %v8020_v53  ;;  %v5782_v7 = vld [vmem:[%s10988_s26 + $0x380] sm:$0xff] }
 0x273   : > { %6791 = vmatprep.subr.bf16.mxu1 %v8076_v58  ;;  %6823 = vmatprep.subr.bf16.mxu0 %v8076_v58 }
 0x274   : > { %1926 = vmatprep.mubr.f32.mxu1 %v5713_v8  ;;  %2068 = vmatprep.mubr.f32.mxu0 %v5729_v10  ;;  %v5769_v8 = vld [vmem:[%s10988_s26 + $0x318] sm:$0xff] }
 0x275   : > { %1927 = vmatmul.mubr.f32.gmra.mrb[58].mxu1 %v5712_v11  ;;  %2069 = vmatmul.mubr.f32.gmra.mrb[58].mxu0 %v5728_v12  ;;  %v5785_v10 = vld [vmem:[%s10988_s26 + $0x398] sm:$0xff]  ;;  %v5768_v11 = vld [vmem:[%s10988_s26 + $0x310] sm:$0xff]  ;;  %v5771_v12 = vld [vmem:[%s10988_s26 + $0x328] sm:$0xff] }
 0x276   : > { %6793 = vmatpush3.bf16.msra.mxu1 %v8024_v60  ;;  %6825 = vmatpush3.bf16.msra.mxu0 %v8024_v60 }
 0x277   : > { %6795 = vmatprep.subr.bf16.mxu1 %v8084_v2  ;;  %6827 = vmatprep.subr.bf16.mxu0 %v8084_v2 }
 0x278   : > { %1931 = vmatprep.mubr.f32.mxu1 %v5715_v13  ;;  %2073 = vmatprep.mubr.f32.mxu0 %v5731_v15  ;;  %v5770_v13 = vld [vmem:[%s10988_s26 + $0x320] sm:$0xff]  ;;  %v5773_v15 = vld [vmem:[%s10988_s26 + $0x338] sm:$0xff] }
 0x279   : > { %1932 = vmatmul.mubr.f32.gmra.mrb[60].mxu1 %v5714_v16  ;;  %2074 = vmatmul.mubr.f32.gmra.mrb[60].mxu0 %v5730_v18  ;;  %v5772_v16 = vld [vmem:[%s10988_s26 + $0x330] sm:$0xff]  ;;  %v5775_v18 = vld [vmem:[%s10988_s26 + $0x348] sm:$0xff] }
 0x27a   : > { %6797 = vmatpush3.bf16.msra.mxu1 %v8028_v3  ;;  %6829 = vmatpush3.bf16.msra.mxu0 %v8028_v3 }
 0x27b   : > { %6799 = vmatprep.subr.bf16.mxu1 %v8091_v6  ;;  %6831 = vmatprep.subr.bf16.mxu0 %v8091_v6 }
 0x27c   : > { %1936 = vmatprep.mubr.f32.mxu1 %v5717_v19  ;;  %2078 = vmatprep.mubr.f32.mxu0 %v5733_v20  ;;  %v5774_v19 = vld [vmem:[%s10988_s26 + $0x340] sm:$0xff]  ;;  %v5777_v20 = vld [vmem:[%s10988_s26 + $0x358] sm:$0xff] }
 0x27d   : > { %1937 = vmatmul.mubr.f32.gmra.mrb[62].mxu1 %v5716_v21  ;;  %2079 = vmatmul.mubr.f32.gmra.mrb[62].mxu0 %v5732_v22  ;;  %v5776_v21 = vld [vmem:[%s10988_s26 + $0x350] sm:$0xff]  ;;  %v5779_v22 = vld [vmem:[%s10988_s26 + $0x368] sm:$0xff] }
 0x27e   : > { %6801 = vmatpush3.bf16.msra.mxu1 %v8032_v9  ;;  %6833 = vmatpush3.bf16.msra.mxu0 %v8032_v9 }
 0x27f   : > { %6835 = vmatprep.subr.bf16.mxu1 %v8036_v17  ;;  %6867 = vmatprep.subr.bf16.mxu0 %v8036_v17 }
 0x280   : > { %2185 = vmatprep.mubr.f32.mxu1 %v5735_v23  ;;  %2327 = vmatprep.mubr.f32.mxu0 %v5751_v26  ;;  %v5778_v23 = vld [vmem:[%s10988_s26 + $0x360] sm:$0xff]  ;;  %v5781_v26 = vld [vmem:[%s10988_s26 + $0x378] sm:$0xff] }
 0x281   : > { %2186 = vmatmul.mubr.f32.vlgmr.msra.gmra.mrb[64].mxu1 %v5734_v27  ;;  %2328 = vmatmul.mubr.f32.vlgmr.msra.gmra.mrb[64].mxu0 %v5750_v28  ;;  %v5780_v27 = vld [vmem:[%s10988_s26 + $0x370] sm:$0xff]  ;;  %v5799_v28 = vld [vmem:[%s10988_s26 + $0x408] sm:$0xff] }
 0x282   : > { %6837 = vmatpush3.bf16.msra.mxu1 %v8004_v24  ;;  %6869 = vmatpush3.bf16.msra.mxu0 %v8004_v24 }
 0x283   : > { %6839 = vmatprep.subr.bf16.mxu1 %v8044_v25  ;;  %6871 = vmatprep.subr.bf16.mxu0 %v8044_v25 }
 0x284   : > { %2190 = vmatprep.mubr.f32.mxu1 %v5737_v29  ;;  %2332 = vmatprep.mubr.f32.mxu0 %v5753_v30  ;;  %v5801_v29 = vld [vmem:[%s10988_s26 + $0x418] sm:$0xff]  ;;  %v5803_v30 = vld [vmem:[%s10988_s26 + $0x428] sm:$0xff] }
 0x285   : > { %2191 = vmatmul.mubr.f32.gmra.mrb[66].mxu1 %v5736_v32  ;;  %2333 = vmatmul.mubr.f32.gmra.mrb[66].mxu0 %v5752_v34  ;;  %v5805_v32 = vld [vmem:[%s10988_s26 + $0x438] sm:$0xff]  ;;  %v5804_v34 = vld [vmem:[%s10988_s26 + $0x430] sm:$0xff] }
 0x286   : > { %6841 = vmatpush3.bf16.msra.mxu1 %v8008_v31  ;;  %6873 = vmatpush3.bf16.msra.mxu0 %v8008_v31 }
 0x287   : > { %6843 = vmatprep.subr.bf16.mxu1 %v8052_v33  ;;  %6875 = vmatprep.subr.bf16.mxu0 %v8052_v33 }
 0x288   : > { %2195 = vmatprep.mubr.f32.mxu1 %v5739_v35  ;;  %2337 = vmatprep.mubr.f32.mxu0 %v5755_v36  ;;  %v5807_v35 = vld [vmem:[%s10988_s26 + $0x448] sm:$0xff]  ;;  %v5806_v36 = vld [vmem:[%s10988_s26 + $0x440] sm:$0xff] }
 0x289   : > { %2196 = vmatmul.mubr.f32.gmra.mrb[68].mxu1 %v5738_v37  ;;  %2338 = vmatmul.mubr.f32.gmra.mrb[68].mxu0 %v5754_v39  ;;  %v5809_v37 = vld [vmem:[%s10988_s26 + $0x458] sm:$0xff]  ;;  %v5808_v39 = vld [vmem:[%s10988_s26 + $0x450] sm:$0xff] }
 0x28a   : > { %6845 = vmatpush3.bf16.msra.mxu1 %v8012_v38  ;;  %6877 = vmatpush3.bf16.msra.mxu0 %v8012_v38 }
 0x28b   : > { %6847 = vmatprep.subr.bf16.mxu1 %v8060_v42  ;;  %6879 = vmatprep.subr.bf16.mxu0 %v8060_v42 }
 0x28c   : > { %2200 = vmatprep.mubr.f32.mxu1 %v5741_v40  ;;  %2342 = vmatprep.mubr.f32.mxu0 %v5757_v43  ;;  %v5811_v40 = vld [vmem:[%s10988_s26 + $0x468] sm:$0xff]  ;;  %v5810_v43 = vld [vmem:[%s10988_s26 + $0x460] sm:$0xff] }
 0x28d   : > { %2201 = vmatmul.mubr.f32.gmra.mrb[70].mxu1 %v5740_v44  ;;  %2343 = vmatmul.mubr.f32.gmra.mrb[70].mxu0 %v5756_v45  ;;  %v5813_v44 = vld [vmem:[%s10988_s26 + $0x478] sm:$0xff]  ;;  %v5812_v45 = vld [vmem:[%s10988_s26 + $0x470] sm:$0xff] }
 0x28e   : > { %6849 = vmatpush3.bf16.msra.mxu1 %v8016_v46  ;;  %6881 = vmatpush3.bf16.msra.mxu0 %v8016_v46 }
 0x28f   : > { %6851 = vmatprep.subr.bf16.mxu1 %v8068_v50  ;;  %6883 = vmatprep.subr.bf16.mxu0 %v8068_v50 }
 0x290   : > { %2205 = vmatprep.mubr.f32.mxu1 %v5743_v47  ;;  %2347 = vmatprep.mubr.f32.mxu0 %v5759_v48  ;;  %v10962_v47 = vlaneseq }
 0x291   : > { %2206 = vmatmul.mubr.f32.gmra.mrb[72].mxu1 %v5742_v49  ;;  %2348 = vmatmul.mubr.f32.gmra.mrb[72].mxu0 %v5758_v51 }
 0x292   : > { %6853 = vmatpush3.bf16.msra.mxu1 %v8020_v53  ;;  %6885 = vmatpush3.bf16.msra.mxu0 %v8020_v53  ;;  %v8636_v48 = vshrl.u32 %v10962_v47, 7 }
 0x293   : > { %6855 = vmatprep.subr.bf16.mxu1 %v8076_v58  ;;  %6887 = vmatprep.subr.bf16.mxu0 %v8076_v58 }
 0x294   : > { %2210 = vmatprep.mubr.f32.mxu1 %v5745_v52  ;;  %2352 = vmatprep.mubr.f32.mxu0 %v5761_v54  ;;  %10989 = vst [vmem:[#allocation5_spill] sm:$0xff] %v8636_v48  ;;  %v8639_v49 = vsub.s32 0, %v8636_v48  ;;  %v8642_v51 = vsub.s32 1, %v8636_v48  ;;  %v8647_v52 = vld [vmem:[%s10941_s6] sm:$0xff] }
 0x295   : > { %2211 = vmatmul.mubr.f32.gmra.mrb[74].mxu1 %v5744_v55  ;;  %2353 = vmatmul.mubr.f32.gmra.mrb[74].mxu0 %v5760_v56 }
 0x296   : > { %6857 = vmatpush3.bf16.msra.mxu1 %v8024_v60  ;;  %6889 = vmatpush3.bf16.msra.mxu0 %v8024_v60  ;;  %10990 = vst [vmem:[#allocation6_spill] sm:$0xff] %v8639_v49  ;;  %10991 = vst [vmem:[#allocation7_spill] sm:$0xff] %v8642_v51  ;;  %v8651_v55 = vrot.slane %v8647_v52, %v8639_v49 }
 0x297   : > { %6859 = vmatprep.subr.bf16.mxu1 %v8084_v2  ;;  %6891 = vmatprep.subr.bf16.mxu0 %v8084_v2 }
 0x298   : > { %2215 = vmatprep.mubr.f32.mxu1 %v5747_v57  ;;  %2357 = vmatprep.mubr.f32.mxu0 %v5763_v59  ;;  %v8655_v57 = vrot.slane %v8647_v52, %v8642_v51 }
 0x299   : > { %2216 = vmatmul.mubr.f32.gmra.mrb[76].mxu1 %v5746_v61  ;;  %2358 = vmatmul.mubr.f32.gmra.mrb[76].mxu0 %v5762_v62 }
 0x29a   : > { %6861 = vmatpush3.bf16.msra.mxu1 %v8028_v3  ;;  %6893 = vmatpush3.bf16.msra.mxu0 %v8028_v3 }
 0x29b   : > { %6863 = vmatprep.subr.bf16.mxu1 %v8091_v6  ;;  %6895 = vmatprep.subr.bf16.mxu0 %v8091_v6 }
 0x29c   : > { %2220 = vmatprep.mubr.f32.mxu1 %v5749_v63  ;;  %2362 = vmatprep.mubr.f32.mxu0 %v5765_v0 }
 0x29d   : > { %2221 = vmatmul.mubr.f32.gmra.mrb[78].mxu1 %v5748_v1  ;;  %2363 = vmatmul.mubr.f32.gmra.mrb[78].mxu0 %v5764_v4 }
 0x29e   : > { %6865 = vmatpush3.bf16.msra.mxu1 %v8032_v9  ;;  %6897 = vmatpush3.bf16.msra.mxu0 %v8032_v9 }
 0x29f   : > { %6899 = vmatprep.subr.bf16.mxu1 %v8036_v17  ;;  %2469 = vmatprep.mubr.f32.mxu1 %v5767_v5  ;;  %v5784_v17 = vld [vmem:[%s10988_s26 + $0x390] sm:$0xff] }
 0x2a0   : > { %2611 = vmatprep.mubr.f32.mxu0 %v5783_v41 }
 0x2a1   : > { %2470 = vmatmul.mubr.f32.vlgmr.msra.gmra.mrb[80].mxu1 %v5766_v14  ;;  %2612 = vmatmul.mubr.f32.vlgmr.msra.gmra.mrb[80].mxu0 %v5782_v7 }
 0x2a2   : > { %6901 = vmatpush3.bf16.msra.mxu1 %v8004_v24  ;;  %2474 = vmatprep.mubr.f32.mxu1 %v5769_v8  ;;  %v5787_v24 = vld [vmem:[%s10988_s26 + $0x3a8] sm:$0xff] }
 0x2a3   : > { %6903 = vmatprep.subr.bf16.mxu1 %v8044_v25  ;;  %2616 = vmatprep.mubr.f32.mxu0 %v5785_v10  ;;  %v5786_v25 = vld [vmem:[%s10988_s26 + $0x3a0] sm:$0xff] }
 0x2a5   : > { %2475 = vmatmul.mubr.f32.gmra.mrb[82].mxu1 %v5768_v11  ;;  %2617 = vmatmul.mubr.f32.gmra.mrb[82].mxu0 %v5784_v17 }
 0x2a6   : > { %6905 = vmatpush3.bf16.msra.mxu1 %v8008_v31  ;;  %2479 = vmatprep.mubr.f32.mxu1 %v5771_v12  ;;  %v5789_v31 = vld [vmem:[%s10988_s26 + $0x3b8] sm:$0xff] }
 0x2a7   : > { %6907 = vmatprep.subr.bf16.mxu1 %v8052_v33  ;;  %2621 = vmatprep.mubr.f32.mxu0 %v5787_v24  ;;  %v5788_v33 = vld [vmem:[%s10988_s26 + $0x3b0] sm:$0xff] }
 0x2a9   : > { %2480 = vmatmul.mubr.f32.gmra.mrb[84].mxu1 %v5770_v13  ;;  %2622 = vmatmul.mubr.f32.gmra.mrb[84].mxu0 %v5786_v25 }
 0x2aa   : > { %6909 = vmatpush3.bf16.msra.mxu1 %v8012_v38  ;;  %2484 = vmatprep.mubr.f32.mxu1 %v5773_v15  ;;  %v5791_v38 = vld [vmem:[%s10988_s26 + $0x3c8] sm:$0xff] }
 0x2ab   : > { %6911 = vmatprep.subr.bf16.mxu1 %v8060_v42  ;;  %2626 = vmatprep.mubr.f32.mxu0 %v5789_v31  ;;  %v5790_v42 = vld [vmem:[%s10988_s26 + $0x3c0] sm:$0xff] }
 0x2ad   : > { %2485 = vmatmul.mubr.f32.gmra.mrb[86].mxu1 %v5772_v16  ;;  %2627 = vmatmul.mubr.f32.gmra.mrb[86].mxu0 %v5788_v33 }
 0x2ae   : > { %6913 = vmatpush3.bf16.msra.mxu1 %v8016_v46  ;;  %2489 = vmatprep.mubr.f32.mxu1 %v5775_v18  ;;  %v5793_v46 = vld [vmem:[%s10988_s26 + $0x3d8] sm:$0xff] }
 0x2af   : > { %6915 = vmatprep.subr.bf16.mxu1 %v8068_v50  ;;  %2631 = vmatprep.mubr.f32.mxu0 %v5791_v38  ;;  %v5792_v50 = vld [vmem:[%s10988_s26 + $0x3d0] sm:$0xff] }
 0x2b1   : > { %2490 = vmatmul.mubr.f32.gmra.mrb[88].mxu1 %v5774_v19  ;;  %2632 = vmatmul.mubr.f32.gmra.mrb[88].mxu0 %v5790_v42 }
 0x2b2   : > { %6917 = vmatpush3.bf16.msra.mxu1 %v8020_v53  ;;  %2494 = vmatprep.mubr.f32.mxu1 %v5777_v20  ;;  %v5795_v53 = vld [vmem:[%s10988_s26 + $0x3e8] sm:$0xff] }
 0x2b3   : > { %6919 = vmatprep.subr.bf16.mxu1 %v8076_v58  ;;  %2636 = vmatprep.mubr.f32.mxu0 %v5793_v46  ;;  %v5794_v58 = vld [vmem:[%s10988_s26 + $0x3e0] sm:$0xff] }
 0x2b5   : > { %2495 = vmatmul.mubr.f32.gmra.mrb[90].mxu1 %v5776_v21  ;;  %2637 = vmatmul.mubr.f32.gmra.mrb[90].mxu0 %v5792_v50 }
 0x2b6   : > { %6921 = vmatpush3.bf16.msra.mxu1 %v8024_v60  ;;  %2499 = vmatprep.mubr.f32.mxu1 %v5779_v22  ;;  %v5797_v60 = vld [vmem:[%s10988_s26 + $0x3f8] sm:$0xff] }
 0x2b7   : > { %6923 = vmatprep.subr.bf16.mxu1 %v8084_v2  ;;  %2641 = vmatprep.mubr.f32.mxu0 %v5795_v53  ;;  %v5796_v2 = vld [vmem:[%s10988_s26 + $0x3f0] sm:$0xff] }
 0x2b9   : > { %2500 = vmatmul.mubr.f32.gmra.mrb[92].mxu1 %v5778_v23  ;;  %2642 = vmatmul.mubr.f32.gmra.mrb[92].mxu0 %v5794_v58 }
 0x2ba   : > { %6925 = vmatpush3.bf16.msra.mxu1 %v8028_v3  ;;  %2504 = vmatprep.mubr.f32.mxu1 %v5781_v26  ;;  %v5798_v3 = vld [vmem:[%s10988_s26 + $0x400] sm:$0xff] }
 0x2bb   : > { %6927 = vmatprep.subr.bf16.mxu1 %v8091_v6  ;;  %2646 = vmatprep.mubr.f32.mxu0 %v5797_v60  ;;  %v5800_v6 = vld [vmem:[%s10988_s26 + $0x410] sm:$0xff] }
 0x2bd   : > { %2505 = vmatmul.mubr.f32.gmra.mrb[94].mxu1 %v5780_v27  ;;  %2647 = vmatmul.mubr.f32.gmra.mrb[94].mxu0 %v5796_v2 }
 0x2be   : > { %6929 = vmatpush3.bf16.msra.mxu1 %v8032_v9  ;;  %2753 = vmatprep.mubr.f32.mxu1 %v5799_v28  ;;  %v5802_v9 = vld [vmem:[%s10988_s26 + $0x420] sm:$0xff] }
 0x2c1   : > { %2754 = vmatmul.mubr.f32.vlgmr.msra.gmra.mrb[96].mxu1 %v5798_v3 }
 0x2c2   : > { %2758 = vmatprep.mubr.f32.mxu1 %v5801_v29 }
 0x2c5   : > { %2759 = vmatmul.mubr.f32.gmra.mrb[98].mxu1 %v5800_v6 }
 0x2c6   : > { %2763 = vmatprep.mubr.f32.mxu1 %v5803_v30 }
 0x2c9   : > { %2764 = vmatmul.mubr.f32.gmra.mrb[100].mxu1 %v5802_v9 }
 0x2ca   : > { %2768 = vmatprep.mubr.f32.mxu1 %v5805_v32 }
 0x2cd   : > { %2769 = vmatmul.mubr.f32.gmra.mrb[102].mxu1 %v5804_v34 }
 0x2ce   : > { %2773 = vmatprep.mubr.f32.mxu1 %v5807_v35 }
 0x2d1   : > { %2774 = vmatmul.mubr.f32.gmra.mrb[104].mxu1 %v5806_v36 }
 0x2d2   : > { %2778 = vmatprep.mubr.f32.mxu1 %v5809_v37 }
 0x2d5   : > { %2779 = vmatmul.mubr.f32.gmra.mrb[106].mxu1 %v5808_v39 }
 0x2d6   : > { %2783 = vmatprep.mubr.f32.mxu1 %v5811_v40 }
 0x2d9   : > { %2784 = vmatmul.mubr.f32.gmra.mrb[108].mxu1 %v5810_v43 }
 0x2da   : > { %2788 = vmatprep.mubr.f32.mxu1 %v5813_v44 }
 0x2dd   : > { %2789 = vmatmul.mubr.f32.gmra.mrb[110].mxu1 %v5812_v45 }
 0x314   : > { %v5966_v54 = vpop.f32.mrb[32].mxu1  ;;  %v6022_v56 = vpop.f32.mrb[32].mxu0 }
 0x315   : > { %v5967_v59 = vpop.f32.mrb[33].mxu1  ;;  %v6023_v61 = vpop.f32.mrb[33].mxu0 }
 0x316   : > { %v5968_v62 = vadd.f32 %v5967_v59, %v5966_v54  ;;  %v6024_v63 = vadd.f32 %v6023_v61, %v6022_v56 }
 0x318   : > { %v1662_v0 = vmul.f32 %v5968_v62, %v8651_v55  ;;  %v5969_v1 = vpop.f32.mrb[34].mxu1  ;;  %v1804_v4 = vmul.f32 %v6024_v63, %v8655_v57  ;;  %v6025_v5 = vpop.f32.mrb[34].mxu0 }
 0x319   : > { %v5970_v41 = vpop.f32.mrb[35].mxu1  ;;  %v6026_v14 = vpop.f32.mrb[35].mxu0 }
 0x31a   : > { %v5971_v7 = vadd.f32 %v5970_v41, %v5969_v1  ;;  %v8659_v8 = vadd.f32 %v1804_v4, %v1662_v0  ;;  %v6027_v10 = vadd.f32 %v6026_v14, %v6025_v5  ;;  %v8684_v1 = vsub.s32 2, %v8636_v48 }
 0x31b   : > { %v8687_v4 = vsub.s32 3, %v8636_v48 }
 0x31c   : > { %v1663_v11 = vmul.f32 %v5971_v7, %v8651_v55  ;;  %v5972_v17 = vpop.f32.mrb[36].mxu1  ;;  %v1805_v12 = vmul.f32 %v6027_v10, %v8655_v57  ;;  %v6028_v24 = vpop.f32.mrb[36].mxu0  ;;  %10992 = vst [vmem:[#allocation8_spill] sm:$0xff] %v8684_v1 }
 0x31d   : > { %v5973_v13 = vpop.f32.mrb[37].mxu1  ;;  %v6029_v25 = vpop.f32.mrb[37].mxu0  ;;  %10993 = vst [vmem:[#allocation9_spill] sm:$0xff] %v8687_v4 }
 0x31e   : > { %v5974_v15 = vadd.f32 %v5973_v13, %v5972_v17  ;;  %v8663_v31 = vadd.f32 %v1805_v12, %v1663_v11  ;;  %v6030_v16 = vadd.f32 %v6029_v25, %v6028_v24  ;;  %v8695_v24 = vrot.slane %v8647_v52, %v8684_v1 }
 0x31f   : > { %v8699_v25 = vrot.slane %v8647_v52, %v8687_v4 }
 0x320   : > { %v1664_v33 = vmul.f32 %v5974_v15, %v8651_v55  ;;  %v5975_v18 = vpop.f32.mrb[38].mxu1  ;;  %v1806_v38 = vmul.f32 %v6030_v16, %v8655_v57  ;;  %v6031_v19 = vpop.f32.mrb[38].mxu0 }
 0x321   : > { %v5976_v42 = vpop.f32.mrb[39].mxu1  ;;  %v6032_v20 = vpop.f32.mrb[39].mxu0 }
 0x322   : > { %v5977_v46 = vadd.f32 %v5976_v42, %v5975_v18  ;;  %v8667_v21 = vadd.f32 %v1806_v38, %v1664_v33  ;;  %v6033_v50 = vadd.f32 %v6032_v20, %v6031_v19 }
 0x324   : > { %v1665_v22 = vmul.f32 %v5977_v46, %v8651_v55  ;;  %v5978_v53 = vpop.f32.mrb[40].mxu1  ;;  %v1807_v23 = vmul.f32 %v6033_v50, %v8655_v57  ;;  %v6034_v58 = vpop.f32.mrb[40].mxu0 }
 0x325   : > { %v5979_v26 = vpop.f32.mrb[41].mxu1  ;;  %v6035_v60 = vpop.f32.mrb[41].mxu0 }
 0x326   : > { %v5980_v27 = vadd.f32 %v5979_v26, %v5978_v53  ;;  %v8671_v2 = vadd.f32 %v1807_v23, %v1665_v22  ;;  %v6036_v28 = vadd.f32 %v6035_v60, %v6034_v58  ;;  %v2860_v23 = vld [vmem:[%s10943_s8] sm:$0xff]  ;;  %v2861_v58 = vld [vmem:[%s10943_s8 + $0x8] sm:$0xff] }
 0x328   : > { %v1666_v3 = vmul.f32 %v5980_v27, %v8651_v55  ;;  %v5981_v29 = vpop.f32.mrb[42].mxu1  ;;  %v1808_v6 = vmul.f32 %v6036_v28, %v8655_v57  ;;  %v6037_v30 = vpop.f32.mrb[42].mxu0 }
 0x329   : > { %v5982_v9 = vpop.f32.mrb[43].mxu1  ;;  %v6038_v32 = vpop.f32.mrb[43].mxu0 }
 0x32a   : > { %v5983_v34 = vadd.f32 %v5982_v9, %v5981_v29  ;;  %v8675_v35 = vadd.f32 %v1808_v6, %v1666_v3  ;;  %v6039_v36 = vadd.f32 %v6038_v32, %v6037_v30  ;;  %v7675_v6 = vmov 0.0|0.0  }
 0x32b   : > { %6930 = vmatprep.subr.bf16.mxu1 %v7675_v6  ;;  %v6931_v30 = vpack.c.bf16 %v2861_v58, %v2860_v23  ;;  %6942 = vmatprep.subr.bf16.mxu0 %v7675_v6 }
 0x32c   : > { %v1667_v37 = vmul.f32 %v5983_v34, %v8651_v55  ;;  %v5984_v39 = vpop.f32.mrb[44].mxu1  ;;  %v1809_v40 = vmul.f32 %v6039_v36, %v8655_v57  ;;  %v6040_v43 = vpop.f32.mrb[44].mxu0  ;;  %v2862_v36 = vld [vmem:[%s10943_s8 + $0x10] sm:$0xff] }
 0x32d   : > { %v5985_v44 = vpop.f32.mrb[45].mxu1  ;;  %v6041_v45 = vpop.f32.mrb[45].mxu0  ;;  %6932 = vmatpush3.bf16.msra.mxu1 %v6931_v30 }
 0x32e   : > { %v5986_v54 = vadd.f32 %v5985_v44, %v5984_v39  ;;  %v8679_v56 = vadd.f32 %v1809_v40, %v1667_v37  ;;  %v6042_v59 = vadd.f32 %v6041_v45, %v6040_v43  ;;  %v2863_v37 = vld [vmem:[%s10943_s8 + $0x18] sm:$0xff]  ;;  %6933 = vmatprep.subr.bf16.mxu1 %v7675_v6 }
 0x330   : > { %v1668_v61 = vmul.f32 %v5986_v54, %v8651_v55  ;;  %v5987_v62 = vpop.f32.mrb[46].mxu1  ;;  %v1810_v63 = vmul.f32 %v6042_v59, %v8655_v57  ;;  %v6043_v0 = vpop.f32.mrb[46].mxu0 }
 0x331   : > { %v5988_v5 = vpop.f32.mrb[47].mxu1  ;;  %v6044_v41 = vpop.f32.mrb[47].mxu0 }
 0x332   : > { %v5989_v14 = vadd.f32 %v5988_v5, %v5987_v62  ;;  %v8689_v7 = vadd.f32 %v1810_v63, %v1668_v61  ;;  %v6045_v10 = vadd.f32 %v6044_v41, %v6043_v0  ;;  %v2864_v0 = vld [vmem:[%s10943_s8 + $0x20] sm:$0xff]  ;;  %v2865_v5 = vld [vmem:[%s10943_s8 + $0x28] sm:$0xff] }
 0x334   : > { %v1669_v11 = vmul.f32 %v5989_v14, %v8651_v55  ;;  %v6078_v17 = vpop.f32.mrb[48].mxu1  ;;  %v1811_v12 = vmul.f32 %v6045_v10, %v8655_v57  ;;  %v6134_v13 = vpop.f32.mrb[48].mxu0 }
 0x335   : > { %v6079_v15 = vpop.f32.mrb[49].mxu1  ;;  %v6135_v16 = vpop.f32.mrb[49].mxu0 }
 0x336   : > { %v8701_v33 = vadd.f32 %v1811_v12, %v1669_v11  ;;  %v6080_v18 = vadd.f32 %v6079_v15, %v6078_v17  ;;  %v6136_v38 = vadd.f32 %v6135_v16, %v6134_v13 }
 0x338   : > { %v1946_v55 = vmul.f32 %v6080_v18, %v8695_v24  ;;  %v2088_v19 = vmul.f32 %v6136_v38, %v8699_v25  ;;  %v6081_v57 = vpop.f32.mrb[50].mxu1  ;;  %v6137_v42 = vpop.f32.mrb[50].mxu0  ;;  %v2866_v38 = vld [vmem:[%s10943_s8 + $0x30] sm:$0xff] }
 0x339   : > { %v6082_v20 = vpop.f32.mrb[51].mxu1  ;;  %v6138_v46 = vpop.f32.mrb[51].mxu0 }
 0x33a   : > { %v1954_v50 = vadd.f32 %v1946_v55, %v8659_v8  ;;  %v6083_v22 = vadd.f32 %v6082_v20, %v6081_v57  ;;  %v6139_v53 = vadd.f32 %v6138_v46, %v6137_v42  ;;  %v2867_v55 = vld [vmem:[%s10943_s8 + $0x38] sm:$0xff] }
 0x33c   : > { %v8712_v26 = vadd.f32 %v2088_v19, %v1954_v50  ;;  %v1947_v60 = vmul.f32 %v6083_v22, %v8695_v24  ;;  %v2089_v27 = vmul.f32 %v6139_v53, %v8699_v25  ;;  %v6084_v28 = vpop.f32.mrb[52].mxu1  ;;  %v6140_v3 = vpop.f32.mrb[52].mxu0 }
 0x33d   : > { %v6085_v29 = vpop.f32.mrb[53].mxu1  ;;  %v6141_v8 = vpop.f32.mrb[53].mxu0 }
 0x33e   : > { %v1955_v9 = vadd.f32 %v1947_v60, %v8663_v31  ;;  %v6086_v32 = vadd.f32 %v6085_v29, %v6084_v28  ;;  %v6142_v34 = vadd.f32 %v6141_v8, %v6140_v3  ;;  %v6934_v31 = vpack.c.bf16 %v2863_v37, %v2862_v36 }
 0x33f   : > { %v7677_v8 = vmov 0.0  }
 0x340   : > { %v8723_v39 = vadd.f32 %v2089_v27, %v1955_v9  ;;  %v1948_v40 = vmul.f32 %v6086_v32, %v8695_v24  ;;  %v2090_v43 = vmul.f32 %v6142_v34, %v8699_v25  ;;  %v6087_v44 = vpop.f32.mrb[54].mxu1  ;;  %v6143_v45 = vpop.f32.mrb[54].mxu0  ;;  %6935 = vmatpush3.bf16.msra.mxu1 %v6934_v31  ;;  %6590 = vmatprep.mubr.msk.f32.mxu1 %vm7676_vm5, %v7677_v8  ;;  %v2228_v34 = vsub.s32 4, %v8636_v48 }
 0x341   : > { %v6088_v54 = vpop.f32.mrb[55].mxu1  ;;  %v6144_v59 = vpop.f32.mrb[55].mxu0  ;;  %6936 = vmatprep.subr.bf16.mxu1 %v7675_v6  ;;  %6597 = vmatprep.mubr.msk.f32.mxu0 %vm7676_vm5, %v7677_v8 }
 0x342   : > { %v1956_v61 = vadd.f32 %v1948_v40, %v8667_v21  ;;  %v6089_v62 = vadd.f32 %v6088_v54, %v6087_v44  ;;  %v6145_v63 = vadd.f32 %v6144_v59, %v6143_v45  ;;  %v6937_v21 = vpack.c.bf16 %v2865_v5, %v2864_v0 }
 0x343   : > { %v2370_v45 = vsub.s32 5, %v8636_v48 }
 0x344   : > { %v8734_v41 = vadd.f32 %v2090_v43, %v1956_v61  ;;  %v1949_v14 = vmul.f32 %v6089_v62, %v8695_v24  ;;  %v2091_v10 = vmul.f32 %v6145_v63, %v8699_v25  ;;  %v6090_v11 = vpop.f32.mrb[56].mxu1  ;;  %v6146_v17 = vpop.f32.mrb[56].mxu0  ;;  %6938 = vmatpush3.bf16.msra.mxu1 %v6937_v21  ;;  %v8767_v62 = vrot.slane %v8647_v52, %v2228_v34 }
 0x345   : > { %v6091_v12 = vpop.f32.mrb[57].mxu1  ;;  %v6147_v13 = vpop.f32.mrb[57].mxu0  ;;  %6939 = vmatprep.subr.bf16.mxu1 %v7675_v6 }
 0x346   : > { %v1957_v15 = vadd.f32 %v1949_v14, %v8671_v2  ;;  %v6092_v16 = vadd.f32 %v6091_v12, %v6090_v11  ;;  %v6148_v18 = vadd.f32 %v6147_v13, %v6146_v17  ;;  %v6940_v2 = vpack.c.bf16 %v2867_v55, %v2866_v38 }
 0x347   : > { %v8776_v11 = vrot.slane %v8647_v52, %v2370_v45 }
 0x348   : > { %v8745_v19 = vadd.f32 %v2091_v10, %v1957_v15  ;;  %v1950_v57 = vmul.f32 %v6092_v16, %v8695_v24  ;;  %v2092_v42 = vmul.f32 %v6148_v18, %v8699_v25  ;;  %v6093_v20 = vpop.f32.mrb[58].mxu1  ;;  %v6149_v46 = vpop.f32.mrb[58].mxu0  ;;  %6941 = vmatpush3.bf16.msra.mxu1 %v6940_v2 }
 0x349   : > { %v6094_v50 = vpop.f32.mrb[59].mxu1  ;;  %v6150_v22 = vpop.f32.mrb[59].mxu0 }
 0x34a   : > { %v1958_v53 = vadd.f32 %v1950_v57, %v8675_v35  ;;  %v6095_v23 = vadd.f32 %v6094_v50, %v6093_v20  ;;  %v6151_v58 = vadd.f32 %v6150_v22, %v6149_v46 }
 0x34c   : > { %v8750_v60 = vadd.f32 %v2092_v42, %v1958_v53  ;;  %v1951_v27 = vmul.f32 %v6095_v23, %v8695_v24  ;;  %v2093_v28 = vmul.f32 %v6151_v58, %v8699_v25  ;;  %v6096_v3 = vpop.f32.mrb[60].mxu1  ;;  %v6152_v29 = vpop.f32.mrb[60].mxu0 }
 0x34d   : > { %v6097_v6 = vpop.f32.mrb[61].mxu1  ;;  %v6153_v30 = vpop.f32.mrb[61].mxu0 }
 0x34e   : > { %v1959_v35 = vadd.f32 %v1951_v27, %v8679_v56  ;;  %v6098_v9 = vadd.f32 %v6097_v6, %v6096_v3  ;;  %v6154_v32 = vadd.f32 %v6153_v30, %v6152_v29 }
 0x350   : > { %v8758_v36 = vadd.f32 %v2093_v28, %v1959_v35  ;;  %v1952_v37 = vmul.f32 %v6098_v9, %v8695_v24  ;;  %v2094_v40 = vmul.f32 %v6154_v32, %v8699_v25  ;;  %v6099_v43 = vpop.f32.mrb[62].mxu1  ;;  %v6155_v44 = vpop.f32.mrb[62].mxu0 }
 0x351   : > { %v6100_v31 = vpop.f32.mrb[63].mxu1  ;;  %v6156_v54 = vpop.f32.mrb[63].mxu0 }
 0x352   : > { %v1960_v59 = vadd.f32 %v1952_v37, %v8689_v7  ;;  %v6101_v61 = vadd.f32 %v6100_v31, %v6099_v43  ;;  %v6157_v56 = vadd.f32 %v6156_v54, %v6155_v44 }
 0x354   : > { %v8769_v63 = vadd.f32 %v2094_v40, %v1960_v59  ;;  %v1953_v0 = vmul.f32 %v6101_v61, %v8695_v24  ;;  %v6190_v5 = vpop.f32.mrb[64].mxu1  ;;  %v2095_v14 = vmul.f32 %v6157_v56, %v8699_v25  ;;  %v6246_v10 = vpop.f32.mrb[64].mxu0 }
 0x355   : > { %v6191_v7 = vpop.f32.mrb[65].mxu1  ;;  %v6247_v17 = vpop.f32.mrb[65].mxu0 }
 0x356   : > { %v1961_v21 = vadd.f32 %v1953_v0, %v8701_v33  ;;  %v6192_v12 = vadd.f32 %v6191_v7, %v6190_v5  ;;  %v6248_v13 = vadd.f32 %v6247_v17, %v6246_v10 }
 0x358   : > { %v8779_v15 = vadd.f32 %v2095_v14, %v1961_v21  ;;  %v2230_v16 = vmul.f32 %v6192_v12, %v8767_v62  ;;  %v2372_v24 = vmul.f32 %v6248_v13, %v8776_v11  ;;  %v6193_v18 = vpop.f32.mrb[66].mxu1  ;;  %v6249_v25 = vpop.f32.mrb[66].mxu0 }
 0x359   : > { %v6194_v38 = vpop.f32.mrb[67].mxu1  ;;  %v6250_v55 = vpop.f32.mrb[67].mxu0 }
 0x35a   : > { %v2238_v57 = vadd.f32 %v2230_v16, %v8712_v26  ;;  %v6195_v42 = vadd.f32 %v6194_v38, %v6193_v18  ;;  %v6251_v20 = vadd.f32 %v6250_v55, %v6249_v25 }
 0x35c   : > { %v8784_v46 = vadd.f32 %v2372_v24, %v2238_v57  ;;  %v2231_v33 = vmul.f32 %v6195_v42, %v8767_v62  ;;  %v2373_v2 = vmul.f32 %v6251_v20, %v8776_v11  ;;  %v6196_v50 = vpop.f32.mrb[68].mxu1  ;;  %v6252_v22 = vpop.f32.mrb[68].mxu0 }
 0x35d   : > { %v6197_v53 = vpop.f32.mrb[69].mxu1  ;;  %v6253_v23 = vpop.f32.mrb[69].mxu0 }
 0x35e   : > { %v2239_v58 = vadd.f32 %v2231_v33, %v8723_v39  ;;  %v6198_v27 = vadd.f32 %v6197_v53, %v6196_v50  ;;  %v6254_v28 = vadd.f32 %v6253_v23, %v6252_v22  ;;  %v2512_v50 = vsub.s32 6, %v8636_v48 }
 0x360   : > { %v8789_v3 = vadd.f32 %v2373_v2, %v2239_v58  ;;  %v2232_v26 = vmul.f32 %v6198_v27, %v8767_v62  ;;  %v2374_v29 = vmul.f32 %v6254_v28, %v8776_v11  ;;  %v6199_v6 = vpop.f32.mrb[70].mxu1  ;;  %v6255_v30 = vpop.f32.mrb[70].mxu0  ;;  %v2654_v27 = vsub.s32 7, %v8636_v48 }
 0x361   : > { %v6200_v35 = vpop.f32.mrb[71].mxu1  ;;  %v6256_v9 = vpop.f32.mrb[71].mxu0 }
 0x362   : > { %v2240_v32 = vadd.f32 %v2232_v26, %v8734_v41  ;;  %v6201_v37 = vadd.f32 %v6200_v35, %v6199_v6  ;;  %v6257_v40 = vadd.f32 %v6256_v9, %v6255_v30  ;;  %v8819_v30 = vrot.slane %v8647_v52, %v2512_v50 }
 0x364   : > { %v8794_v43 = vadd.f32 %v2374_v29, %v2240_v32  ;;  %v2233_v39 = vmul.f32 %v6201_v37, %v8767_v62  ;;  %v2375_v44 = vmul.f32 %v6257_v40, %v8776_v11  ;;  %v6202_v31 = vpop.f32.mrb[72].mxu1  ;;  %v6258_v54 = vpop.f32.mrb[72].mxu0 }
 0x365   : > { %v6203_v59 = vpop.f32.mrb[73].mxu1  ;;  %v6259_v61 = vpop.f32.mrb[73].mxu0 }
 0x366   : > { %v2241_v56 = vadd.f32 %v2233_v39, %v8745_v19  ;;  %v6204_v0 = vadd.f32 %v6203_v59, %v6202_v31  ;;  %v6260_v5 = vadd.f32 %v6259_v61, %v6258_v54  ;;  %v8828_v39 = vrot.slane %v8647_v52, %v2654_v27 }
 0x368   : > { %v8799_v14 = vadd.f32 %v2375_v44, %v2241_v56  ;;  %v2234_v41 = vmul.f32 %v6204_v0, %v8767_v62  ;;  %v2376_v10 = vmul.f32 %v6260_v5, %v8776_v11  ;;  %v6205_v7 = vpop.f32.mrb[74].mxu1  ;;  %v6261_v17 = vpop.f32.mrb[74].mxu0 }
 0x369   : > { %v6206_v21 = vpop.f32.mrb[75].mxu1  ;;  %v6262_v12 = vpop.f32.mrb[75].mxu0 }
 0x36a   : > { %v2242_v13 = vadd.f32 %v2234_v41, %v8750_v60  ;;  %v6207_v16 = vadd.f32 %v6206_v21, %v6205_v7  ;;  %v6263_v24 = vadd.f32 %v6262_v12, %v6261_v17 }
 0x36c   : > { %v8804_v18 = vadd.f32 %v2376_v10, %v2242_v13  ;;  %v2235_v19 = vmul.f32 %v6207_v16, %v8767_v62  ;;  %v2377_v25 = vmul.f32 %v6263_v24, %v8776_v11  ;;  %v6208_v38 = vpop.f32.mrb[76].mxu1  ;;  %v6264_v55 = vpop.f32.mrb[76].mxu0 }
 0x36d   : > { %v6209_v57 = vpop.f32.mrb[77].mxu1  ;;  %v6265_v42 = vpop.f32.mrb[77].mxu0 }
 0x36e   : > { %v2243_v20 = vadd.f32 %v2235_v19, %v8758_v36  ;;  %v6210_v33 = vadd.f32 %v6209_v57, %v6208_v38  ;;  %v6266_v2 = vadd.f32 %v6265_v42, %v6264_v55 }
 0x370   : > { %v8810_v22 = vadd.f32 %v2377_v25, %v2243_v20  ;;  %v2236_v60 = vmul.f32 %v6210_v33, %v8767_v62  ;;  %v2378_v53 = vmul.f32 %v6266_v2, %v8776_v11  ;;  %v6211_v23 = vpop.f32.mrb[78].mxu1  ;;  %v6267_v58 = vpop.f32.mrb[78].mxu0 }
 0x371   : > { %v6212_v28 = vpop.f32.mrb[79].mxu1  ;;  %v6268_v26 = vpop.f32.mrb[79].mxu0 }
 0x372   : > { %v2244_v29 = vadd.f32 %v2236_v60, %v8769_v63  ;;  %v6213_v6 = vadd.f32 %v6212_v28, %v6211_v23  ;;  %v6269_v36 = vadd.f32 %v6268_v26, %v6267_v58 }
 0x374   : > { %v8821_v35 = vadd.f32 %v2378_v53, %v2244_v29  ;;  %v2237_v9 = vmul.f32 %v6213_v6, %v8767_v62  ;;  %v2379_v32 = vmul.f32 %v6269_v36, %v8776_v11  ;;  %v6302_v37 = vpop.f32.mrb[80].mxu1  ;;  %v6358_v40 = vpop.f32.mrb[80].mxu0 }
 0x375   : > { %v6303_v63 = vpop.f32.mrb[81].mxu1  ;;  %v6359_v44 = vpop.f32.mrb[81].mxu0 }
 0x376   : > { %v2245_v31 = vadd.f32 %v2237_v9, %v8779_v15  ;;  %v6304_v54 = vadd.f32 %v6303_v63, %v6302_v37  ;;  %v6360_v59 = vadd.f32 %v6359_v44, %v6358_v40 }
 0x378   : > { %v8831_v61 = vadd.f32 %v2379_v32, %v2245_v31  ;;  %v2514_v56 = vmul.f32 %v6304_v54, %v8819_v30  ;;  %v2656_v62 = vmul.f32 %v6360_v59, %v8828_v39  ;;  %v6305_v11 = vpop.f32.mrb[82].mxu1  ;;  %v6361_v0 = vpop.f32.mrb[82].mxu0 }
 0x379   : > { %v6306_v5 = vpop.f32.mrb[83].mxu1  ;;  %v6362_v41 = vpop.f32.mrb[83].mxu0 }
 0x37a   : > { %v2522_v10 = vadd.f32 %v2514_v56, %v8784_v46  ;;  %v6307_v52 = vadd.f32 %v6306_v5, %v6305_v11  ;;  %v6363_v7 = vadd.f32 %v6362_v41, %v6361_v0 }
 0x37c   : > { %v8836_v17 = vadd.f32 %v2656_v62, %v2522_v10  ;;  %v2515_v15 = vmul.f32 %v6307_v52, %v8819_v30  ;;  %v2657_v21 = vmul.f32 %v6363_v7, %v8828_v39  ;;  %v6308_v12 = vpop.f32.mrb[84].mxu1  ;;  %v6364_v13 = vpop.f32.mrb[84].mxu0 }
 0x37d   : > { %v6309_v16 = vpop.f32.mrb[85].mxu1  ;;  %v6365_v24 = vpop.f32.mrb[85].mxu0 }
 0x37e   : > { %v2523_v19 = vadd.f32 %v2515_v15, %v8789_v3  ;;  %v6310_v25 = vadd.f32 %v6309_v16, %v6308_v12  ;;  %v6366_v38 = vadd.f32 %v6365_v24, %v6364_v13 }
 0x380   : > { %v8841_v55 = vadd.f32 %v2657_v21, %v2523_v19  ;;  %v2516_v46 = vmul.f32 %v6310_v25, %v8819_v30  ;;  %v2658_v57 = vmul.f32 %v6366_v38, %v8828_v39  ;;  %v6311_v42 = vpop.f32.mrb[86].mxu1  ;;  %v6367_v20 = vpop.f32.mrb[86].mxu0 }
 0x381   : > { %v6312_v33 = vpop.f32.mrb[87].mxu1  ;;  %v6368_v2 = vpop.f32.mrb[87].mxu0 }
 0x382   : > { %v2524_v60 = vadd.f32 %v2516_v46, %v8794_v43  ;;  %v6313_v53 = vadd.f32 %v6312_v33, %v6311_v42  ;;  %v6369_v23 = vadd.f32 %v6368_v2, %v6367_v20 }
 0x384   : > { %v2666_v58 = vadd.f32 %v2658_v57, %v2524_v60  ;;  %v2517_v28 = vmul.f32 %v6313_v53, %v8819_v30  ;;  %v2659_v3 = vmul.f32 %v6369_v23, %v8828_v39  ;;  %v6314_v26 = vpop.f32.mrb[88].mxu1  ;;  %v6370_v29 = vpop.f32.mrb[88].mxu0  ;;  %v5814_v60 = vld [vmem:[%s10941_s6 + $0x8] ss:$0 sm:$0xff] }
 0x385   : > { %v6315_v6 = vpop.f32.mrb[89].mxu1  ;;  %v6371_v36 = vpop.f32.mrb[89].mxu0 }
 0x386   : > { %v2525_v9 = vadd.f32 %v2517_v28, %v8799_v14  ;;  %v6316_v32 = vadd.f32 %v6315_v6, %v6314_v26  ;;  %v6372_v37 = vadd.f32 %v6371_v36, %v6370_v29 }
 0x388   : > { %v2667_v40 = vadd.f32 %v2659_v3, %v2525_v9  ;;  %v2518_v63 = vmul.f32 %v6316_v32, %v8819_v30  ;;  %v2660_v43 = vmul.f32 %v6372_v37, %v8828_v39  ;;  %v6317_v44 = vpop.f32.mrb[90].mxu1  ;;  %v6373_v31 = vpop.f32.mrb[90].mxu0 }
 0x389   : > { %v6318_v54 = vpop.f32.mrb[91].mxu1  ;;  %v6374_v59 = vpop.f32.mrb[91].mxu0 }
 0x38a   : > { %v2526_v56 = vadd.f32 %v2518_v63, %v8804_v18  ;;  %v6319_v62 = vadd.f32 %v6318_v54, %v6317_v44  ;;  %v6375_v11 = vadd.f32 %v6374_v59, %v6373_v31 }
 0x38c   : > { %v2668_v0 = vadd.f32 %v2660_v43, %v2526_v56  ;;  %v2519_v5 = vmul.f32 %v6319_v62, %v8819_v30  ;;  %v2661_v14 = vmul.f32 %v6375_v11, %v8828_v39  ;;  %v6320_v41 = vpop.f32.mrb[92].mxu1  ;;  %v6376_v10 = vpop.f32.mrb[92].mxu0 }
 0x38d   : > { %v6321_v52 = vpop.f32.mrb[93].mxu1  ;;  %v6377_v7 = vpop.f32.mrb[93].mxu0 }
 0x38e   : > { %v2527_v15 = vadd.f32 %v2519_v5, %v8810_v22  ;;  %v6322_v21 = vadd.f32 %v6321_v52, %v6320_v41  ;;  %v6378_v12 = vadd.f32 %v6377_v7, %v6376_v10 }
 0x390   : > { %v2669_v13 = vadd.f32 %v2661_v14, %v2527_v15  ;;  %v2520_v16 = vmul.f32 %v6322_v21, %v8819_v30  ;;  %v2662_v18 = vmul.f32 %v6378_v12, %v8828_v39  ;;  %v6323_v24 = vpop.f32.mrb[94].mxu1  ;;  %v6379_v19 = vpop.f32.mrb[94].mxu0 }
 0x391   : > { %v6324_v25 = vpop.f32.mrb[95].mxu1  ;;  %v6380_v38 = vpop.f32.mrb[95].mxu0 }
 0x392   : > { %v2528_v46 = vadd.f32 %v2520_v16, %v8821_v35  ;;  %v6325_v57 = vadd.f32 %v6324_v25, %v6323_v24  ;;  %v6381_v42 = vadd.f32 %v6380_v38, %v6379_v19 }
 0x394   : > { %v2670_v20 = vadd.f32 %v2662_v18, %v2528_v46  ;;  %v2521_v33 = vmul.f32 %v6325_v57, %v8819_v30  ;;  %v2663_v22 = vmul.f32 %v6381_v42, %v8828_v39  ;;  %v6414_v2 = vpop.f32.mrb[96].mxu1 }
 0x395   : > { %v6415_v53 = vpop.f32.mrb[97].mxu1 }
 0x396   : > { %v2529_v23 = vadd.f32 %v2521_v33, %v8831_v61  ;;  %v6416_v28 = vadd.f32 %v6415_v53, %v6414_v2  ;;  %v5815_v61 = vld [vmem:[%s10942_s7] ss:$0 sm:$0xff] }
 0x398   : > { %v2671_v3 = vadd.f32 %v2663_v22, %v2529_v23  ;;  %v2798_v26 = vmul.f32 %v6416_v28, %v5814_v60  ;;  %v6417_v29 = vpop.f32.mrb[98].mxu1 }
 0x399   : > { %v6418_v35 = vpop.f32.mrb[99].mxu1 }
 0x39a   : > { %v2806_v6 = vadd.f32 %v2798_v26, %v8836_v17  ;;  %v6419_v36 = vadd.f32 %v6418_v35, %v6417_v29 }
 0x39c   : > { %v2799_v9 = vmul.f32 %v6419_v36, %v5814_v60  ;;  %v6420_v30 = vpop.f32.mrb[100].mxu1  ;;  %v8871_v14 = vadd.f32 %v5815_v61, %v2806_v6 }
 0x39d   : > { %v6421_v32 = vpop.f32.mrb[101].mxu1 }
 0x39e   : > { %v2807_v39 = vadd.f32 %v2799_v9, %v8841_v55  ;;  %v6422_v37 = vadd.f32 %v6421_v32, %v6420_v30  ;;  %v2829_v12 = vmax.f32 %v8871_v14, 0.0 }
 0x3a0   : > { %v2800_v63 = vmul.f32 %v6422_v37, %v5814_v60  ;;  %v6423_v43 = vpop.f32.mrb[102].mxu1  ;;  %v8869_v17 = vadd.f32 %v5815_v61, %v2807_v39 }
 0x3a1   : > { %v6424_v44 = vpop.f32.mrb[103].mxu1 }
 0x3a2   : > { %v2808_v31 = vadd.f32 %v2800_v63, %v2666_v58  ;;  %v6425_v54 = vadd.f32 %v6424_v44, %v6423_v43  ;;  %v2830_v58 = vmax.f32 %v8869_v17, 0.0 }
 0x3a4   : > { %v2801_v59 = vmul.f32 %v6425_v54, %v5814_v60  ;;  %v6426_v56 = vpop.f32.mrb[104].mxu1  ;;  %v8873_v55 = vadd.f32 %v5815_v61, %v2808_v31  ;;  %v2839_v25 = vsel %vm2837_vm6, %v2830_v58, 0.0 }
 0x3a5   : > { %v6427_v62 = vpop.f32.mrb[105].mxu1 }
 0x3a6   : > { %v2809_v11 = vadd.f32 %v2801_v59, %v2667_v40  ;;  %v6428_v5 = vadd.f32 %v6427_v62, %v6426_v56  ;;  %v2831_v16 = vmax.f32 %v8873_v55, 0.0 }
 0x3a8   : > { %v2802_v41 = vmul.f32 %v6428_v5, %v5814_v60  ;;  %v6429_v10 = vpop.f32.mrb[106].mxu1  ;;  %v8876_v7 = vadd.f32 %v5815_v61, %v2809_v11  ;;  %v2841_v42 = vsel %vm2837_vm6, %v2831_v16, 0.0 }
 0x3a9   : > { %v6430_v52 = vpop.f32.mrb[107].mxu1 }
 0x3aa   : > { %v2810_v15 = vadd.f32 %v2802_v41, %v2668_v0  ;;  %v6431_v21 = vadd.f32 %v6430_v52, %v6429_v10  ;;  %v2832_v38 = vmax.f32 %v8876_v7, 0.0  ;;  %v2838_v0 = vsel %vm2837_vm6, %v2829_v12, 0.0  ;;  %v3196_v7 = vld [vmem:[%s10949_s14 + $0x88] sm:$0xff] }
 0x3ab   : > { %v2840_v23 = vadd.f32 %v2839_v25, %v2838_v0  ;;  %v3036_v0 = vld [vmem:[%s10947_s12 + $0x8] sm:$0xff] }
 0x3ac   : > { %v8880_v40 = vadd.f32 %v5815_v61, %v2810_v15  ;;  %v2803_v18 = vmul.f32 %v6431_v21, %v5814_v60  ;;  %v6432_v24 = vpop.f32.mrb[108].mxu1  ;;  %v2944_v15 = vld [vmem:[%s10945_s10 + $0x8] sm:$0xff] }
 0x3ad   : > { %v6433_v19 = vpop.f32.mrb[109].mxu1  ;;  %v2842_v6 = vadd.f32 %v2841_v42, %v2840_v23 }
 0x3ae   : > { %v2811_v46 = vadd.f32 %v2803_v18, %v2669_v13  ;;  %v6434_v57 = vadd.f32 %v6433_v19, %v6432_v24  ;;  %v2833_v33 = vmax.f32 %v8880_v40, 0.0  ;;  %v2843_v13 = vsel %vm2837_vm6, %v2832_v38, 0.0  ;;  %v2868_v18 = vld [vmem:[%s10944_s9] sm:$0x1]  ;;  %v3197_v40 = vld [vmem:[%s10949_s14 + $0x90] sm:$0xff] }
 0x3af   : > { %v2844_v32 = vadd.f32 %v2843_v13, %v2842_v6  ;;  %v3040_v13 = vld [vmem:[%s10947_s12 + $0x28] sm:$0xff]  ;;  %v3042_v6 = vld [vmem:[%s10947_s12 + $0x38] sm:$0xff] }
 0x3b0   : > { %v8893_v22 = vadd.f32 %v5815_v61, %v2811_v46  ;;  %v2804_v2 = vmul.f32 %v6434_v57, %v5814_v60  ;;  %v6435_v53 = vpop.f32.mrb[110].mxu1  ;;  %v2845_v36 = vsel %vm2837_vm6, %v2833_v33, 0.0  ;;  %v3035_v57 = vld [vmem:[%s10947_s12] sm:$0xff] }
 0x3b1   : > { %v6436_v28 = vpop.f32.mrb[111].mxu1  ;;  %v2846_v43 = vadd.f32 %v2845_v36, %v2844_v32  ;;  %v6945_v42 = vpack.c.bf16 %v3036_v0, %v3035_v57  ;;  %v3188_v32 = vld [vmem:[%s10949_s14 + $0x48] sm:$0xff]  ;;  %v3191_v57 = vld [vmem:[%s10949_s14 + $0x60] sm:$0xff]  ;;  %v3185_v0 = vld [vmem:[%s10949_s14 + $0x30] sm:$0xff] }
 0x3b2   : > { %v2834_v26 = vmax.f32 %v8893_v22, 0.0  ;;  %v2812_v29 = vadd.f32 %v2804_v2, %v2670_v20  ;;  %v6437_v35 = vadd.f32 %v6436_v28, %v6435_v53  ;;  %v3037_v2 = vld [vmem:[%s10947_s12 + $0x10] sm:$0xff]  ;;  %v3038_v53 = vld [vmem:[%s10947_s12 + $0x18] sm:$0xff]  ;;  %v3039_v28 = vld [vmem:[%s10947_s12 + $0x20] sm:$0xff] }
 0x3b3   : > { %v6949_v23 = vpack.c.bf16 %v3038_v53, %v3037_v2  ;;  %v3186_v22 = vld [vmem:[%s10949_s14 + $0x38] sm:$0xff] }
 0x3b4   : > { %v8902_v9 = vadd.f32 %v5815_v61, %v2812_v29  ;;  %v2805_v30 = vmul.f32 %v6437_v35, %v5814_v60  ;;  %v2847_v39 = vsel %vm2837_vm6, %v2834_v26, 0.0  ;;  %v6953_v29 = vpack.c.bf16 %v3040_v13, %v3039_v28  ;;  %v3041_v35 = vld [vmem:[%s10947_s12 + $0x30] sm:$0xff] }
 0x3b5   : > { %v2848_v31 = vadd.f32 %v2847_v39, %v2846_v43  ;;  %v6957_v36 = vpack.c.bf16 %v3042_v6, %v3041_v35  ;;  %v3182_v39 = vld [vmem:[%s10949_s14 + $0x18] sm:$0xff]  ;;  %v4163_v6 = vld [vmem:[%s10951_s16 + $0x8] sm:$0xff] }
 0x3b6   : > { %v2835_v37 = vmax.f32 %v8902_v9, 0.0  ;;  %v2813_v63 = vadd.f32 %v2805_v30, %v2671_v3  ;;  %v3180_v30 = vld [vmem:[%s10949_s14 + $0x8] sm:$0xff]  ;;  %v3190_v43 = vld [vmem:[%s10949_s14 + $0x58] sm:$0xff] }
 0x3b7   : > { %v3194_v9 = vld [vmem:[%s10949_s14 + $0x78] sm:$0xff] }
 0x3b8   : > { %v2849_v20 = vsel %vm2837_vm6, %v2835_v37, 0.0  ;;  %v8911_v44 = vadd.f32 %v5815_v61, %v2813_v63  ;;  %v2943_v61 = vld [vmem:[%s10945_s10] sm:$0xff]  ;;  %v6961_v63 = vpack.c.bf16 %v3188_v32, %v3180_v30  ;;  %v3202_v35 = vld [vmem:[%s10949_s14 + $0xb8] sm:$0xff]  ;;  %v4167_v30 = vld [vmem:[%s10951_s16 + $0x28] sm:$0xff] }
 0x3b9   : > { %v2850_v59 = vadd.f32 %v2849_v20, %v2848_v31  ;;  %v6943_v21 = vpack.c.bf16 %v2944_v15, %v2943_v61  ;;  %v3179_v20 = vld [vmem:[%s10949_s14] sm:$0xff]  ;;  %v3181_v61 = vld [vmem:[%s10949_s14 + $0x10] sm:$0xff]  ;;  %v4291_v32 = vld [vmem:[%s10951_s16 + $0x408] sm:$0xff] }
 0x3ba   : > { %v2836_v54 = vmax.f32 %v8911_v44, 0.0  ;;  %v3187_v31 = vld [vmem:[%s10949_s14 + $0x40] sm:$0xff]  ;;  %6962 = vmatprep.subr.bf16.mxu1 %v6961_v63  ;;  %v3189_v15 = vld [vmem:[%s10949_s14 + $0x50] sm:$0xff] }
 0x3bb   : > { %6944 = vmatpush3.bf16.msra.mxu0 %v6943_v21  ;;  %v9033_v44 = vld [vmem:[%s10948_s13] ss:$0 sm:$0xff] }
 0x3bc   : > { %v2851_v60 = vsel %vm2837_vm6, %v2836_v54, 0.0  ;;  %6946 = vmatprep.subr.bf16.mxu0 %v6945_v42 }
 0x3bd   : > { %v2852_v56 = vadd.f32 %v2851_v60, %v2850_v59  ;;  %v6965_v59 = vpack.c.bf16 %v3190_v43, %v3182_v39  ;;  %v6963_v60 = vpack.c.bf16 %v3187_v31, %v3179_v20  ;;  %v4295_v39 = vld [vmem:[%s10951_s16 + $0x428] sm:$0xff]  ;;  %v3199_v20 = vld [vmem:[%s10949_s14 + $0xa0] sm:$0xff]  ;;  %v3201_v31 = vld [vmem:[%s10949_s14 + $0xb0] sm:$0xff] }
 0x3bf   : > { %v2853_v62 = vrot.slane %v2852_v56, 4 }
 0x3c1   : > { %v2854_v11 = vadd.f32 %v2853_v62, %v2852_v56  ;;  %v2945_v56 = vld [vmem:[%s10946_s11] sm:$0x1] }
 0x3c3   : > { %v2855_v5 = vrot.slane %v2854_v11, 2 }
 0x3c5   : > { %v2856_v3 = vadd.f32 %v2855_v5, %v2854_v11 }
 0x3c7   : > { %v2857_v41 = vrot.slane %v2856_v3, 1 }
 0x3c9   : > { %v2858_v10 = vadd.f32 %v2857_v41, %v2856_v3 }
 0x3cb   : > { %v2859_v52 = vmul.f32 0.015625, %v2858_v10 }
 0x3cd   : > { %6591 = vmatmul.mubr.msk.f32.vlgmr.msra.gmra.mrb[112].mxu1 %vm2837_vm6, %v2859_v52 }
 0x3ce   : > { %3334 = vmatprep.mubr.f32.mxu1 %v7677_v8  ;;  %6964 = vmatpush1.bf16.msra.mxu1 %v6963_v60  ;;  %v7041_v60 = vpack.c.bf16 %v4295_v39, %v4291_v32  ;;  %v4190_v32 = vld [vmem:[%s10951_s16 + $0xe0] sm:$0xff] }
 0x3cf   : > { %3274 = vmatprep.subr.mxu1 %v3196_v7  ;;  %v4170_v7 = vld [vmem:[%s10951_s16 + $0x40] sm:$0xff] }
 0x4a0   : > { %v2938_v24 = vpop.f32.mrb[112].mxu1 }
 0x4a1   : > { %v2939_v19 = vadd.f32 %v2938_v24, %v2868_v18  ;;  %v6592_v25 = vpop.f32.mrb[113].mxu1 }
 0x4a3   : > { %v2942_v46 = vmax.f32 %v2939_v19, 0.0  ;;  %v6967_v19 = vpack.c.bf16 %v3189_v15, %v3181_v61 }
 0x4a5   : > { %6598 = vmatmul.mubr.msk.f32.vlgmr.msra.gmra.mrb[96].mxu0 %vm1181_vm4, %v2942_v46 }
 0x4a6   : > { %6948 = vmatpush3.bf16.msra.mxu0 %v6945_v42  ;;  %v3193_v42 = vld [vmem:[%s10949_s14 + $0x70] sm:$0xff] }
 0x4a7   : > { %6950 = vmatprep.subr.bf16.mxu0 %v6949_v23  ;;  %v6975_v13 = vpack.c.bf16 %v3193_v42, %v3185_v0  ;;  %v4182_v0 = vld [vmem:[%s10951_s16 + $0xa0] sm:$0xff] }
 0x4aa   : > { %6952 = vmatpush3.bf16.msra.mxu0 %v6949_v23 }
 0x4ab   : > { %6954 = vmatprep.subr.bf16.mxu0 %v6953_v29 }
 0x4ae   : > { %6956 = vmatpush3.bf16.msra.mxu0 %v6953_v29  ;;  %v3200_v29 = vld [vmem:[%s10949_s14 + $0xa8] sm:$0xff] }
 0x4af   : > { %6958 = vmatprep.subr.bf16.mxu0 %v6957_v36 }
 0x4b2   : > { %6960 = vmatpush3.bf16.msra.mxu0 %v6957_v36 }
 0x4b3   : > { %6966 = vmatprep.subr.bf16.mxu0 %v6965_v59  ;;  %v6977_v59 = vpack.c.bf16 %v4167_v30, %v4163_v6  ;;  %v4186_v30 = vld [vmem:[%s10951_s16 + $0xc0] sm:$0xff] }
 0x578   : > { %v3015_v62 = vpop.f32.mrb[96].mxu0 }
 0x579   : > { %v3016_v11 = vadd.f32 %v3015_v62, %v2945_v56  ;;  %v6599_v5 = vpop.f32.mrb[97].mxu0 }
 0x57b   : > { %v3019_v3 = vadd.f32 3.0, %v3016_v11 }
 0x57d   : > { %v3020_v41 = vmax.f32 %v3019_v3, 0.0 }
 0x57f   : > { %v3021_v10 = vmin.f32 %v3020_v41, 6.0 }
 0x581   : > { %v3022_v52 = vmul.f32 0.16666667, %v3021_v10 }
 0x583   : > { %v3026_v21 = vrot.slane %v3022_v52, %v8639_v49 }
 0x585   : > { %v3027_v18 = vmul.f32 %v3026_v21, %v2829_v12  ;;  %v3028_v24 = vmul.f32 %v3026_v21, %v2830_v58  ;;  %v3029_v25 = vmul.f32 %v3026_v21, %v2831_v16  ;;  %v3030_v46 = vmul.f32 %v3026_v21, %v2832_v38  ;;  %v3198_v12 = vld [vmem:[%s10949_s14 + $0x98] sm:$0xff]  ;;  %v3195_v16 = vld [vmem:[%s10949_s14 + $0x80] sm:$0xff]  ;;  %v3184_v38 = vld [vmem:[%s10949_s14 + $0x28] sm:$0xff] }
 0x586   : > { %v3031_v14 = vmul.f32 %v3026_v21, %v2833_v33  ;;  %v3032_v17 = vmul.f32 %v3026_v21, %v2834_v26  ;;  %v3033_v55 = vmul.f32 %v3026_v21, %v2835_v37  ;;  %v3034_v58 = vmul.f32 %v3026_v21, %v2836_v54  ;;  %3275 = vmatpush1.msra.mxu1 %v3195_v16  ;;  %v3192_v33 = vld [vmem:[%s10949_s14 + $0x68] sm:$0xff]  ;;  %v3183_v54 = vld [vmem:[%s10949_s14 + $0x20] sm:$0xff] }
 0x587   : > { %6616 = vmatprep.mubr.msk.f32.mxu0 %vm2837_vm6, %v3027_v18  ;;  %v6969_v26 = vpack.c.bf16 %v3192_v33, %v3184_v38  ;;  %v6973_v37 = vpack.c.bf16 %v3194_v9, %v3186_v22  ;;  %v6971_v28 = vpack.c.bf16 %v3191_v57, %v3183_v54  ;;  %v4162_v21 = vld [vmem:[%s10951_s16] sm:$0xff]  ;;  %v4179_v9 = vld [vmem:[%s10951_s16 + $0x88] sm:$0xff] }
 0x588   : > { %6617 = vmatmul.mubr.msk.f32.vlgmr.msra.gmra.mrb[98].mxu0 %vm2837_vm6, %v3028_v24  ;;  %v4166_v18 = vld [vmem:[%s10951_s16 + $0x20] sm:$0xff] }
 0x589   : > { %6619 = vmatprep.mubr.msk.f32.mxu0 %vm2837_vm6, %v3029_v25  ;;  %6968 = vmatpush1.bf16.msra.mxu0 %v6967_v19  ;;  %v4290_v24 = vld [vmem:[%s10951_s16 + $0x400] sm:$0xff]  ;;  %v4171_v25 = vld [vmem:[%s10951_s16 + $0x48] sm:$0xff] }
 0x58a   : > { %3387 = vmatprep.subr.mxu0 %v3198_v12  ;;  %6970 = vmatprep.subr.bf16.mxu1 %v6969_v26  ;;  %v4294_v19 = vld [vmem:[%s10951_s16 + $0x420] sm:$0xff] }
 0x58b   : > { %v4298_v38 = vld [vmem:[%s10951_s16 + $0x440] sm:$0xff] }
 0x58c   : > { %6620 = vmatmul.mubr.msk.f32.gmra.mrb[100].mxu0 %vm2837_vm6, %v3030_v46  ;;  %v4175_v46 = vld [vmem:[%s10951_s16 + $0x68] sm:$0xff]  ;;  %v4302_v33 = vld [vmem:[%s10951_s16 + $0x460] sm:$0xff] }
 0x58d   : > { %6622 = vmatprep.mubr.msk.f32.mxu0 %vm2837_vm6, %v3031_v14  ;;  %3388 = vmatpush1.msra.mxu0 %v3197_v40  ;;  %v4299_v14 = vld [vmem:[%s10951_s16 + $0x448] sm:$0xff]  ;;  %v6981_v12 = vpack.c.bf16 %v4175_v46, %v4171_v25  ;;  %v4174_v40 = vld [vmem:[%s10951_s16 + $0x60] sm:$0xff]  ;;  %v7047_v26 = vpack.c.bf16 %v4302_v33, %v4298_v38 }
 0x58e   : > { %6974 = vmatprep.subr.bf16.mxu0 %v6973_v37  ;;  %v6983_v22 = vpack.c.bf16 %v4174_v40, %v4170_v7  ;;  %v4183_v37 = vld [vmem:[%s10951_s16 + $0xa8] sm:$0xff]  ;;  %v4178_v57 = vld [vmem:[%s10951_s16 + $0x80] sm:$0xff] }
 0x58f   : > { %v6985_v54 = vpack.c.bf16 %v4183_v37, %v4179_v9  ;;  %v4335_v25 = vld [vmem:[%s10951_s16 + $0x568] sm:$0xff]  ;;  %v4202_v46 = vld [vmem:[%s10951_s16 + $0x140] sm:$0xff] }
 0x590   : > { %6623 = vmatmul.mubr.msk.f32.gmra.mrb[102].mxu0 %vm2837_vm6, %v3032_v17  ;;  %v4303_v17 = vld [vmem:[%s10951_s16 + $0x468] sm:$0xff]  ;;  %v4334_v7 = vld [vmem:[%s10951_s16 + $0x560] sm:$0xff] }
 0x591   : > { %6625 = vmatprep.mubr.msk.f32.mxu0 %vm2837_vm6, %v3033_v55  ;;  %v6979_v55 = vpack.c.bf16 %v4166_v18, %v4162_v21  ;;  %v7045_v16 = vpack.c.bf16 %v4303_v17, %v4299_v14  ;;  %v4203_v21 = vld [vmem:[%s10951_s16 + $0x148] sm:$0xff]  ;;  %v4206_v14 = vld [vmem:[%s10951_s16 + $0x160] sm:$0xff] }
 0x592   : > { %v4207_v18 = vld [vmem:[%s10951_s16 + $0x168] sm:$0xff]  ;;  %v4214_v9 = vld [vmem:[%s10951_s16 + $0x1a0] sm:$0xff] }
 0x593   : > { %v4215_v40 = vld [vmem:[%s10951_s16 + $0x1a8] sm:$0xff] }
 0x594   : > { %6626 = vmatmul.mubr.msk.f32.gmra.mrb[104].mxu0 %vm2837_vm6, %v3034_v58  ;;  %v7043_v58 = vpack.c.bf16 %v4294_v19, %v4290_v24  ;;  %v4331_v24 = vld [vmem:[%s10951_s16 + $0x548] sm:$0xff]  ;;  %v6997_v19 = vpack.c.bf16 %v4207_v18, %v4203_v21  ;;  %v4238_v21 = vld [vmem:[%s10951_s16 + $0x260] sm:$0xff] }
 0x595   : > { %3447 = vmatprep.mubr.f32.mxu0 %v7677_v8  ;;  %v7061_v17 = vpack.c.bf16 %v4335_v25, %v4331_v24  ;;  %v4339_v38 = vld [vmem:[%s10951_s16 + $0x588] sm:$0xff]  ;;  %v4366_v25 = vld [vmem:[%s10951_s16 + $0x660] sm:$0xff] }
 0x65b   : > { %v6618_v2 = vpop.f32.mrb[98].mxu0 }
 0x65c   : > { %v3140_v53 = vpop.f32.mrb[99].mxu0  ;;  %v9075_v43 = vadd.f32 %v6618_v2, %v9033_v44  ;;  %v6987_v2 = vpack.c.bf16 %v4182_v0, %v4178_v57  ;;  %v4219_v0 = vld [vmem:[%s10951_s16 + $0x1c8] sm:$0xff] }
 0x65d   : > { %v9048_v23 = vadd.f32 %v9033_v44, %v3140_v53  ;;  %v4306_v53 = vld [vmem:[%s10951_s16 + $0x480] sm:$0xff] }
 0x65f   : > { %v6621_v36 = vpop.f32.mrb[100].mxu0  ;;  %5827 = vmatmul.mubr.msk.f32.vlgmr.msra.gmra.mrb[114].mxu1 %vm3245_vm7, %v9048_v23  ;;  %5835 = vmatmul.mubr.msk.f32.vlgmr.msra.gmra.mrb[106].mxu0 %vm3245_vm7, %v9048_v23 }
 0x660   : > { %v3150_v63 = vpop.f32.mrb[101].mxu0  ;;  %3340 = vmatprep.mubr.f32.mxu1 %v7677_v8  ;;  %3453 = vmatprep.mubr.f32.mxu0 %v7677_v8  ;;  %v3156_v41 = vadd.f32 %v6621_v36, %v9033_v44  ;;  %v4319_v36 = vld [vmem:[%s10951_s16 + $0x4e8] sm:$0xff] }
 0x661   : > { %6972 = vmatpush1.bf16.msra.mxu1 %v6971_v28  ;;  %6976 = vmatpush1.bf16.msra.mxu0 %v6975_v13  ;;  %v9090_v11 = vadd.f32 %v9033_v44, %v3150_v63  ;;  %v4187_v13 = vld [vmem:[%s10951_s16 + $0xc8] sm:$0xff]  ;;  %v6991_v63 = vpack.c.bf16 %v4190_v32, %v4186_v30 }
 0x662   : > { %3500 = vmatprep.subr.mxu1 %v3200_v29  ;;  %3613 = vmatprep.subr.mxu0 %v3202_v35  ;;  %v4191_v29 = vld [vmem:[%s10951_s16 + $0xe8] sm:$0xff] }
 0x663   : > { %v6624_v56 = vpop.f32.mrb[102].mxu0  ;;  %5828 = vmatmul.mubr.msk.f32.gmra.mrb[116].mxu1 %vm3245_vm7, %v9075_v43  ;;  %5836 = vmatmul.mubr.msk.f32.gmra.mrb[108].mxu0 %vm3245_vm7, %v9075_v43  ;;  %v4315_v35 = vld [vmem:[%s10951_s16 + $0x4c8] sm:$0xff]  ;;  %v6989_v6 = vpack.c.bf16 %v4191_v29, %v4187_v13  ;;  %v4222_v13 = vld [vmem:[%s10951_s16 + $0x1e0] sm:$0xff] }
 0x664   : > { %v3160_v62 = vpop.f32.mrb[103].mxu0  ;;  %3346 = vmatprep.mubr.f32.mxu1 %v7677_v8  ;;  %3459 = vmatprep.mubr.f32.mxu0 %v7677_v8  ;;  %v3166_v52 = vadd.f32 %v6624_v56, %v9033_v44  ;;  %v7053_v39 = vpack.c.bf16 %v4319_v36, %v4315_v35  ;;  %v4323_v56 = vld [vmem:[%s10951_s16 + $0x508] sm:$0xff]  ;;  %v4350_v36 = vld [vmem:[%s10951_s16 + $0x5e0] sm:$0xff] }
 0x665   : > { %3501 = vmatpush1.msra.mxu1 %v3199_v20  ;;  %3614 = vmatpush1.msra.mxu0 %v3201_v31  ;;  %v3161_v10 = vadd.f32 %v9033_v44, %v3160_v62  ;;  %v4318_v20 = vld [vmem:[%s10951_s16 + $0x4e0] sm:$0xff]  ;;  %v4227_v32 = vld [vmem:[%s10951_s16 + $0x208] sm:$0xff] }
 0x666   : > { %6978 = vmatprep.subr.bf16.mxu0 %v6977_v59  ;;  %7042 = vmatprep.subr.bf16.mxu1 %v7041_v60  ;;  %v4195_v59 = vld [vmem:[%s10951_s16 + $0x108] sm:$0xff] }
 0x667   : > { %v6627_v5 = vpop.f32.mrb[104].mxu0  ;;  %5829 = vmatmul.mubr.msk.f32.gmra.mrb[118].mxu1 %vm3245_vm7, %v9090_v11  ;;  %5837 = vmatmul.mubr.msk.f32.gmra.mrb[110].mxu0 %vm3245_vm7, %v9090_v11  ;;  %v4199_v60 = vld [vmem:[%s10951_s16 + $0x128] sm:$0xff] }
 0x668   : > { %v3170_v3 = vpop.f32.mrb[105].mxu0  ;;  %3352 = vmatprep.mubr.f32.mxu1 %v7677_v8  ;;  %3465 = vmatprep.mubr.f32.mxu0 %v7677_v8  ;;  %v3176_v15 = vadd.f32 %v6627_v5, %v9033_v44  ;;  %v6993_v62 = vpack.c.bf16 %v4199_v60, %v4195_v59  ;;  %v4194_v5 = vld [vmem:[%s10951_s16 + $0x100] sm:$0xff] }
 0x669   : > { %v3171_v61 = vadd.f32 %v9033_v44, %v3170_v3  ;;  %v4307_v44 = vld [vmem:[%s10951_s16 + $0x488] sm:$0xff]  ;;  %v4198_v3 = vld [vmem:[%s10951_s16 + $0x120] sm:$0xff] }
 0x66a   : > { %v4230_v59 = vld [vmem:[%s10951_s16 + $0x220] sm:$0xff] }
 0x66b   : > { %5830 = vmatmul.mubr.msk.f32.gmra.mrb[120].mxu1 %vm3245_vm7, %v3156_v41  ;;  %5838 = vmatmul.mubr.msk.f32.gmra.mrb[112].mxu0 %vm3245_vm7, %v3156_v41 }
 0x66c   : > { %3358 = vmatprep.mubr.f32.mxu1 %v7677_v8  ;;  %3471 = vmatprep.mubr.f32.mxu0 %v7677_v8 }
 0x66f   : > { %5831 = vmatmul.mubr.msk.f32.gmra.mrb[122].mxu1 %vm3245_vm7, %v3161_v10  ;;  %5839 = vmatmul.mubr.msk.f32.gmra.mrb[114].mxu0 %vm3245_vm7, %v3161_v10 }
 0x670   : > { %3364 = vmatprep.mubr.f32.mxu1 %v7677_v8  ;;  %3477 = vmatprep.mubr.f32.mxu0 %v7677_v8 }
 0x673   : > { %5832 = vmatmul.mubr.msk.f32.gmra.mrb[124].mxu1 %vm3245_vm7, %v3166_v52  ;;  %5840 = vmatmul.mubr.msk.f32.gmra.mrb[116].mxu0 %vm3245_vm7, %v3166_v52 }
 0x674   : > { %3370 = vmatprep.mubr.f32.mxu1 %v7677_v8  ;;  %3483 = vmatprep.mubr.f32.mxu0 %v7677_v8 }
 0x677   : > { %5833 = vmatmul.mubr.msk.f32.gmra.mrb[126].mxu1 %vm3245_vm7, %v3171_v61  ;;  %5841 = vmatmul.mubr.msk.f32.gmra.mrb[118].mxu0 %vm3245_vm7, %v3171_v61 }
 0x678   : > { %3376 = vmatprep.mubr.f32.mxu1 %v7677_v8  ;;  %3489 = vmatprep.mubr.f32.mxu0 %v7677_v8 }
 0x67b   : > { %5834 = vmatmul.mubr.msk.f32.gmra.mrb[128].mxu1 %vm3245_vm7, %v3176_v15  ;;  %5842 = vmatmul.mubr.msk.f32.gmra.mrb[120].mxu0 %vm3245_vm7, %v3176_v15 }
 0x67c   : > { %3560 = vmatprep.mubr.f32.mxu1 %v7677_v8  ;;  %3673 = vmatprep.mubr.f32.mxu0 %v7677_v8 }
 0x67f   : > { %5843 = vmatmul.mubr.msk.f32.vlgmr.msra.gmra.mrb[130].mxu1 %vm3245_vm7, %v9048_v23  ;;  %5851 = vmatmul.mubr.msk.f32.vlgmr.msra.gmra.mrb[122].mxu0 %vm3245_vm7, %v9048_v23  ;;  %v4310_v23 = vld [vmem:[%s10951_s16 + $0x4a0] sm:$0xff] }
 0x680   : > { %3566 = vmatprep.mubr.f32.mxu1 %v7677_v8  ;;  %3679 = vmatprep.mubr.f32.mxu0 %v7677_v8  ;;  %v7051_v28 = vpack.c.bf16 %v4310_v23, %v4306_v53  ;;  %v4351_v23 = vld [vmem:[%s10951_s16 + $0x5e8] sm:$0xff] }
 0x681   : > { %6980 = vmatpush1.bf16.msra.mxu0 %v6979_v55  ;;  %7044 = vmatpush1.bf16.msra.mxu1 %v7043_v58  ;;  %v6999_v55 = vpack.c.bf16 %v4206_v14, %v4202_v46  ;;  %v4330_v58 = vld [vmem:[%s10951_s16 + $0x540] sm:$0xff]  ;;  %v4243_v14 = vld [vmem:[%s10951_s16 + $0x288] sm:$0xff] }
 0x682   : > { %6982 = vmatprep.subr.bf16.mxu0 %v6981_v12  ;;  %7046 = vmatprep.subr.bf16.mxu1 %v7045_v16  ;;  %v7063_v12 = vpack.c.bf16 %v4334_v7, %v4330_v58  ;;  %v4211_v16 = vld [vmem:[%s10951_s16 + $0x188] sm:$0xff] }
 0x683   : > { %5844 = vmatmul.mubr.msk.f32.gmra.mrb[132].mxu1 %vm3245_vm7, %v9075_v43  ;;  %5852 = vmatmul.mubr.msk.f32.gmra.mrb[124].mxu0 %vm3245_vm7, %v9075_v43  ;;  %v4314_v43 = vld [vmem:[%s10951_s16 + $0x4c0] sm:$0xff]  ;;  %v7001_v33 = vpack.c.bf16 %v4215_v40, %v4211_v16  ;;  %v4375_v7 = vld [vmem:[%s10951_s16 + $0x6a8] sm:$0xff] }
 0x684   : > { %3572 = vmatprep.mubr.f32.mxu1 %v7677_v8  ;;  %3685 = vmatprep.mubr.f32.mxu0 %v7677_v8  ;;  %v7055_v31 = vpack.c.bf16 %v4318_v20, %v4314_v43  ;;  %v4359_v20 = vld [vmem:[%s10951_s16 + $0x628] sm:$0xff]  ;;  %v4246_v16 = vld [vmem:[%s10951_s16 + $0x2a0] sm:$0xff] }
 0x685   : > { %6984 = vmatpush1.bf16.msra.mxu0 %v6983_v22  ;;  %7048 = vmatpush1.bf16.msra.mxu1 %v7047_v26  ;;  %v4343_v22 = vld [vmem:[%s10951_s16 + $0x5a8] sm:$0xff]  ;;  %v4210_v26 = vld [vmem:[%s10951_s16 + $0x180] sm:$0xff] }
 0x686   : > { %6986 = vmatprep.subr.bf16.mxu0 %v6985_v54  ;;  %v7065_v37 = vpack.c.bf16 %v4343_v22, %v4339_v38  ;;  %v4338_v54 = vld [vmem:[%s10951_s16 + $0x580] sm:$0xff] }
 0x687   : > { %5845 = vmatmul.mubr.msk.f32.gmra.mrb[134].mxu1 %vm3245_vm7, %v9090_v11  ;;  %5853 = vmatmul.mubr.msk.f32.gmra.mrb[126].mxu0 %vm3245_vm7, %v9090_v11  ;;  %v4327_v11 = vld [vmem:[%s10951_s16 + $0x528] sm:$0xff]  ;;  %v4374_v22 = vld [vmem:[%s10951_s16 + $0x6a0] sm:$0xff] }
 0x688   : > { %3578 = vmatprep.mubr.f32.mxu1 %v7677_v8  ;;  %3691 = vmatprep.mubr.f32.mxu0 %v7677_v8 }
 0x689   : > { %6988 = vmatpush1.bf16.msra.mxu0 %v6987_v2  ;;  %v4347_v2 = vld [vmem:[%s10951_s16 + $0x5c8] sm:$0xff] }
 0x68a   : > { %6990 = vmatprep.subr.bf16.mxu0 %v6989_v6  ;;  %v7069_v29 = vpack.c.bf16 %v4351_v23, %v4347_v2  ;;  %v4346_v6 = vld [vmem:[%s10951_s16 + $0x5c0] sm:$0xff] }
 0x68b   : > { %5846 = vmatmul.mubr.msk.f32.gmra.mrb[136].mxu1 %vm3245_vm7, %v3156_v41  ;;  %5854 = vmatmul.mubr.msk.f32.gmra.mrb[128].mxu0 %vm3245_vm7, %v3156_v41  ;;  %v7057_v41 = vpack.c.bf16 %v4327_v11, %v4323_v56  ;;  %v7071_v30 = vpack.c.bf16 %v4350_v36, %v4346_v6  ;;  %v4358_v11 = vld [vmem:[%s10951_s16 + $0x620] sm:$0xff]  ;;  %v4391_v36 = vld [vmem:[%s10951_s16 + $0x728] sm:$0xff] }
 0x68c   : > { %3584 = vmatprep.mubr.f32.mxu1 %v7677_v8  ;;  %3697 = vmatprep.mubr.f32.mxu0 %v7677_v8  ;;  %v4382_v23 = vld [vmem:[%s10951_s16 + $0x6e0] sm:$0xff] }
 0x68d   : > { %6992 = vmatpush1.bf16.msra.mxu0 %v6991_v63  ;;  %v4355_v63 = vld [vmem:[%s10951_s16 + $0x608] sm:$0xff] }
 0x68e   : > { %6994 = vmatprep.subr.bf16.mxu0 %v6993_v62  ;;  %v7073_v60 = vpack.c.bf16 %v4359_v20, %v4355_v63  ;;  %v4354_v62 = vld [vmem:[%s10951_s16 + $0x600] sm:$0xff] }
 0x68f   : > { %5847 = vmatmul.mubr.msk.f32.gmra.mrb[138].mxu1 %vm3245_vm7, %v3161_v10  ;;  %5855 = vmatmul.mubr.msk.f32.gmra.mrb[130].mxu0 %vm3245_vm7, %v3161_v10  ;;  %v6995_v10 = vpack.c.bf16 %v4198_v3, %v4194_v5  ;;  %v7075_v5 = vpack.c.bf16 %v4358_v11, %v4354_v62  ;;  %v4235_v3 = vld [vmem:[%s10951_s16 + $0x248] sm:$0xff]  ;;  %v4390_v20 = vld [vmem:[%s10951_s16 + $0x720] sm:$0xff] }
 0x690   : > { %3590 = vmatprep.mubr.f32.mxu1 %v7677_v8  ;;  %3703 = vmatprep.mubr.f32.mxu0 %v7677_v8  ;;  %v4399_v11 = vld [vmem:[%s10951_s16 + $0x768] sm:$0xff] }
 0x691   : > { %6996 = vmatpush1.bf16.msra.mxu0 %v6995_v10  ;;  %v4363_v10 = vld [vmem:[%s10951_s16 + $0x648] sm:$0xff] }
 0x692   : > { %6998 = vmatprep.subr.bf16.mxu0 %v6997_v19  ;;  %v4362_v19 = vld [vmem:[%s10951_s16 + $0x640] sm:$0xff] }
 0x693   : > { %5848 = vmatmul.mubr.msk.f32.gmra.mrb[140].mxu1 %vm3245_vm7, %v3166_v52  ;;  %5856 = vmatmul.mubr.msk.f32.gmra.mrb[132].mxu0 %vm3245_vm7, %v3166_v52  ;;  %v4322_v52 = vld [vmem:[%s10951_s16 + $0x500] sm:$0xff]  ;;  %v7079_v46 = vpack.c.bf16 %v4366_v25, %v4362_v19  ;;  %v4407_v25 = vld [vmem:[%s10951_s16 + $0x7a8] sm:$0xff] }
 0x694   : > { %3596 = vmatprep.mubr.f32.mxu1 %v7677_v8  ;;  %3709 = vmatprep.mubr.f32.mxu0 %v7677_v8 }
 0x695   : > { %7000 = vmatpush1.bf16.msra.mxu0 %v6999_v55  ;;  %v4371_v55 = vld [vmem:[%s10951_s16 + $0x688] sm:$0xff] }
 0x696   : > { %7002 = vmatprep.subr.bf16.mxu0 %v7001_v33  ;;  %v7081_v40 = vpack.c.bf16 %v4375_v7, %v4371_v55  ;;  %v4370_v33 = vld [vmem:[%s10951_s16 + $0x680] sm:$0xff] }
 0x697   : > { %5849 = vmatmul.mubr.msk.f32.gmra.mrb[142].mxu1 %vm3245_vm7, %v3171_v61  ;;  %5857 = vmatmul.mubr.msk.f32.gmra.mrb[134].mxu0 %vm3245_vm7, %v3171_v61  ;;  %v4326_v61 = vld [vmem:[%s10951_s16 + $0x520] sm:$0xff] }
 0x698   : > { %3602 = vmatprep.mubr.f32.mxu1 %v7677_v8  ;;  %3715 = vmatprep.mubr.f32.mxu0 %v7677_v8  ;;  %v4311_v8 = vld [vmem:[%s10951_s16 + $0x4a8] sm:$0xff]  ;;  %v4406_v7 = vld [vmem:[%s10951_s16 + $0x7a0] sm:$0xff] }
 0x699   : > { %v7049_v42 = vpack.c.bf16 %v4311_v8, %v4307_v44  ;;  %v7003_v44 = vpack.c.bf16 %v4214_v9, %v4210_v26  ;;  %v4342_v8 = vld [vmem:[%s10951_s16 + $0x5a0] sm:$0xff]  ;;  %v7083_v26 = vpack.c.bf16 %v4374_v22, %v4370_v33  ;;  %v4251_v9 = vld [vmem:[%s10951_s16 + $0x2c8] sm:$0xff] }
 0x69a   : > { %v7067_v57 = vpack.c.bf16 %v4342_v8, %v4338_v54  ;;  %v4383_v8 = vld [vmem:[%s10951_s16 + $0x6e8] sm:$0xff] }
 0x69b   : > { %5850 = vmatmul.mubr.msk.f32.gmra.mrb[144].mxu1 %vm3245_vm7, %v3176_v15  ;;  %5858 = vmatmul.mubr.msk.f32.gmra.mrb[136].mxu0 %vm3245_vm7, %v3176_v15  ;;  %v7059_v15 = vpack.c.bf16 %v4326_v61, %v4322_v52  ;;  %v4367_v61 = vld [vmem:[%s10951_s16 + $0x668] sm:$0xff] }
 0x69c   : > { %7050 = vmatprep.subr.bf16.mxu1 %v7049_v42  ;;  %7004 = vmatpush1.bf16.msra.mxu0 %v7003_v44  ;;  %v4223_v42 = vld [vmem:[%s10951_s16 + $0x1e8] sm:$0xff]  ;;  %v7077_v18 = vpack.c.bf16 %v4367_v61, %v4363_v10  ;;  %v4398_v61 = vld [vmem:[%s10951_s16 + $0x760] sm:$0xff] }
 0x69d   : > { %7052 = vmatpush1.bf16.msra.mxu1 %v7051_v28  ;;  %v7005_v53 = vpack.c.bf16 %v4223_v42, %v4219_v0  ;;  %v4218_v28 = vld [vmem:[%s10951_s16 + $0x1c0] sm:$0xff]  ;;  %v4379_v44 = vld [vmem:[%s10951_s16 + $0x6c8] sm:$0xff] }
 0x69e   : > { %7054 = vmatprep.subr.bf16.mxu1 %v7053_v39  ;;  %v7007_v35 = vpack.c.bf16 %v4222_v13, %v4218_v28  ;;  %v4231_v39 = vld [vmem:[%s10951_s16 + $0x228] sm:$0xff]  ;;  %v4254_v0 = vld [vmem:[%s10951_s16 + $0x2e0] sm:$0xff]  ;;  %v7085_v42 = vpack.c.bf16 %v4383_v8, %v4379_v44 }
 0x69f   : > { %7006 = vmatprep.subr.bf16.mxu0 %v7005_v53  ;;  %v7009_v43 = vpack.c.bf16 %v4231_v39, %v4227_v32  ;;  %v4378_v53 = vld [vmem:[%s10951_s16 + $0x6c0] sm:$0xff]  ;;  %v4259_v13 = vld [vmem:[%s10951_s16 + $0x308] sm:$0xff] }
 0x6a0   : > { %7008 = vmatpush1.bf16.msra.mxu0 %v7007_v35  ;;  %v7087_v28 = vpack.c.bf16 %v4382_v23, %v4378_v53  ;;  %v4387_v35 = vld [vmem:[%s10951_s16 + $0x708] sm:$0xff]  ;;  %v4262_v32 = vld [vmem:[%s10951_s16 + $0x320] sm:$0xff]  ;;  %v4169_v23 = vld [vmem:[%s10951_s16 + $0x38] sm:$0xff] }
 0x6a1   : > { %7056 = vmatpush1.bf16.msra.mxu1 %v7055_v31  ;;  %v4226_v31 = vld [vmem:[%s10951_s16 + $0x200] sm:$0xff]  ;;  %7010 = vmatprep.subr.bf16.mxu0 %v7009_v43  ;;  %v7089_v39 = vpack.c.bf16 %v4391_v36, %v4387_v35  ;;  %v4415_v22 = vld [vmem:[%s10951_s16 + $0x7e8] sm:$0xff] }
 0x6a2   : > { %7058 = vmatprep.subr.bf16.mxu1 %v7057_v41  ;;  %v7011_v56 = vpack.c.bf16 %v4230_v59, %v4226_v31  ;;  %v4239_v41 = vld [vmem:[%s10951_s16 + $0x268] sm:$0xff]  ;;  %v4386_v43 = vld [vmem:[%s10951_s16 + $0x700] sm:$0xff] }
 0x6a3   : > { %v7013_v52 = vpack.c.bf16 %v4239_v41, %v4235_v3  ;;  %v7091_v31 = vpack.c.bf16 %v4390_v20, %v4386_v43  ;;  %v4267_v59 = vld [vmem:[%s10951_s16 + $0x348] sm:$0xff]  ;;  %v4270_v3 = vld [vmem:[%s10951_s16 + $0x360] sm:$0xff] }
 0x6a4   : > { %7012 = vmatpush1.bf16.msra.mxu0 %v7011_v56  ;;  %v4395_v56 = vld [vmem:[%s10951_s16 + $0x748] sm:$0xff]  ;;  %v4414_v8 = vld [vmem:[%s10951_s16 + $0x7e0] sm:$0xff] }
 0x6a5   : > { %7060 = vmatpush1.bf16.msra.mxu1 %v7059_v15  ;;  %v4234_v15 = vld [vmem:[%s10951_s16 + $0x240] sm:$0xff]  ;;  %7014 = vmatprep.subr.bf16.mxu0 %v7013_v52  ;;  %v7093_v41 = vpack.c.bf16 %v4399_v11, %v4395_v56  ;;  %v9578_v56 = vld [vmem:[%s10951_s16 + $0x30] sm:$0xff] }
 0x6a6   : > { %7062 = vmatprep.subr.bf16.mxu1 %v7061_v17  ;;  %v7015_v24 = vpack.c.bf16 %v4238_v21, %v4234_v15  ;;  %v4247_v17 = vld [vmem:[%s10951_s16 + $0x2a8] sm:$0xff]  ;;  %v4394_v52 = vld [vmem:[%s10951_s16 + $0x740] sm:$0xff]  ;;  %10997 = vst [vmem:[#allocation13_spill] sm:$0xff] %v9578_v56 }
 0x6a7   : > { %v7017_v58 = vpack.c.bf16 %v4247_v17, %v4243_v14  ;;  %v7095_v15 = vpack.c.bf16 %v4398_v61, %v4394_v52  ;;  %v4275_v21 = vld [vmem:[%s10951_s16 + $0x388] sm:$0xff]  ;;  %v4278_v14 = vld [vmem:[%s10951_s16 + $0x3a0] sm:$0xff] }
 0x6a8   : > { %7016 = vmatpush1.bf16.msra.mxu0 %v7015_v24  ;;  %v4403_v24 = vld [vmem:[%s10951_s16 + $0x788] sm:$0xff] }
 0x6a9   : > { %7064 = vmatpush1.bf16.msra.mxu1 %v7063_v12  ;;  %v4242_v12 = vld [vmem:[%s10951_s16 + $0x280] sm:$0xff]  ;;  %7018 = vmatprep.subr.bf16.mxu0 %v7017_v58  ;;  %v7097_v17 = vpack.c.bf16 %v4407_v25, %v4403_v24 }
 0x6aa   : > { %7066 = vmatprep.subr.bf16.mxu1 %v7065_v37  ;;  %v7019_v38 = vpack.c.bf16 %v4246_v16, %v4242_v12  ;;  %v4255_v37 = vld [vmem:[%s10951_s16 + $0x2e8] sm:$0xff]  ;;  %v4402_v58 = vld [vmem:[%s10951_s16 + $0x780] sm:$0xff] }
 0x6ab   : > { %v7021_v54 = vpack.c.bf16 %v4255_v37, %v4251_v9  ;;  %v7099_v12 = vpack.c.bf16 %v4406_v7, %v4402_v58  ;;  %v4283_v16 = vld [vmem:[%s10951_s16 + $0x3c8] sm:$0xff]  ;;  %v4286_v9 = vld [vmem:[%s10951_s16 + $0x3e0] sm:$0xff] }
 0x6ac   : > { %7020 = vmatpush1.bf16.msra.mxu0 %v7019_v38  ;;  %v4411_v38 = vld [vmem:[%s10951_s16 + $0x7c8] sm:$0xff] }
 0x6ad   : > { %7068 = vmatpush1.bf16.msra.mxu1 %v7067_v57  ;;  %v4250_v57 = vld [vmem:[%s10951_s16 + $0x2c0] sm:$0xff]  ;;  %7022 = vmatprep.subr.bf16.mxu0 %v7021_v54  ;;  %v7101_v37 = vpack.c.bf16 %v4415_v22, %v4411_v38 }
 0x6ae   : > { %7070 = vmatprep.subr.bf16.mxu1 %v7069_v29  ;;  %v7023_v2 = vpack.c.bf16 %v4254_v0, %v4250_v57  ;;  %v4263_v29 = vld [vmem:[%s10951_s16 + $0x328] sm:$0xff]  ;;  %v4410_v54 = vld [vmem:[%s10951_s16 + $0x7c0] sm:$0xff] }
 0x6af   : > { %v7025_v6 = vpack.c.bf16 %v4263_v29, %v4259_v13  ;;  %v7103_v57 = vpack.c.bf16 %v4414_v8, %v4410_v54  ;;  %v4419_v0 = vld [vmem:[%s10951_s16 + $0x808] sm:$0xff]  ;;  %v3203_v13 = vld [vmem:[%s10950_s15] sm:$0xff] }
 0x6b0   : > { %7024 = vmatpush1.bf16.msra.mxu0 %v7023_v2  ;;  %v4165_v2 = vld [vmem:[%s10951_s16 + $0x18] sm:$0xff]  ;;  %v9547_v29 = vrot.slane %v3203_v13, %v8639_v49  ;;  %v9550_v35 = vrot.slane %v3203_v13, %v8684_v1  ;;  %v9556_v36 = vrot.slane %v3203_v13, %v8687_v4  ;;  %v9592_v52 = vrot.slane %v3203_v13, %v2370_v45 }
 0x6b1   : > { %7072 = vmatpush1.bf16.msra.mxu1 %v7071_v30  ;;  %v4258_v30 = vld [vmem:[%s10951_s16 + $0x300] sm:$0xff]  ;;  %7026 = vmatprep.subr.bf16.mxu0 %v7025_v6  ;;  %v9553_v6 = vrot.slane %v3203_v13, %v8642_v51  ;;  %v9596_v61 = vrot.slane %v3203_v13, %v2654_v27 }
 0x6b2   : > { %7074 = vmatprep.subr.bf16.mxu1 %v7073_v60  ;;  %v7027_v63 = vpack.c.bf16 %v4262_v32, %v4258_v30  ;;  %v4271_v60 = vld [vmem:[%s10951_s16 + $0x368] sm:$0xff] }
 0x6b3   : > { %v7029_v62 = vpack.c.bf16 %v4271_v60, %v4267_v59  ;;  %v9568_v59 = vld [vmem:[%s10951_s16 + $0x820] sm:$0xff]  ;;  %v9573_v60 = vld [vmem:[%s10951_s16 + $0x10] sm:$0xff] }
 0x6b4   : > { %7028 = vmatpush1.bf16.msra.mxu0 %v7027_v63  ;;  %10995 = vst [vmem:[#allocation11_spill] sm:$0xff] %v9568_v59  ;;  %10996 = vst [vmem:[#allocation12_spill] sm:$0xff] %v9573_v60 }
 0x6b5   : > { %7076 = vmatpush1.bf16.msra.mxu1 %v7075_v5  ;;  %v4266_v5 = vld [vmem:[%s10951_s16 + $0x340] sm:$0xff]  ;;  %7030 = vmatprep.subr.bf16.mxu0 %v7029_v62 }
 0x6b6   : > { %7078 = vmatprep.subr.bf16.mxu1 %v7077_v18  ;;  %v7031_v10 = vpack.c.bf16 %v4270_v3, %v4266_v5  ;;  %v4279_v18 = vld [vmem:[%s10951_s16 + $0x3a8] sm:$0xff]  ;;  %v9584_v5 = vrot.slane %v3203_v13, %v2228_v34  ;;  %v9588_v3 = vrot.slane %v3203_v13, %v2512_v50 }
 0x6b7   : > { %v7033_v19 = vpack.c.bf16 %v4279_v18, %v4275_v21 }
 0x6b8   : > { %7032 = vmatpush1.bf16.msra.mxu0 %v7031_v10 }
 0x6b9   : > { %7080 = vmatpush1.bf16.msra.mxu1 %v7079_v46  ;;  %v4274_v46 = vld [vmem:[%s10951_s16 + $0x380] sm:$0xff]  ;;  %7034 = vmatprep.subr.bf16.mxu0 %v7033_v19 }
 0x6ba   : > { %7082 = vmatprep.subr.bf16.mxu1 %v7081_v40  ;;  %v7035_v55 = vpack.c.bf16 %v4278_v14, %v4274_v46  ;;  %v4287_v40 = vld [vmem:[%s10951_s16 + $0x3e8] sm:$0xff] }
 0x6bb   : > { %v7037_v33 = vpack.c.bf16 %v4287_v40, %v4283_v16 }
 0x6bc   : > { %7036 = vmatpush1.bf16.msra.mxu0 %v7035_v55 }
 0x6bd   : > { %7084 = vmatpush1.bf16.msra.mxu1 %v7083_v26  ;;  %v4282_v26 = vld [vmem:[%s10951_s16 + $0x3c0] sm:$0xff]  ;;  %7038 = vmatprep.subr.bf16.mxu0 %v7037_v33 }
 0x6be   : > { %7086 = vmatprep.subr.bf16.mxu1 %v7085_v42  ;;  %v7039_v44 = vpack.c.bf16 %v4286_v9, %v4282_v26  ;;  %v4423_v42 = vld [vmem:[%s10951_s16 + $0x828] sm:$0xff] }
 0x6bf   : > { %v7105_v53 = vpack.c.bf16 %v4423_v42, %v4419_v0 }
 0x6c0   : > { %7040 = vmatpush1.bf16.msra.mxu0 %v7039_v44 }
 0x6c1   : > { %7088 = vmatpush1.bf16.msra.mxu1 %v7087_v28  ;;  %v7217_v28 = vpack.c.bf16 %v4169_v23, %v4165_v2 }
 0x6c2   : > { %7090 = vmatprep.subr.bf16.mxu1 %v7089_v39  ;;  %v9561_v39 = vld [vmem:[%s10951_s16 + $0x800] sm:$0xff] }
 0x6c3   : > { %7218 = vmatprep.subr.bf16.mxu0 %v7217_v28  ;;  %10994 = vst [vmem:[#allocation10_spill] sm:$0xff] %v9561_v39 }
 0x6c5   : > { %7092 = vmatpush1.bf16.msra.mxu1 %v7091_v31 }
 0x6c6   : > { %7094 = vmatprep.subr.bf16.mxu1 %v7093_v41 }
 0x6c9   : > { %7096 = vmatpush1.bf16.msra.mxu1 %v7095_v15 }
 0x6ca   : > { %7098 = vmatprep.subr.bf16.mxu1 %v7097_v17 }
 0x6cd   : > { %7100 = vmatpush1.bf16.msra.mxu1 %v7099_v12 }
 0x6ce   : > { %7102 = vmatprep.subr.bf16.mxu1 %v7101_v37 }
 0x6d1   : > { %7104 = vmatpush1.bf16.msra.mxu1 %v7103_v57 }
 0x6d2   : > { %7106 = vmatprep.subr.bf16.mxu1 %v7105_v53 }
 0x732   : > { %v3336_v30 = vpop.f32.mrb[114].mxu1  ;;  %v3449_v32 = vpop.f32.mrb[106].mxu0 }
 0x733   : > { %v3337_v63 = vadd.f32 %v3336_v30, %v9547_v29  ;;  %v3450_v43 = vadd.f32 %v3449_v32, %v9550_v35  ;;  %v3338_v20 = vpop.f32.mrb[115].mxu1  ;;  %v3451_v31 = vpop.f32.mrb[107].mxu0 }
 0x734   : > { %v3339_v62 = vadd.f32 %v3338_v20, %v9553_v6  ;;  %v3452_v11 = vadd.f32 %v3451_v31, %v9556_v36 }
 0x735   : > { %v3722_v41 = vadd.f32 3.0, %v3337_v63  ;;  %v3724_v10 = vadd.f32 3.0, %v3450_v43 }
 0x736   : > { %v3723_v15 = vadd.f32 3.0, %v3339_v62  ;;  %v3725_v21 = vadd.f32 3.0, %v3452_v11  ;;  %v3342_v18 = vpop.f32.mrb[116].mxu1  ;;  %v3455_v24 = vpop.f32.mrb[108].mxu0 }
 0x737   : > { %v3786_v19 = vmax.f32 %v3722_v41, 0.0  ;;  %v3788_v25 = vmax.f32 %v3724_v10, 0.0  ;;  %v3343_v46 = vadd.f32 %v3342_v18, %v9547_v29  ;;  %v3456_v45 = vadd.f32 %v3455_v24, %v9550_v35  ;;  %v3344_v14 = vpop.f32.mrb[117].mxu1  ;;  %v3457_v17 = vpop.f32.mrb[109].mxu0 }
 0x738   : > { %v3787_v27 = vmax.f32 %v3723_v15, 0.0  ;;  %v3789_v55 = vmax.f32 %v3725_v21, 0.0  ;;  %v3345_v58 = vadd.f32 %v3344_v14, %v9553_v6  ;;  %v3458_v7 = vadd.f32 %v3457_v17, %v9556_v36 }
 0x739   : > { %v3850_v12 = vmin.f32 %v3786_v19, 6.0  ;;  %v3852_v16 = vmin.f32 %v3788_v25, 6.0  ;;  %v3730_v40 = vadd.f32 3.0, %v3343_v46  ;;  %v3732_v38 = vadd.f32 3.0, %v3456_v45 }
 0x73a   : > { %v3851_v33 = vmin.f32 %v3787_v27, 6.0  ;;  %v3853_v22 = vmin.f32 %v3789_v55, 6.0  ;;  %v3731_v26 = vadd.f32 3.0, %v3345_v58  ;;  %v3733_v9 = vadd.f32 3.0, %v3458_v7  ;;  %v3348_v37 = vpop.f32.mrb[118].mxu1  ;;  %v3461_v44 = vpop.f32.mrb[110].mxu0 }
 0x73b   : > { %v3914_v54 = vmul.f32 %v3850_v12, %v3337_v63  ;;  %v3916_v8 = vmul.f32 %v3852_v16, %v3450_v43  ;;  %v3794_v57 = vmax.f32 %v3730_v40, 0.0  ;;  %v3796_v0 = vmax.f32 %v3732_v38, 0.0  ;;  %v3350_v42 = vpop.f32.mrb[119].mxu1  ;;  %v3463_v2 = vpop.f32.mrb[111].mxu0 }
 0x73c   : > { %v3915_v53 = vmul.f32 %v3851_v33, %v3339_v62  ;;  %v3917_v23 = vmul.f32 %v3853_v22, %v3452_v11  ;;  %v3795_v28 = vmax.f32 %v3731_v26, 0.0  ;;  %v3797_v13 = vmax.f32 %v3733_v9, 0.0 }
 0x73d   : > { %v3978_v30 = vmul.f32 0.16666667, %v3914_v54  ;;  %v3980_v32 = vmul.f32 0.16666667, %v3916_v8  ;;  %v3858_v20 = vmin.f32 %v3794_v57, 6.0  ;;  %v3860_v31 = vmin.f32 %v3796_v0, 6.0 }
 0x73e   : > { %v3979_v41 = vmul.f32 0.16666667, %v3915_v53  ;;  %v3981_v10 = vmul.f32 0.16666667, %v3917_v23  ;;  %v3859_v15 = vmin.f32 %v3795_v28, 6.0  ;;  %v3861_v21 = vmin.f32 %v3797_v13, 6.0 }
 0x73f   : > { %v3922_v18 = vmul.f32 %v3858_v20, %v3343_v46  ;;  %v3924_v24 = vmul.f32 %v3860_v31, %v3456_v45  ;;  %v3349_v63 = vadd.f32 %v3348_v37, %v9547_v29  ;;  %v3462_v43 = vadd.f32 %v3461_v44, %v9550_v35  ;;  %v3354_v19 = vpop.f32.mrb[120].mxu1  ;;  %v3467_v25 = vpop.f32.mrb[112].mxu0 }
 0x740   : > { %v3923_v62 = vmul.f32 %v3859_v15, %v3345_v58  ;;  %v3925_v11 = vmul.f32 %v3861_v21, %v3458_v7  ;;  %v3351_v14 = vadd.f32 %v3350_v42, %v9553_v6  ;;  %v3464_v17 = vadd.f32 %v3463_v2, %v9556_v36  ;;  %v3356_v27 = vpop.f32.mrb[121].mxu1  ;;  %v3469_v55 = vpop.f32.mrb[113].mxu0 }
 0x741   : > { %v3986_v12 = vmul.f32 0.16666667, %v3922_v18  ;;  %v3988_v16 = vmul.f32 0.16666667, %v3924_v24  ;;  %v3738_v40 = vadd.f32 3.0, %v3349_v63  ;;  %v3740_v38 = vadd.f32 3.0, %v3462_v43 }
 0x742   : > { %v3987_v46 = vmul.f32 0.16666667, %v3923_v62  ;;  %v3989_v45 = vmul.f32 0.16666667, %v3925_v11  ;;  %v3739_v33 = vadd.f32 3.0, %v3351_v14  ;;  %v3741_v22 = vadd.f32 3.0, %v3464_v17 }
 0x743   : > { %v4042_v26 = vadd.f32 %v3986_v12, %v3978_v30  ;;  %v4068_v9 = vadd.f32 %v3988_v16, %v3980_v32  ;;  %v3802_v37 = vmax.f32 %v3738_v40, 0.0  ;;  %v3804_v44 = vmax.f32 %v3740_v38, 0.0  ;;  %v3360_v58 = vpop.f32.mrb[122].mxu1  ;;  %v3473_v7 = vpop.f32.mrb[114].mxu0 }
 0x744   : > { %v4055_v54 = vadd.f32 %v3987_v46, %v3979_v41  ;;  %v4081_v8 = vadd.f32 %v3989_v45, %v3981_v10  ;;  %v3803_v57 = vmax.f32 %v3739_v33, 0.0  ;;  %v3805_v0 = vmax.f32 %v3741_v22, 0.0  ;;  %v3362_v42 = vpop.f32.mrb[123].mxu1  ;;  %v3475_v2 = vpop.f32.mrb[115].mxu0 }
 0x745   : > { %v3866_v53 = vmin.f32 %v3802_v37, 6.0  ;;  %v3868_v23 = vmin.f32 %v3804_v44, 6.0  ;;  %v3355_v28 = vadd.f32 %v3354_v19, %v9547_v29  ;;  %v3468_v13 = vadd.f32 %v3467_v25, %v9550_v35 }
 0x746   : > { %v3867_v20 = vmin.f32 %v3803_v57, 6.0  ;;  %v3869_v31 = vmin.f32 %v3805_v0, 6.0  ;;  %v3357_v30 = vadd.f32 %v3356_v27, %v9553_v6  ;;  %v3470_v32 = vadd.f32 %v3469_v55, %v9556_v36  ;;  %v9614_v15 = vpop.f32.mrb[124].mxu1  ;;  %v9616_v41 = vpop.f32.mrb[116].mxu0 }
 0x747   : > { %v3930_v10 = vmul.f32 %v3866_v53, %v3349_v63  ;;  %v3932_v21 = vmul.f32 %v3868_v23, %v3462_v43  ;;  %v3746_v18 = vadd.f32 3.0, %v3355_v28  ;;  %v3748_v24 = vadd.f32 3.0, %v3468_v13  ;;  %v9618_v62 = vpop.f32.mrb[125].mxu1  ;;  %v9620_v11 = vpop.f32.mrb[117].mxu0 }
 0x748   : > { %v3931_v19 = vmul.f32 %v3867_v20, %v3351_v14  ;;  %v3933_v25 = vmul.f32 %v3869_v31, %v3464_v17  ;;  %v3747_v12 = vadd.f32 3.0, %v3357_v30  ;;  %v3749_v16 = vadd.f32 3.0, %v3470_v32 }
 0x749   : > { %v3994_v40 = vmul.f32 0.16666667, %v3930_v10  ;;  %v3996_v27 = vmul.f32 0.16666667, %v3932_v21  ;;  %v3810_v38 = vmax.f32 %v3746_v18, 0.0  ;;  %v3812_v55 = vmax.f32 %v3748_v24, 0.0 }
 0x74a   : > { %v3995_v46 = vmul.f32 0.16666667, %v3931_v19  ;;  %v3997_v45 = vmul.f32 0.16666667, %v3933_v25  ;;  %v3811_v33 = vmax.f32 %v3747_v12, 0.0  ;;  %v3813_v22 = vmax.f32 %v3749_v16, 0.0 }
 0x74b   : > { %v4043_v63 = vadd.f32 %v4042_v26, %v3994_v40  ;;  %v4069_v43 = vadd.f32 %v4068_v9, %v3996_v27  ;;  %v3874_v37 = vmin.f32 %v3810_v38, 6.0  ;;  %v3876_v44 = vmin.f32 %v3812_v55, 6.0  ;;  %v9622_v57 = vpop.f32.mrb[126].mxu1  ;;  %v9624_v0 = vpop.f32.mrb[118].mxu0 }
 0x74c   : > { %v4056_v14 = vadd.f32 %v4055_v54, %v3995_v46  ;;  %v4082_v17 = vadd.f32 %v4081_v8, %v3997_v45  ;;  %v3875_v53 = vmin.f32 %v3811_v33, 6.0  ;;  %v3877_v23 = vmin.f32 %v3813_v22, 6.0  ;;  %v9626_v20 = vpop.f32.mrb[127].mxu1  ;;  %v9628_v31 = vpop.f32.mrb[119].mxu0 }
 0x74d   : > { %v3938_v10 = vmul.f32 %v3874_v37, %v3355_v28  ;;  %v3940_v21 = vmul.f32 %v3876_v44, %v3468_v13  ;;  %v3361_v18 = vadd.f32 %v3360_v58, %v9547_v29  ;;  %v3474_v26 = vadd.f32 %v3473_v7, %v9550_v35 }
 0x74e   : > { %v3939_v9 = vmul.f32 %v3875_v53, %v3357_v30  ;;  %v3941_v24 = vmul.f32 %v3877_v23, %v3470_v32  ;;  %v3363_v19 = vadd.f32 %v3362_v42, %v9553_v6  ;;  %v3476_v25 = vadd.f32 %v3475_v2, %v9556_v36  ;;  %v9634_v54 = vpop.f32.mrb[128].mxu1  ;;  %v9636_v8 = vpop.f32.mrb[120].mxu0 }
 0x74f   : > { %v4002_v12 = vmul.f32 0.16666667, %v3938_v10  ;;  %v4004_v16 = vmul.f32 0.16666667, %v3940_v21  ;;  %v3754_v40 = vadd.f32 3.0, %v3361_v18  ;;  %v3756_v27 = vadd.f32 3.0, %v3474_v26 }
 0x750   : > { %v4003_v28 = vmul.f32 0.16666667, %v3939_v9  ;;  %v4005_v13 = vmul.f32 0.16666667, %v3941_v24  ;;  %v3755_v38 = vadd.f32 3.0, %v3363_v19  ;;  %v3757_v58 = vadd.f32 3.0, %v3476_v25 }
 0x751   : > { %v4044_v55 = vadd.f32 %v4043_v63, %v4002_v12  ;;  %v4070_v7 = vadd.f32 %v4069_v43, %v4004_v16  ;;  %v3818_v30 = vmax.f32 %v3754_v40, 0.0  ;;  %v3820_v32 = vmax.f32 %v3756_v27, 0.0  ;;  %v9638_v46 = vpop.f32.mrb[129].mxu1  ;;  %v9640_v42 = vpop.f32.mrb[121].mxu0 }
 0x752   : > { %v4057_v2 = vadd.f32 %v4056_v14, %v4003_v28  ;;  %v4083_v45 = vadd.f32 %v4082_v17, %v4005_v13  ;;  %v3819_v33 = vmax.f32 %v3755_v38, 0.0  ;;  %v3821_v22 = vmax.f32 %v3757_v58, 0.0  ;;  %v9642_v37 = vpop.f32.mrb[130].mxu1  ;;  %v9644_v44 = vpop.f32.mrb[122].mxu0 }
 0x753   : > { %v3882_v53 = vmin.f32 %v3818_v30, 6.0  ;;  %v3884_v23 = vmin.f32 %v3820_v32, 6.0  ;;  %v3367_v63 = vadd.f32 %v9614_v15, %v9547_v29  ;;  %v3480_v43 = vadd.f32 %v9616_v41, %v9550_v35  ;;  %v9650_v10 = vpop.f32.mrb[131].mxu1  ;;  %v9652_v21 = vpop.f32.mrb[123].mxu0 }
 0x754   : > { %v3883_v14 = vmin.f32 %v3819_v33, 6.0  ;;  %v3885_v17 = vmin.f32 %v3821_v22, 6.0  ;;  %v3369_v9 = vadd.f32 %v9618_v62, %v9553_v6  ;;  %v3482_v24 = vadd.f32 %v9620_v11, %v9556_v36 }
 0x755   : > { %v3946_v12 = vmul.f32 %v3882_v53, %v3361_v18  ;;  %v3948_v16 = vmul.f32 %v3884_v23, %v3474_v26  ;;  %v3762_v40 = vadd.f32 3.0, %v3367_v63  ;;  %v3764_v27 = vadd.f32 3.0, %v3480_v43 }
 0x756   : > { %v3947_v15 = vmul.f32 %v3883_v14, %v3363_v19  ;;  %v3949_v28 = vmul.f32 %v3885_v17, %v3476_v25  ;;  %v3763_v13 = vadd.f32 3.0, %v3369_v9  ;;  %v3765_v41 = vadd.f32 3.0, %v3482_v24  ;;  %v9658_v38 = vpop.f32.mrb[132].mxu1  ;;  %v9660_v58 = vpop.f32.mrb[124].mxu0 }
 0x757   : > { %v4010_v30 = vmul.f32 0.16666667, %v3946_v12  ;;  %v4012_v32 = vmul.f32 0.16666667, %v3948_v16  ;;  %v3826_v33 = vmax.f32 %v3762_v40, 0.0  ;;  %v3828_v22 = vmax.f32 %v3764_v27, 0.0 }
 0x758   : > { %v4011_v62 = vmul.f32 0.16666667, %v3947_v15  ;;  %v4013_v47 = vmul.f32 0.16666667, %v3949_v28  ;;  %v3827_v34 = vmax.f32 %v3763_v13, 0.0  ;;  %v3829_v11 = vmax.f32 %v3765_v41, 0.0 }
 0x759   : > { %v4045_v18 = vadd.f32 %v4044_v55, %v4010_v30  ;;  %v4071_v26 = vadd.f32 %v4070_v7, %v4012_v32  ;;  %v3890_v53 = vmin.f32 %v3826_v33, 6.0  ;;  %v3892_v23 = vmin.f32 %v3828_v22, 6.0  ;;  %v9662_v19 = vpop.f32.mrb[133].mxu1  ;;  %v9664_v25 = vpop.f32.mrb[125].mxu0 }
 0x75a   : > { %v4058_v14 = vadd.f32 %v4057_v2, %v4011_v62  ;;  %v4084_v17 = vadd.f32 %v4083_v45, %v4013_v47  ;;  %v3891_v50 = vmin.f32 %v3827_v34, 6.0  ;;  %v3893_v48 = vmin.f32 %v3829_v11, 6.0  ;;  %v9666_v12 = vpop.f32.mrb[134].mxu1  ;;  %v9668_v16 = vpop.f32.mrb[126].mxu0 }
 0x75b   : > { %v3954_v40 = vmul.f32 %v3890_v53, %v3367_v63  ;;  %v3956_v27 = vmul.f32 %v3892_v23, %v3480_v43  ;;  %v3373_v55 = vadd.f32 %v9622_v57, %v9547_v29  ;;  %v3486_v7 = vadd.f32 %v9624_v0, %v9550_v35  ;;  %v9674_v15 = vpop.f32.mrb[135].mxu1  ;;  %v9676_v28 = vpop.f32.mrb[127].mxu0 }
 0x75c   : > { %v3955_v2 = vmul.f32 %v3891_v50, %v3369_v9  ;;  %v3957_v47 = vmul.f32 %v3893_v48, %v3482_v24  ;;  %v3375_v34 = vadd.f32 %v9626_v20, %v9553_v6  ;;  %v3488_v45 = vadd.f32 %v9628_v31, %v9556_v36 }
 0x75d   : > { %v4018_v63 = vmul.f32 0.16666667, %v3954_v40  ;;  %v4020_v43 = vmul.f32 0.16666667, %v3956_v27  ;;  %v3770_v13 = vadd.f32 3.0, %v3373_v55  ;;  %v3772_v41 = vadd.f32 3.0, %v3486_v7 }
 0x75e   : > { %v4019_v57 = vmul.f32 0.16666667, %v3955_v2  ;;  %v4021_v30 = vmul.f32 0.16666667, %v3957_v47  ;;  %v3771_v32 = vadd.f32 3.0, %v3375_v34  ;;  %v3773_v0 = vadd.f32 3.0, %v3488_v45 }
 0x75f   : > { %v4046_v33 = vadd.f32 %v4045_v18, %v4018_v63  ;;  %v4072_v22 = vadd.f32 %v4071_v26, %v4020_v43  ;;  %v3834_v62 = vmax.f32 %v3770_v13, 0.0  ;;  %v3836_v11 = vmax.f32 %v3772_v41, 0.0  ;;  %v9682_v50 = vpop.f32.mrb[136].mxu1  ;;  %v9684_v48 = vpop.f32.mrb[128].mxu0 }
 0x760   : > { %v4059_v20 = vadd.f32 %v4058_v14, %v4019_v57  ;;  %v4085_v9 = vadd.f32 %v4084_v17, %v4021_v30  ;;  %v3835_v24 = vmax.f32 %v3771_v32, 0.0  ;;  %v3837_v31 = vmax.f32 %v3773_v0, 0.0  ;;  %v9686_v53 = vpop.f32.mrb[137].mxu1  ;;  %v9688_v23 = vpop.f32.mrb[129].mxu0 }
 0x761   : > { %v3898_v40 = vmin.f32 %v3834_v62, 6.0  ;;  %v3900_v27 = vmin.f32 %v3836_v11, 6.0  ;;  %v3379_v18 = vadd.f32 %v9634_v54, %v9547_v29  ;;  %v3492_v26 = vadd.f32 %v9636_v8, %v9550_v35 }
 0x762   : > { %v3899_v2 = vmin.f32 %v3835_v24, 6.0  ;;  %v3901_v47 = vmin.f32 %v3837_v31, 6.0  ;;  %v3381_v14 = vadd.f32 %v9638_v46, %v9553_v6  ;;  %v3494_v17 = vadd.f32 %v9640_v42, %v9556_v36  ;;  %v9698_v63 = vpop.f32.mrb[138].mxu1  ;;  %v9700_v43 = vpop.f32.mrb[130].mxu0 }
 0x763   : > { %v3962_v13 = vmul.f32 %v3898_v40, %v3373_v55  ;;  %v3964_v41 = vmul.f32 %v3900_v27, %v3486_v7  ;;  %v3778_v57 = vadd.f32 3.0, %v3379_v18  ;;  %v3780_v30 = vadd.f32 3.0, %v3492_v26  ;;  %v9702_v29 = vpop.f32.mrb[139].mxu1  ;;  %v9704_v54 = vpop.f32.mrb[131].mxu0 }
 0x764   : > { %v3963_v35 = vmul.f32 %v3899_v2, %v3375_v34  ;;  %v3965_v8 = vmul.f32 %v3901_v47, %v3488_v45  ;;  %v3779_v32 = vadd.f32 3.0, %v3381_v14  ;;  %v3781_v0 = vadd.f32 3.0, %v3494_v17 }
 0x765   : > { %v4026_v6 = vmul.f32 0.16666667, %v3962_v13  ;;  %v4028_v46 = vmul.f32 0.16666667, %v3964_v41  ;;  %v3842_v62 = vmax.f32 %v3778_v57, 0.0  ;;  %v3844_v36 = vmax.f32 %v3780_v30, 0.0 }
 0x766   : > { %v4027_v42 = vmul.f32 0.16666667, %v3963_v35  ;;  %v4029_v11 = vmul.f32 0.16666667, %v3965_v8  ;;  %v3843_v24 = vmax.f32 %v3779_v32, 0.0  ;;  %v3845_v31 = vmax.f32 %v3781_v0, 0.0 }
 0x767   : > { %v4047_v55 = vadd.f32 %v4046_v33, %v4026_v6  ;;  %v4073_v7 = vadd.f32 %v4072_v22, %v4028_v46  ;;  %v3906_v40 = vmin.f32 %v3842_v62, 6.0  ;;  %v3908_v27 = vmin.f32 %v3844_v36, 6.0  ;;  %v9706_v4 = vpop.f32.mrb[140].mxu1  ;;  %v9708_v1 = vpop.f32.mrb[132].mxu0 }
 0x768   : > { %v4060_v34 = vadd.f32 %v4059_v20, %v4027_v42  ;;  %v4086_v45 = vadd.f32 %v4085_v9, %v4029_v11  ;;  %v3907_v2 = vmin.f32 %v3843_v24, 6.0  ;;  %v3909_v47 = vmin.f32 %v3845_v31, 6.0  ;;  %v9710_v13 = vpop.f32.mrb[141].mxu1  ;;  %v9712_v41 = vpop.f32.mrb[133].mxu0 }
 0x769   : > { %v3970_v57 = vmul.f32 %v3906_v40, %v3379_v18  ;;  %v3972_v30 = vmul.f32 %v3908_v27, %v3492_v26  ;;  %v3563_v33 = vadd.f32 %v9642_v37, %v9584_v5  ;;  %v3676_v22 = vadd.f32 %v9644_v44, %v9588_v3 }
 0x76a   : > { %v3971_v35 = vmul.f32 %v3907_v2, %v3381_v14  ;;  %v3973_v8 = vmul.f32 %v3909_v47, %v3494_v17  ;;  %v3565_v20 = vadd.f32 %v9650_v10, %v9592_v52  ;;  %v3678_v9 = vadd.f32 %v9652_v21, %v9596_v61  ;;  %v9722_v32 = vpop.f32.mrb[142].mxu1  ;;  %v9724_v0 = vpop.f32.mrb[134].mxu0 }
 0x76b   : > { %v4034_v18 = vmul.f32 0.16666667, %v3970_v57  ;;  %v4036_v26 = vmul.f32 0.16666667, %v3972_v30  ;;  %v3726_v6 = vadd.f32 3.0, %v3563_v33  ;;  %v3728_v46 = vadd.f32 3.0, %v3676_v22 }
 0x76c   : > { %v4035_v37 = vmul.f32 0.16666667, %v3971_v35  ;;  %v4037_v62 = vmul.f32 0.16666667, %v3973_v8  ;;  %v3727_v36 = vadd.f32 3.0, %v3565_v20  ;;  %v3729_v44 = vadd.f32 3.0, %v3678_v9 }
 0x76d   : > { %v4048_v14 = vadd.f32 %v4047_v55, %v4034_v18  ;;  %v4074_v17 = vadd.f32 %v4073_v7, %v4036_v26  ;;  %v3790_v42 = vmax.f32 %v3726_v6, 0.0  ;;  %v3792_v11 = vmax.f32 %v3728_v46, 0.0  ;;  %v9726_v10 = vpop.f32.mrb[143].mxu1  ;;  %v9728_v24 = vpop.f32.mrb[135].mxu0  ;;  %v9737_v57 = vld [vmem:[%s10951_s16 + $0x848] sm:$0xff] }
 0x76e   : > { %v4061_v21 = vadd.f32 %v4060_v34, %v4035_v37  ;;  %v4087_v31 = vadd.f32 %v4086_v45, %v4037_v62  ;;  %v3791_v40 = vmax.f32 %v3727_v36, 0.0  ;;  %v3793_v27 = vmax.f32 %v3729_v44, 0.0  ;;  %v9730_v2 = vpop.f32.mrb[144].mxu1  ;;  %v9732_v47 = vpop.f32.mrb[136].mxu0  ;;  %v9742_v55 = vld [vmem:[%s10951_s16 + $0x868] sm:$0xff] }
 0x76f   : > { %v4049_v7 = vrot.slane %v4048_v14, 4  ;;  %v4075_v30 = vrot.slane %v4074_v17, 4  ;;  %v3854_v34 = vmin.f32 %v3790_v42, 6.0  ;;  %v3856_v45 = vmin.f32 %v3792_v11, 6.0  ;;  %v9744_v35 = vpop.f32.mrb[145].mxu1  ;;  %v9746_v8 = vpop.f32.mrb[137].mxu0 }
 0x770   : > { %10998 = vst [vmem:[#allocation14_spill] sm:$0xff] %v9744_v35  ;;  %10999 = vst [vmem:[#allocation15_spill] sm:$0xff] %v9746_v8  ;;  %v4062_v18 = vrot.slane %v4061_v21, 4  ;;  %v4088_v26 = vrot.slane %v4087_v31, 4  ;;  %v3855_v6 = vmin.f32 %v3791_v40, 6.0  ;;  %v3857_v46 = vmin.f32 %v3793_v27, 6.0 }
 0x771   : > { %v4050_v37 = vadd.f32 %v4049_v7, %v4048_v14  ;;  %v4076_v62 = vadd.f32 %v4075_v30, %v4074_v17  ;;  %v3918_v36 = vmul.f32 %v3854_v34, %v3563_v33  ;;  %v3920_v44 = vmul.f32 %v3856_v45, %v3676_v22 }
 0x772   : > { %v9748_v51 = vadd.f32 %v4062_v18, %v4061_v21  ;;  %v3919_v49 = vmul.f32 %v3855_v6, %v3565_v20  ;;  %v3921_v39 = vmul.f32 %v3857_v46, %v3678_v9  ;;  %v9752_v60 = vadd.f32 %v4088_v26, %v4087_v31 }
 0x773   : > { %v4051_v11 = vrot.slane %v4050_v37, 2  ;;  %v4077_v59 = vrot.slane %v4076_v62, 2  ;;  %v3982_v56 = vmul.f32 0.16666667, %v3918_v36  ;;  %v3984_v8 = vmul.f32 0.16666667, %v3920_v44 }
 0x774   : > { %v3985_v35 = vmul.f32 0.16666667, %v3921_v39  ;;  %v3569_v14 = vadd.f32 %v9658_v38, %v9584_v5  ;;  %v3682_v33 = vadd.f32 %v9660_v58, %v9588_v3  ;;  %v3571_v20 = vadd.f32 %v9662_v19, %v9592_v52 }
 0x775   : > { %v4052_v22 = vadd.f32 %v4051_v11, %v4050_v37  ;;  %v4078_v17 = vadd.f32 %v4077_v59, %v4076_v62  ;;  %v3684_v9 = vadd.f32 %v9664_v25, %v9596_v61  ;;  %v3983_v21 = vmul.f32 0.16666667, %v3919_v49 }
 0x776   : > { %v3734_v31 = vadd.f32 3.0, %v3569_v14  ;;  %v3736_v40 = vadd.f32 3.0, %v3682_v33  ;;  %v3575_v39 = vadd.f32 %v9666_v12, %v9584_v5  ;;  %v3735_v38 = vadd.f32 3.0, %v3571_v20 }
 0x777   : > { %v4053_v27 = vrot.slane %v4052_v22, 1  ;;  %v4079_v7 = vrot.slane %v4078_v17, 1  ;;  %v3737_v30 = vadd.f32 3.0, %v3684_v9  ;;  %v3688_v59 = vadd.f32 %v9668_v16, %v9588_v3 }
 0x778   : > { %v3798_v34 = vmax.f32 %v3734_v31, 0.0  ;;  %v3800_v58 = vmax.f32 %v3736_v40, 0.0  ;;  %v3742_v45 = vadd.f32 3.0, %v3575_v39  ;;  %v4133_v18 = vsel %vm2837_vm6, %v3985_v35, 0.0 }
 0x779   : > { %v4054_v19 = vadd.f32 %v4053_v27, %v4052_v22  ;;  %v3799_v25 = vmax.f32 %v3735_v38, 0.0  ;;  %v3801_v49 = vmax.f32 %v3737_v30, 0.0  ;;  %v3744_v37 = vadd.f32 3.0, %v3688_v59 }
 0x77a   : > { %v3862_v26 = vmin.f32 %v3798_v34, 6.0  ;;  %v3864_v6 = vmin.f32 %v3800_v58, 6.0  ;;  %v3806_v46 = vmax.f32 %v3742_v45, 0.0  ;;  %v9769_v62 = vadd.f32 %v4079_v7, %v4078_v17 }
 0x77b   : > { %v9767_v12 = vmul.f32 0.015625, %v4054_v19  ;;  %v3863_v36 = vmin.f32 %v3799_v25, 6.0  ;;  %v3865_v44 = vmin.f32 %v3801_v49, 6.0  ;;  %v3808_v42 = vmax.f32 %v3744_v37, 0.0 }
 0x77c   : > { %v3926_v11 = vmul.f32 %v3862_v26, %v3569_v14  ;;  %v3928_v31 = vmul.f32 %v3864_v6, %v3682_v33  ;;  %v3870_v40 = vmin.f32 %v3806_v46, 6.0  ;;  %v3577_v35 = vadd.f32 %v9674_v15, %v9592_v52 }
 0x77d   : > { %v3927_v16 = vmul.f32 %v3863_v36, %v3571_v20  ;;  %v3929_v22 = vmul.f32 %v3865_v44, %v3684_v9  ;;  %v3690_v27 = vadd.f32 %v9676_v28, %v9596_v61  ;;  %v3872_v58 = vmin.f32 %v3808_v42, 6.0 }
 0x77e   : > { %v3990_v38 = vmul.f32 0.16666667, %v3926_v11  ;;  %v3992_v30 = vmul.f32 0.16666667, %v3928_v31  ;;  %v3934_v34 = vmul.f32 %v3870_v40, %v3575_v39  ;;  %v3743_v45 = vadd.f32 3.0, %v3577_v35 }
 0x77f   : > { %v3991_v17 = vmul.f32 0.16666667, %v3927_v16  ;;  %v3993_v7 = vmul.f32 0.16666667, %v3929_v22  ;;  %v3745_v19 = vadd.f32 3.0, %v3690_v27  ;;  %v3936_v49 = vmul.f32 %v3872_v58, %v3688_v59 }
 0x780   : > { %v4094_v14 = vadd.f32 %v3990_v38, %v3982_v56  ;;  %v4120_v33 = vadd.f32 %v3992_v30, %v3984_v8  ;;  %v3998_v25 = vmul.f32 0.16666667, %v3934_v34  ;;  %v3807_v26 = vmax.f32 %v3743_v45, 0.0 }
 0x781   : > { %v4107_v20 = vadd.f32 %v3991_v17, %v3983_v21  ;;  %v4134_v9 = vsel %vm2837_vm6, %v3993_v7, 0.0  ;;  %v3809_v15 = vmax.f32 %v3745_v19, 0.0  ;;  %v4000_v28 = vmul.f32 0.16666667, %v3936_v49 }
 0x782   : > { %v4135_v6 = vadd.f32 %v4134_v9, %v4133_v18  ;;  %v4095_v46 = vadd.f32 %v4094_v14, %v3998_v25  ;;  %v3581_v39 = vadd.f32 %v9682_v50, %v9584_v5  ;;  %v3871_v42 = vmin.f32 %v3807_v26, 6.0 }
 0x783   : > { %v3873_v37 = vmin.f32 %v3809_v15, 6.0  ;;  %v3694_v36 = vadd.f32 %v9684_v48, %v9588_v3  ;;  %v3583_v56 = vadd.f32 %v9686_v53, %v9592_v52  ;;  %v4121_v8 = vadd.f32 %v4120_v33, %v4000_v28 }
 0x784   : > { %v3750_v21 = vadd.f32 3.0, %v3581_v39  ;;  %v3696_v59 = vadd.f32 %v9688_v23, %v9596_v61  ;;  %v3587_v18 = vadd.f32 %v9698_v63, %v9584_v5  ;;  %v3935_v44 = vmul.f32 %v3871_v42, %v3577_v35 }
 0x785   : > { %v3937_v11 = vmul.f32 %v3873_v37, %v3690_v27  ;;  %v3752_v31 = vadd.f32 3.0, %v3694_v36  ;;  %v3751_v50 = vadd.f32 3.0, %v3583_v56  ;;  %v3700_v48 = vadd.f32 %v9700_v43, %v9588_v3 }
 0x786   : > { %v3814_v40 = vmax.f32 %v3750_v21, 0.0  ;;  %v3753_v16 = vadd.f32 3.0, %v3696_v59  ;;  %v3758_v22 = vadd.f32 3.0, %v3587_v18  ;;  %v3999_v38 = vmul.f32 0.16666667, %v3935_v44 }
 0x787   : > { %v4001_v53 = vmul.f32 0.16666667, %v3937_v11  ;;  %v3816_v30 = vmax.f32 %v3752_v31, 0.0  ;;  %v3815_v34 = vmax.f32 %v3751_v50, 0.0  ;;  %v3760_v7 = vadd.f32 3.0, %v3700_v48 }
 0x788   : > { %v3878_v58 = vmin.f32 %v3814_v40, 6.0  ;;  %v3817_v17 = vmax.f32 %v3753_v16, 0.0  ;;  %v3822_v23 = vmax.f32 %v3758_v22, 0.0  ;;  %v4108_v45 = vadd.f32 %v4107_v20, %v3999_v38 }
 0x789   : > { %v4136_v63 = vsel %vm2837_vm6, %v4001_v53, 0.0  ;;  %v3880_v35 = vmin.f32 %v3816_v30, 6.0  ;;  %v3879_v27 = vmin.f32 %v3815_v34, 6.0  ;;  %v3824_v43 = vmax.f32 %v3760_v7, 0.0 }
 0x78a   : > { %v4137_v19 = vadd.f32 %v4136_v63, %v4135_v6  ;;  %v3942_v14 = vmul.f32 %v3878_v58, %v3581_v39  ;;  %v3881_v33 = vmin.f32 %v3817_v17, 6.0  ;;  %v3886_v25 = vmin.f32 %v3822_v23, 6.0 }
 0x78b   : > { %v3944_v49 = vmul.f32 %v3880_v35, %v3694_v36  ;;  %v3943_v9 = vmul.f32 %v3879_v27, %v3583_v56  ;;  %v3589_v26 = vadd.f32 %v9702_v29, %v9592_v52  ;;  %v3702_v20 = vadd.f32 %v9704_v54, %v9596_v61 }
 0x78c   : > { %v4006_v15 = vmul.f32 0.16666667, %v3942_v14  ;;  %v3945_v28 = vmul.f32 %v3881_v33, %v3696_v59  ;;  %v3950_v42 = vmul.f32 %v3886_v25, %v3587_v18  ;;  %v3888_v44 = vmin.f32 %v3824_v43, 6.0 }
 0x78d   : > { %v4008_v37 = vmul.f32 0.16666667, %v3944_v49  ;;  %v4007_v21 = vmul.f32 0.16666667, %v3943_v9  ;;  %v3759_v11 = vadd.f32 3.0, %v3589_v26  ;;  %v3761_v50 = vadd.f32 3.0, %v3702_v20 }
 0x78e   : > { %v4096_v6 = vadd.f32 %v4095_v46, %v4006_v15  ;;  %v4009_v39 = vmul.f32 0.16666667, %v3945_v28  ;;  %v4014_v31 = vmul.f32 0.16666667, %v3950_v42  ;;  %v3952_v40 = vmul.f32 %v3888_v44, %v3700_v48 }
 0x78f   : > { %v4122_v36 = vadd.f32 %v4121_v8, %v4008_v37  ;;  %v4109_v56 = vadd.f32 %v4108_v45, %v4007_v21  ;;  %v3823_v16 = vmax.f32 %v3759_v11, 0.0  ;;  %v3825_v59 = vmax.f32 %v3761_v50, 0.0 }
 0x790   : > { %v4138_v29 = vsel %vm2837_vm6, %v4009_v39, 0.0  ;;  %v4097_v22 = vadd.f32 %v4096_v6, %v4014_v31  ;;  %v3593_v18 = vadd.f32 %v9706_v4, %v9584_v5  ;;  %v4016_v38 = vmul.f32 0.16666667, %v3952_v40 }
 0x791   : > { %v4139_v54 = vadd.f32 %v4138_v29, %v4137_v19  ;;  %v3887_v53 = vmin.f32 %v3823_v16, 6.0  ;;  %v3706_v46 = vadd.f32 %v9708_v1, %v9588_v3  ;;  %v3889_v30 = vmin.f32 %v3825_v59, 6.0 }
 0x792   : > { %v3766_v34 = vadd.f32 3.0, %v3593_v18  ;;  %v3595_v8 = vadd.f32 %v9710_v13, %v9592_v52  ;;  %v3708_v48 = vadd.f32 %v9712_v41, %v9596_v61  ;;  %v4123_v58 = vadd.f32 %v4122_v36, %v4016_v38 }
 0x793   : > { %v3951_v17 = vmul.f32 %v3887_v53, %v3589_v26  ;;  %v3768_v23 = vadd.f32 3.0, %v3706_v46  ;;  %v3599_v4 = vadd.f32 %v9722_v32, %v9584_v5  ;;  %v3953_v7 = vmul.f32 %v3889_v30, %v3702_v20 }
 0x794   : > { %v3830_v45 = vmax.f32 %v3766_v34, 0.0  ;;  %v3767_v63 = vadd.f32 3.0, %v3595_v8  ;;  %v3769_v35 = vadd.f32 3.0, %v3708_v48  ;;  %v3712_v14 = vadd.f32 %v9724_v0, %v9588_v3 }
 0x795   : > { %v4015_v27 = vmul.f32 0.16666667, %v3951_v17  ;;  %v3832_v1 = vmax.f32 %v3768_v23, 0.0  ;;  %v3774_v19 = vadd.f32 3.0, %v3599_v4  ;;  %v4017_v13 = vmul.f32 0.16666667, %v3953_v7 }
 0x796   : > { %v3894_v33 = vmin.f32 %v3830_v45, 6.0  ;;  %v3831_v25 = vmax.f32 %v3767_v63, 0.0  ;;  %v3833_v41 = vmax.f32 %v3769_v35, 0.0  ;;  %v3776_v26 = vadd.f32 3.0, %v3712_v14  ;;  %v11000_v35 = vld [vmem:[#allocation14_spill] sm:$0xff] }
 0x797   : > { %v4110_v49 = vadd.f32 %v4109_v56, %v4015_v27  ;;  %v3896_v9 = vmin.f32 %v3832_v1, 6.0  ;;  %v3838_v43 = vmax.f32 %v3774_v19, 0.0  ;;  %v4140_v32 = vsel %vm2837_vm6, %v4017_v13, 0.0 }
 0x798   : > { %v3958_v15 = vmul.f32 %v3894_v33, %v3593_v18  ;;  %v3895_v28 = vmin.f32 %v3831_v25, 6.0  ;;  %v3897_v42 = vmin.f32 %v3833_v41, 6.0  ;;  %v4141_v20 = vadd.f32 %v4140_v32, %v4139_v54  ;;  %v11001_v41 = vld [vmem:[#allocation15_spill] sm:$0xff] }
 0x799   : > { %v3960_v37 = vmul.f32 %v3896_v9, %v3706_v46  ;;  %v3902_v21 = vmin.f32 %v3838_v43, 6.0  ;;  %v3840_v44 = vmax.f32 %v3776_v26, 0.0  ;;  %v3601_v39 = vadd.f32 %v9726_v10, %v9592_v52 }
 0x79a   : > { %v4022_v11 = vmul.f32 0.16666667, %v3958_v15  ;;  %v3959_v6 = vmul.f32 %v3895_v28, %v3595_v8  ;;  %v3961_v0 = vmul.f32 %v3897_v42, %v3708_v48  ;;  %v3714_v56 = vadd.f32 %v9728_v24, %v9596_v61 }
 0x79b   : > { %v4024_v31 = vmul.f32 0.16666667, %v3960_v37  ;;  %v3966_v50 = vmul.f32 %v3902_v21, %v3599_v4  ;;  %v3904_v36 = vmin.f32 %v3840_v44, 6.0  ;;  %v3775_v59 = vadd.f32 3.0, %v3601_v39 }
 0x79c   : > { %v4098_v40 = vadd.f32 %v4097_v22, %v4022_v11  ;;  %v4023_v16 = vmul.f32 0.16666667, %v3959_v6  ;;  %v4025_v29 = vmul.f32 0.16666667, %v3961_v0  ;;  %v3777_v53 = vadd.f32 3.0, %v3714_v56  ;;  %v4172_v11 = vld [vmem:[%s10951_s16 + $0x50] sm:$0xff] }
 0x79d   : > { %v4124_v18 = vadd.f32 %v4123_v58, %v4024_v31  ;;  %v4030_v54 = vmul.f32 0.16666667, %v3966_v50  ;;  %v3968_v38 = vmul.f32 %v3904_v36, %v3712_v14  ;;  %v3839_v34 = vmax.f32 %v3775_v59, 0.0  ;;  %v4176_v6 = vld [vmem:[%s10951_s16 + $0x70] sm:$0xff]  ;;  %v4181_v36 = vld [vmem:[%s10951_s16 + $0x98] sm:$0xff] }
 0x79e   : > { %v4111_v46 = vadd.f32 %v4110_v49, %v4023_v16  ;;  %v4142_v30 = vsel %vm2837_vm6, %v4025_v29, 0.0  ;;  %v4064_v10 = vrot.slane %v9748_v51, 2  ;;  %v3841_v23 = vmax.f32 %v3777_v53, 0.0  ;;  %v11003_v53 = vld [vmem:[#allocation12_spill] sm:$0xff] }
 0x79f   : > { %v4143_v8 = vadd.f32 %v4142_v30, %v4141_v20  ;;  %v9813_v48 = vadd.f32 %v4098_v40, %v4030_v54  ;;  %v4032_v17 = vmul.f32 0.16666667, %v3968_v38  ;;  %v3903_v24 = vmin.f32 %v3839_v34, 6.0  ;;  %v4430_v54 = vld [vmem:[%s10951_s16 + $0x860] sm:$0xff]  ;;  %v4435_v34 = vld [vmem:[%s10951_s16 + $0x888] sm:$0xff] }
 0x7a0   : > { %v4065_v22 = vadd.f32 %v4064_v10, %v9748_v51  ;;  %v4090_v4 = vrot.slane %v9752_v60, 2  ;;  %v3605_v58 = vadd.f32 %v9730_v2, %v9584_v5  ;;  %v3905_v45 = vmin.f32 %v3841_v23, 6.0  ;;  %v11002_v38 = vld [vmem:[#allocation13_spill] sm:$0xff]  ;;  %v4439_v10 = vld [vmem:[%s10951_s16 + $0x8a8] sm:$0xff] }
 0x7a1   : > { %v9819_v7 = vadd.f32 %v4124_v18, %v4032_v17  ;;  %v3718_v63 = vadd.f32 %v9732_v47, %v9588_v3  ;;  %v3607_v27 = vadd.f32 %v11000_v35, %v9592_v52  ;;  %v3967_v1 = vmul.f32 %v3903_v24, %v3601_v39  ;;  %v4173_v3 = vld [vmem:[%s10951_s16 + $0x58] sm:$0xff]  ;;  %v4426_v18 = vld [vmem:[%s10951_s16 + $0x840] sm:$0xff] }
 0x7a2   : > { %v4066_v19 = vrot.slane %v4065_v22, 1  ;;  %v4091_v14 = vadd.f32 %v4090_v4, %v9752_v60  ;;  %v3782_v13 = vadd.f32 3.0, %v3605_v58  ;;  %v3969_v51 = vmul.f32 %v3905_v45, %v3714_v56  ;;  %v4177_v60 = vld [vmem:[%s10951_s16 + $0x78] sm:$0xff]  ;;  %v4184_v4 = vld [vmem:[%s10951_s16 + $0xb0] sm:$0xff]  ;;  %v11006_v45 = vld [vmem:[#allocation10_spill] sm:$0xff] }
 0x7a3   : > { %v3784_v33 = vadd.f32 3.0, %v3718_v63  ;;  %v3783_v25 = vadd.f32 3.0, %v3607_v27  ;;  %v3720_v5 = vadd.f32 %v11001_v41, %v9596_v61  ;;  %v4031_v2 = vmul.f32 0.16666667, %v3967_v1  ;;  %v4185_v56 = vld [vmem:[%s10951_s16 + $0xb8] sm:$0xff]  ;;  %v4438_v41 = vld [vmem:[%s10951_s16 + $0x8a0] sm:$0xff] }
 0x7a4   : > { %v4067_v49 = vadd.f32 %v4066_v19, %v4065_v22  ;;  %v4092_v9 = vrot.slane %v4091_v14, 1  ;;  %v3846_v43 = vmax.f32 %v3782_v13, 0.0  ;;  %v4033_v52 = vmul.f32 0.16666667, %v3969_v51  ;;  %v4180_v22 = vld [vmem:[%s10951_s16 + $0x90] sm:$0xff]  ;;  %v4189_v1 = vld [vmem:[%s10951_s16 + $0xd8] sm:$0xff] }
 0x7a5   : > { %v3848_v47 = vmax.f32 %v3784_v33, 0.0  ;;  %v3847_v26 = vmax.f32 %v3783_v25, 0.0  ;;  %v3785_v32 = vadd.f32 3.0, %v3720_v5  ;;  %v4112_v15 = vadd.f32 %v4111_v46, %v4031_v2  ;;  %v4193_v19 = vld [vmem:[%s10951_s16 + $0xf8] sm:$0xff]  ;;  %v4434_v25 = vld [vmem:[%s10951_s16 + $0x880] sm:$0xff] }
 0x7a6   : > { %v4155_v28 = vmul.f32 0.015625, %v4067_v49  ;;  %v4093_v42 = vadd.f32 %v4092_v9, %v4091_v14  ;;  %v3910_v61 = vmin.f32 %v3846_v43, 6.0  ;;  %v4144_v20 = vsel %vm2837_vm6, %v4033_v52, 0.0  ;;  %v4188_v9 = vld [vmem:[%s10951_s16 + $0xd0] sm:$0xff] }
 0x7a7   : > { %v3912_v37 = vmin.f32 %v3848_v47, 6.0  ;;  %v3911_v21 = vmin.f32 %v3847_v26, 6.0  ;;  %v3849_v44 = vmax.f32 %v3785_v32, 0.0  ;;  %v4145_v0 = vadd.f32 %v4144_v20, %v4143_v8  ;;  %v4192_v43 = vld [vmem:[%s10951_s16 + $0xf0] sm:$0xff]  ;;  %v4197_v47 = vld [vmem:[%s10951_s16 + $0x118] sm:$0xff]  ;;  %v4455_v20 = vld [vmem:[%s10951_s16 + $0x928] sm:$0xff] }
 0x7a8   : > { %4731 = vmatprep.mubr.f32.mxu0 %v4155_v28  ;;  %v9841_v39 = vmul.f32 0.015625, %v4093_v42  ;;  %v3974_v31 = vmul.f32 %v3910_v61, %v3605_v58  ;;  %v7221_v50 = vpack.c.bf16 %v4177_v60, %v4173_v3  ;;  %v9850_v40 = vmul.f32 0.015625, %v9769_v62  ;;  %v11005_v58 = vld [vmem:[#allocation11_spill] sm:$0xff]  ;;  %v4201_v26 = vld [vmem:[%s10951_s16 + $0x138] sm:$0xff]  ;;  %v4451_v61 = vld [vmem:[%s10951_s16 + $0x908] sm:$0xff] }
 0x7a9   : > { %4732 = vmatmul.mubr.f32.vlgmr.msra.gmra.mrb[138].mxu0 %v9767_v12  ;;  %v3976_v16 = vmul.f32 %v3912_v37, %v3718_v63  ;;  %v3975_v29 = vmul.f32 %v3911_v21, %v3607_v27  ;;  %v3913_v59 = vmin.f32 %v3849_v44, 6.0  ;;  %v11004_v46 = vpack.c.bf16 %v11002_v38, %v11003_v53  ;;  %v4196_v21 = vld [vmem:[%s10951_s16 + $0x110] sm:$0xff] }
 0x7aa   : > { %4802 = vmatprep.mubr.f32.mxu1 %v9841_v39  ;;  %v4038_v62 = vmul.f32 0.16666667, %v3974_v31  ;;  %v7223_v30 = vpack.c.bf16 %v4176_v6, %v4172_v11  ;;  %5015 = vmatprep.mubr.f32.mxu0 %v4155_v28  ;;  %v7225_v24 = vpack.c.bf16 %v4185_v56, %v4181_v36  ;;  %v11007_v63 = vpack.c.bf16 %v11005_v58, %v11006_v45  ;;  %v4446_v28 = vld [vmem:[%s10951_s16 + $0x8e0] sm:$0xff]  ;;  %v4200_v44 = vld [vmem:[%s10951_s16 + $0x130] sm:$0xff]  ;;  %v4209_v31 = vld [vmem:[%s10951_s16 + $0x178] sm:$0xff] }
 0x7ab   : > { %7220 = vmatpush1.bf16.msra.mxu0 %v11004_v46  ;;  %4803 = vmatmul.mubr.f32.vlgmr.msra.gmra.mrb[146].mxu1 %v9850_v40  ;;  %v4040_v8 = vmul.f32 0.16666667, %v3976_v16  ;;  %v4039_v17 = vmul.f32 0.16666667, %v3975_v29  ;;  %v3977_v23 = vmul.f32 %v3913_v59, %v3720_v5  ;;  %v7111_v27 = vpack.c.bf16 %v4430_v54, %v4426_v18  ;;  %v4450_v36 = vld [vmem:[%s10951_s16 + $0x900] sm:$0xff]  ;;  %v4459_v59 = vld [vmem:[%s10951_s16 + $0x948] sm:$0xff] }
 0x7ac   : > { %7108 = vmatpush1.bf16.msra.mxu1 %v11007_v63  ;;  %v9880_v35 = vadd.f32 %v9813_v48, %v4038_v62  ;;  %7222 = vmatprep.subr.bf16.mxu0 %v7221_v50  ;;  %v11008_v33 = vpack.c.bf16 %v9742_v55, %v9737_v57  ;;  %v7113_v48 = vpack.c.bf16 %v4439_v10, %v4435_v34  ;;  %v4447_v57 = vld [vmem:[%s10951_s16 + $0x8e8] sm:$0xff]  ;;  %v4454_v56 = vld [vmem:[%s10951_s16 + $0x920] sm:$0xff]  ;;  %v4204_v38 = vld [vmem:[%s10951_s16 + $0x150] sm:$0xff] }
 0x7ad   : > { %v9889_v14 = vadd.f32 %v9819_v7, %v4040_v8  ;;  %v4113_v13 = vadd.f32 %v4112_v15, %v4039_v17  ;;  %v4041_v51 = vmul.f32 0.16666667, %v3977_v23  ;;  %v7227_v5 = vpack.c.bf16 %v4184_v4, %v4180_v22  ;;  %v4443_v7 = vld [vmem:[%s10951_s16 + $0x8c8] sm:$0xff]  ;;  %v4442_v15 = vld [vmem:[%s10951_s16 + $0x8c0] sm:$0xff]  ;;  %v4208_v53 = vld [vmem:[%s10951_s16 + $0x170] sm:$0xff] }
 0x7ae   : > { %7110 = vmatprep.subr.bf16.mxu1 %v11008_v33  ;;  %v7229_v49 = vpack.c.bf16 %v4193_v19, %v4189_v1  ;;  %v7115_v52 = vpack.c.bf16 %v4438_v41, %v4434_v25  ;;  %v7117_v60 = vpack.c.bf16 %v4447_v57, %v4443_v7  ;;  %v7231_v42 = vpack.c.bf16 %v4192_v43, %v4188_v9  ;;  %v4463_v18 = vld [vmem:[%s10951_s16 + $0x968] sm:$0xff]  ;;  %v4217_v34 = vld [vmem:[%s10951_s16 + $0x1b8] sm:$0xff]  ;;  %v4458_v8 = vld [vmem:[%s10951_s16 + $0x940] sm:$0xff] }
 0x7af   : > { %7224 = vmatpush1.bf16.msra.mxu0 %v7223_v30  ;;  %v4114_v55 = vrot.slane %v4113_v13, 4  ;;  %v4146_v2 = vsel %vm2837_vm6, %v4041_v51, 0.0  ;;  %v7233_v37 = vpack.c.bf16 %v4201_v26, %v4197_v47  ;;  %v7119_v6 = vpack.c.bf16 %v4446_v28, %v4442_v15  ;;  %v4213_v30 = vld [vmem:[%s10951_s16 + $0x198] sm:$0xff]  ;;  %v4462_v17 = vld [vmem:[%s10951_s16 + $0x960] sm:$0xff]  ;;  %v4467_v22 = vld [vmem:[%s10951_s16 + $0x988] sm:$0xff] }
 0x7b0   : > { %7226 = vmatprep.subr.bf16.mxu0 %v7225_v24  ;;  %v9913_v3 = vadd.f32 %v4146_v2, %v4145_v0  ;;  %7112 = vmatpush1.bf16.msra.mxu1 %v7111_v27  ;;  %v4205_v0 = vld [vmem:[%s10951_s16 + $0x158] sm:$0xff]  ;;  %v7121_v50 = vpack.c.bf16 %v4455_v20, %v4451_v61  ;;  %v7235_v29 = vpack.c.bf16 %v4200_v44, %v4196_v21  ;;  %v4471_v4 = vld [vmem:[%s10951_s16 + $0x9a8] sm:$0xff]  ;;  %v4212_v45 = vld [vmem:[%s10951_s16 + $0x190] sm:$0xff] }
 0x7b1   : > { %v4115_v32 = vadd.f32 %v4114_v55, %v4113_v13  ;;  %7114 = vmatprep.subr.bf16.mxu1 %v7113_v48  ;;  %v7237_v54 = vpack.c.bf16 %v4209_v31, %v4205_v0  ;;  %v7123_v62 = vpack.c.bf16 %v4454_v56, %v4450_v36  ;;  %v7125_v10 = vpack.c.bf16 %v4463_v18, %v4459_v59  ;;  %v4216_v63 = vld [vmem:[%s10951_s16 + $0x1b0] sm:$0xff]  ;;  %v4221_v19 = vld [vmem:[%s10951_s16 + $0x1d8] sm:$0xff]  ;;  %v4466_v33 = vld [vmem:[%s10951_s16 + $0x980] sm:$0xff] }
 0x7b2   : > { %v7239_v24 = vpack.c.bf16 %v4208_v53, %v4204_v38  ;;  %v7241_v58 = vpack.c.bf16 %v4217_v34, %v4213_v30  ;;  %v7127_v1 = vpack.c.bf16 %v4462_v17, %v4458_v8  ;;  %v4225_v13 = vld [vmem:[%s10951_s16 + $0x1f8] sm:$0xff]  ;;  %v7129_v51 = vpack.c.bf16 %v4471_v4, %v4467_v22  ;;  %v4470_v48 = vld [vmem:[%s10951_s16 + $0x9a0] sm:$0xff]  ;;  %v4475_v41 = vld [vmem:[%s10951_s16 + $0x9c8] sm:$0xff] }
 0x7b3   : > { %7228 = vmatpush1.bf16.msra.mxu0 %v7227_v5  ;;  %v4116_v11 = vrot.slane %v4115_v32, 2  ;;  %v7243_v25 = vpack.c.bf16 %v4216_v63, %v4212_v45  ;;  %v4479_v5 = vld [vmem:[%s10951_s16 + $0x9e8] sm:$0xff]  ;;  %v7245_v7 = vpack.c.bf16 %v4225_v13, %v4221_v19  ;;  %v4220_v57 = vld [vmem:[%s10951_s16 + $0x1d0] sm:$0xff]  ;;  %v7131_v2 = vpack.c.bf16 %v4470_v48, %v4466_v33  ;;  %v4233_v9 = vld [vmem:[%s10951_s16 + $0x238] sm:$0xff] }
 0x7b4   : > { %7230 = vmatprep.subr.bf16.mxu0 %v7229_v49  ;;  %7116 = vmatpush1.bf16.msra.mxu1 %v7115_v52  ;;  %v4224_v55 = vld [vmem:[%s10951_s16 + $0x1f0] sm:$0xff]  ;;  %v4229_v49 = vld [vmem:[%s10951_s16 + $0x218] sm:$0xff]  ;;  %v7133_v43 = vpack.c.bf16 %v4479_v5, %v4475_v41  ;;  %v4474_v52 = vld [vmem:[%s10951_s16 + $0x9c0] sm:$0xff] }
 0x7b5   : > { %7118 = vmatprep.subr.bf16.mxu1 %v7117_v60  ;;  %v4117_v16 = vadd.f32 %v4116_v11, %v4115_v32  ;;  %v4478_v47 = vld [vmem:[%s10951_s16 + $0x9e0] sm:$0xff]  ;;  %v7247_v26 = vpack.c.bf16 %v4224_v55, %v4220_v57  ;;  %v4483_v32 = vld [vmem:[%s10951_s16 + $0xa08] sm:$0xff]  ;;  %v7249_v15 = vpack.c.bf16 %v4233_v9, %v4229_v49  ;;  %v4228_v28 = vld [vmem:[%s10951_s16 + $0x210] sm:$0xff]  ;;  %v4148_v57 = vrot.slane %v9913_v3, 4 }
 0x7b6   : > { %v4487_v60 = vld [vmem:[%s10951_s16 + $0xa28] sm:$0xff]  ;;  %v7135_v61 = vpack.c.bf16 %v4478_v47, %v4474_v52  ;;  %v4237_v20 = vld [vmem:[%s10951_s16 + $0x258] sm:$0xff]  ;;  %v4482_v44 = vld [vmem:[%s10951_s16 + $0xa00] sm:$0xff] }
 0x7b7   : > { %7232 = vmatpush1.bf16.msra.mxu0 %v7231_v42  ;;  %v4118_v46 = vrot.slane %v4117_v16, 1  ;;  %v4232_v42 = vld [vmem:[%s10951_s16 + $0x230] sm:$0xff]  ;;  %v7137_v21 = vpack.c.bf16 %v4487_v60, %v4483_v32  ;;  %v4486_v11 = vld [vmem:[%s10951_s16 + $0xa20] sm:$0xff]  ;;  %v4491_v0 = vld [vmem:[%s10951_s16 + $0xa48] sm:$0xff] }
 0x7b8   : > { %7234 = vmatprep.subr.bf16.mxu0 %v7233_v37  ;;  %7120 = vmatpush1.bf16.msra.mxu1 %v7119_v6  ;;  %v4241_v37 = vld [vmem:[%s10951_s16 + $0x278] sm:$0xff]  ;;  %v7251_v6 = vpack.c.bf16 %v4232_v42, %v4228_v28  ;;  %v4495_v31 = vld [vmem:[%s10951_s16 + $0xa68] sm:$0xff]  ;;  %v4236_v36 = vld [vmem:[%s10951_s16 + $0x250] sm:$0xff] }
 0x7b9   : > { %7122 = vmatprep.subr.bf16.mxu1 %v7121_v50  ;;  %v4119_v23 = vadd.f32 %v4118_v46, %v4117_v16  ;;  %v7253_v50 = vpack.c.bf16 %v4241_v37, %v4237_v20  ;;  %v4240_v56 = vld [vmem:[%s10951_s16 + $0x270] sm:$0xff]  ;;  %v7139_v16 = vpack.c.bf16 %v4486_v11, %v4482_v44  ;;  %v4249_v59 = vld [vmem:[%s10951_s16 + $0x2b8] sm:$0xff]  ;;  %v7141_v18 = vpack.c.bf16 %v4495_v31, %v4491_v0  ;;  %v4494_v38 = vld [vmem:[%s10951_s16 + $0xa60] sm:$0xff] }
 0x7ba   : > { %v7255_v53 = vpack.c.bf16 %v4240_v56, %v4236_v36  ;;  %v4499_v46 = vld [vmem:[%s10951_s16 + $0xa88] sm:$0xff]  ;;  %v4244_v34 = vld [vmem:[%s10951_s16 + $0x290] sm:$0xff]  ;;  %v4253_v17 = vld [vmem:[%s10951_s16 + $0x2d8] sm:$0xff] }
 0x7bb   : > { %7236 = vmatpush1.bf16.msra.mxu0 %v7235_v29  ;;  %v9987_v27 = vmul.f32 0.015625, %v4119_v23  ;;  %v4245_v29 = vld [vmem:[%s10951_s16 + $0x298] sm:$0xff]  ;;  %v4498_v22 = vld [vmem:[%s10951_s16 + $0xa80] sm:$0xff]  ;;  %v4507_v45 = vld [vmem:[%s10951_s16 + $0xac8] sm:$0xff] }
 0x7bc   : > { %7238 = vmatprep.subr.bf16.mxu0 %v7237_v54  ;;  %7124 = vmatpush1.bf16.msra.mxu1 %v7123_v62  ;;  %v4490_v54 = vld [vmem:[%s10951_s16 + $0xa40] sm:$0xff]  ;;  %v4503_v62 = vld [vmem:[%s10951_s16 + $0xaa8] sm:$0xff]  ;;  %v7257_v30 = vpack.c.bf16 %v4249_v59, %v4245_v29  ;;  %v4257_v23 = vld [vmem:[%s10951_s16 + $0x2f8] sm:$0xff] }
 0x7bd   : > { %7126 = vmatprep.subr.bf16.mxu1 %v7125_v10  ;;  %4873 = vmatprep.mubr.f32.mxu1 %v9987_v27  ;;  %v4248_v10 = vld [vmem:[%s10951_s16 + $0x2b0] sm:$0xff]  ;;  %v7143_v8 = vpack.c.bf16 %v4494_v38, %v4490_v54  ;;  %v4502_v4 = vld [vmem:[%s10951_s16 + $0xaa0] sm:$0xff]  ;;  %v4511_v63 = vld [vmem:[%s10951_s16 + $0xae8] sm:$0xff] }
 0x7be   : > { %v4252_v19 = vld [vmem:[%s10951_s16 + $0x2d0] sm:$0xff]  ;;  %v4261_v33 = vld [vmem:[%s10951_s16 + $0x318] sm:$0xff]  ;;  %v7149_v41 = vpack.c.bf16 %v4511_v63, %v4507_v45  ;;  %v4506_v5 = vld [vmem:[%s10951_s16 + $0xac0] sm:$0xff] }
 0x7bf   : > { %7240 = vmatpush1.bf16.msra.mxu0 %v7239_v24  ;;  %v7145_v24 = vpack.c.bf16 %v4503_v62, %v4499_v46  ;;  %v4256_v13 = vld [vmem:[%s10951_s16 + $0x2f0] sm:$0xff]  ;;  %v4265_v48 = vld [vmem:[%s10951_s16 + $0x338] sm:$0xff]  ;;  %v4519_v49 = vld [vmem:[%s10951_s16 + $0xb28] sm:$0xff] }
 0x7c0   : > { %7242 = vmatprep.subr.bf16.mxu0 %v7241_v58  ;;  %7128 = vmatpush1.bf16.msra.mxu1 %v7127_v1  ;;  %v7259_v58 = vpack.c.bf16 %v4248_v10, %v4244_v34  ;;  %v7261_v1 = vpack.c.bf16 %v4257_v23, %v4253_v17  ;;  %v7263_v55 = vpack.c.bf16 %v4256_v13, %v4252_v19  ;;  %v4264_v52 = vld [vmem:[%s10951_s16 + $0x330] sm:$0xff]  ;;  %v4273_v32 = vld [vmem:[%s10951_s16 + $0x378] sm:$0xff]  ;;  %v4514_v28 = vld [vmem:[%s10951_s16 + $0xb00] sm:$0xff] }
 0x7c1   : > { %7130 = vmatprep.subr.bf16.mxu1 %v7129_v51  ;;  %v7147_v51 = vpack.c.bf16 %v4502_v4, %v4498_v22  ;;  %v7265_v9 = vpack.c.bf16 %v4265_v48, %v4261_v33  ;;  %v4518_v42 = vld [vmem:[%s10951_s16 + $0xb20] sm:$0xff]  ;;  %v4523_v37 = vld [vmem:[%s10951_s16 + $0xb48] sm:$0xff]  ;;  %v4268_v44 = vld [vmem:[%s10951_s16 + $0x350] sm:$0xff] }
 0x7c2   : > { %v7155_v11 = vpack.c.bf16 %v4518_v42, %v4514_v28  ;;  %v4281_v0 = vld [vmem:[%s10951_s16 + $0x3b8] sm:$0xff]  ;;  %v4522_v36 = vld [vmem:[%s10951_s16 + $0xb40] sm:$0xff]  ;;  %v4531_v59 = vld [vmem:[%s10951_s16 + $0xb88] sm:$0xff] }
 0x7c3   : > { %7244 = vmatpush1.bf16.msra.mxu0 %v7243_v25  ;;  %v4101_v25 = vrot.slane %v9880_v35, 4  ;;  %v4526_v56 = vld [vmem:[%s10951_s16 + $0xb60] sm:$0xff]  ;;  %v4276_v38 = vld [vmem:[%s10951_s16 + $0x390] sm:$0xff]  ;;  %v4285_v62 = vld [vmem:[%s10951_s16 + $0x3d8] sm:$0xff] }
 0x7c4   : > { %7246 = vmatprep.subr.bf16.mxu0 %v7245_v7  ;;  %7132 = vmatpush1.bf16.msra.mxu1 %v7131_v2  ;;  %v4510_v7 = vld [vmem:[%s10951_s16 + $0xae0] sm:$0xff]  ;;  %v4515_v2 = vld [vmem:[%s10951_s16 + $0xb08] sm:$0xff]  ;;  %v7159_v46 = vpack.c.bf16 %v4526_v56, %v4522_v36  ;;  %v4284_v45 = vld [vmem:[%s10951_s16 + $0x3d0] sm:$0xff] }
 0x7c5   : > { %7134 = vmatprep.subr.bf16.mxu1 %v7133_v43  ;;  %v4260_v43 = vld [vmem:[%s10951_s16 + $0x310] sm:$0xff]  ;;  %v7151_v47 = vpack.c.bf16 %v4510_v7, %v4506_v5  ;;  %v4102_v60 = vadd.f32 %v4101_v25, %v9880_v35  ;;  %v4527_v35 = vld [vmem:[%s10951_s16 + $0xb68] sm:$0xff]  ;;  %v4534_v17 = vld [vmem:[%s10951_s16 + $0xba0] sm:$0xff] }
 0x7c6   : > { %v7267_v20 = vpack.c.bf16 %v4264_v52, %v4260_v43  ;;  %v4543_v22 = vld [vmem:[%s10951_s16 + $0xbe8] sm:$0xff]  ;;  %v4288_v63 = vld [vmem:[%s10951_s16 + $0x3f0] sm:$0xff]  ;;  %v4293_v19 = vld [vmem:[%s10951_s16 + $0x418] sm:$0xff] }
 0x7c7   : > { %7248 = vmatpush1.bf16.msra.mxu0 %v7247_v26  ;;  %v4269_v26 = vld [vmem:[%s10951_s16 + $0x358] sm:$0xff]  ;;  %v4103_v31 = vrot.slane %v4102_v60, 2  ;;  %v4538_v33 = vld [vmem:[%s10951_s16 + $0xbc0] sm:$0xff]  ;;  %v4547_v5 = vld [vmem:[%s10951_s16 + $0xc08] sm:$0xff] }
 0x7c8   : > { %7250 = vmatprep.subr.bf16.mxu0 %v7249_v15  ;;  %7136 = vmatpush1.bf16.msra.mxu1 %v7135_v61  ;;  %v7153_v15 = vpack.c.bf16 %v4519_v49, %v4515_v2  ;;  %v4149_v61 = vadd.f32 %v4148_v57, %v9913_v3  ;;  %v4272_v3 = vld [vmem:[%s10951_s16 + $0x370] sm:$0xff]  ;;  %v4297_v13 = vld [vmem:[%s10951_s16 + $0x438] sm:$0xff]  ;;  %v4542_v48 = vld [vmem:[%s10951_s16 + $0xbe0] sm:$0xff] }
 0x7c9   : > { %7138 = vmatprep.subr.bf16.mxu1 %v7137_v21  ;;  %v7269_v21 = vpack.c.bf16 %v4273_v32, %v4269_v26  ;;  %v7271_v29 = vpack.c.bf16 %v4272_v3, %v4268_v44  ;;  %v4104_v34 = vadd.f32 %v4103_v31, %v4102_v60  ;;  %v4551_v7 = vld [vmem:[%s10951_s16 + $0xc28] sm:$0xff]  ;;  %v4292_v2 = vld [vmem:[%s10951_s16 + $0x410] sm:$0xff]  ;;  %v4301_v43 = vld [vmem:[%s10951_s16 + $0x458] sm:$0xff] }
 0x7ca   : > { %v4296_v49 = vld [vmem:[%s10951_s16 + $0x430] sm:$0xff]  ;;  %v4305_v52 = vld [vmem:[%s10951_s16 + $0x478] sm:$0xff]  ;;  %v7169_v26 = vpack.c.bf16 %v4551_v7, %v4547_v5  ;;  %v4546_v32 = vld [vmem:[%s10951_s16 + $0xc00] sm:$0xff] }
 0x7cb   : > { %7252 = vmatpush1.bf16.msra.mxu0 %v7251_v6  ;;  %v4277_v6 = vld [vmem:[%s10951_s16 + $0x398] sm:$0xff]  ;;  %v4105_v25 = vrot.slane %v4104_v34, 1  ;;  %v4550_v60 = vld [vmem:[%s10951_s16 + $0xc20] sm:$0xff]  ;;  %v7283_v28 = vpack.c.bf16 %v4296_v49, %v4292_v2  ;;  %v4555_v42 = vld [vmem:[%s10951_s16 + $0xc48] sm:$0xff] }
 0x7cc   : > { %7254 = vmatprep.subr.bf16.mxu0 %v7253_v50  ;;  %7140 = vmatpush1.bf16.msra.mxu1 %v7139_v16  ;;  %v7157_v50 = vpack.c.bf16 %v4527_v35, %v4523_v37  ;;  %v4150_v16 = vrot.slane %v4149_v61, 2  ;;  %v7273_v54 = vpack.c.bf16 %v4281_v0, %v4277_v6  ;;  %v4300_v37 = vld [vmem:[%s10951_s16 + $0x450] sm:$0xff]  ;;  %v4309_v44 = vld [vmem:[%s10951_s16 + $0x498] sm:$0xff]  ;;  %v4554_v0 = vld [vmem:[%s10951_s16 + $0xc40] sm:$0xff] }
 0x7cd   : > { %7142 = vmatprep.subr.bf16.mxu1 %v7141_v18  ;;  %v4535_v18 = vld [vmem:[%s10951_s16 + $0xba8] sm:$0xff]  ;;  %v4304_v35 = vld [vmem:[%s10951_s16 + $0x470] sm:$0xff]  ;;  %v4313_v3 = vld [vmem:[%s10951_s16 + $0x4b8] sm:$0xff] }
 0x7ce   : > { %v7161_v10 = vpack.c.bf16 %v4535_v18, %v4531_v59  ;;  %v4151_v4 = vadd.f32 %v4150_v16, %v4149_v61  ;;  %v4559_v61 = vld [vmem:[%s10951_s16 + $0xc68] sm:$0xff]  ;;  %v4558_v31 = vld [vmem:[%s10951_s16 + $0xc60] sm:$0xff]  ;;  %v7287_v36 = vpack.c.bf16 %v4304_v35, %v4300_v37  ;;  %v7289_v16 = vpack.c.bf16 %v4313_v3, %v4309_v44  ;;  %v4317_v18 = vld [vmem:[%s10951_s16 + $0x4d8] sm:$0xff] }
 0x7cf   : > { %7256 = vmatpush1.bf16.msra.mxu0 %v7255_v53  ;;  %v4280_v53 = vld [vmem:[%s10951_s16 + $0x3b0] sm:$0xff]  ;;  %v7173_v6 = vpack.c.bf16 %v4559_v61, %v4555_v42  ;;  %v4563_v56 = vld [vmem:[%s10951_s16 + $0xc88] sm:$0xff]  ;;  %v7175_v59 = vpack.c.bf16 %v4558_v31, %v4554_v0  ;;  %v4578_v7 = vld [vmem:[%s10951_s16 + $0xd00] sm:$0xff] }
 0x7d0   : > { %7258 = vmatprep.subr.bf16.mxu0 %v7257_v30  ;;  %7144 = vmatpush1.bf16.msra.mxu1 %v7143_v8  ;;  %v4289_v30 = vld [vmem:[%s10951_s16 + $0x3f8] sm:$0xff]  ;;  %v4530_v8 = vld [vmem:[%s10951_s16 + $0xb80] sm:$0xff]  ;;  %v7275_v23 = vpack.c.bf16 %v4280_v53, %v4276_v38  ;;  %v4152_v57 = vrot.slane %v4151_v4, 1  ;;  %v4587_v2 = vld [vmem:[%s10951_s16 + $0xd48] sm:$0xff] }
 0x7d1   : > { %7146 = vmatprep.subr.bf16.mxu1 %v7145_v24  ;;  %v4539_v24 = vld [vmem:[%s10951_s16 + $0xbc8] sm:$0xff]  ;;  %v4562_v53 = vld [vmem:[%s10951_s16 + $0xc80] sm:$0xff]  ;;  %v4340_v35 = vld [vmem:[%s10951_s16 + $0x590] sm:$0xff] }
 0x7d2   : > { %v4591_v49 = vld [vmem:[%s10951_s16 + $0xd68] sm:$0xff]  ;;  %v4349_v3 = vld [vmem:[%s10951_s16 + $0x5d8] sm:$0xff]  ;;  %v4594_v31 = vld [vmem:[%s10951_s16 + $0xd80] sm:$0xff] }
 0x7d3   : > { %7260 = vmatpush1.bf16.msra.mxu0 %v7259_v58  ;;  %v7277_v58 = vpack.c.bf16 %v4289_v30, %v4285_v62  ;;  %v4571_v30 = vld [vmem:[%s10951_s16 + $0xcc8] sm:$0xff] }
 0x7d4   : > { %7262 = vmatprep.subr.bf16.mxu0 %v7261_v1  ;;  %7148 = vmatpush1.bf16.msra.mxu1 %v7147_v51  ;;  %v7163_v1 = vpack.c.bf16 %v4534_v17, %v4530_v8  ;;  %v7165_v51 = vpack.c.bf16 %v4543_v22, %v4539_v24  ;;  %v4316_v8 = vld [vmem:[%s10951_s16 + $0x4d0] sm:$0xff]  ;;  %v4325_v24 = vld [vmem:[%s10951_s16 + $0x518] sm:$0xff]  ;;  %v4595_v61 = vld [vmem:[%s10951_s16 + $0xd88] sm:$0xff] }
 0x7d5   : > { %7150 = vmatprep.subr.bf16.mxu1 %v7149_v41  ;;  %v7279_v41 = vpack.c.bf16 %v4288_v63, %v4284_v45  ;;  %v4320_v17 = vld [vmem:[%s10951_s16 + $0x4f0] sm:$0xff]  ;;  %v4329_v22 = vld [vmem:[%s10951_s16 + $0x538] sm:$0xff]  ;;  %v4574_v45 = vld [vmem:[%s10951_s16 + $0xce0] sm:$0xff] }
 0x7d6   : > { %v7295_v63 = vpack.c.bf16 %v4320_v17, %v4316_v8  ;;  %v4615_v8 = vld [vmem:[%s10951_s16 + $0xe28] sm:$0xff] }
 0x7d7   : > { %7264 = vmatpush1.bf16.msra.mxu0 %v7263_v55  ;;  %v7281_v55 = vpack.c.bf16 %v4297_v13, %v4293_v19  ;;  %v4583_v19 = vld [vmem:[%s10951_s16 + $0xd28] sm:$0xff]  ;;  %v7297_v13 = vpack.c.bf16 %v4329_v22, %v4325_v24  ;;  %v4360_v24 = vld [vmem:[%s10951_s16 + $0x630] sm:$0xff] }
 0x7d8   : > { %7266 = vmatprep.subr.bf16.mxu0 %v7265_v9  ;;  %7152 = vmatpush1.bf16.msra.mxu1 %v7151_v47  ;;  %v7167_v9 = vpack.c.bf16 %v4542_v48, %v4538_v33  ;;  %v4106_v47 = vadd.f32 %v4105_v25, %v4104_v34  ;;  %v4575_v34 = vld [vmem:[%s10951_s16 + $0xce8] sm:$0xff]  ;;  %v4328_v33 = vld [vmem:[%s10951_s16 + $0x530] sm:$0xff]  ;;  %v4333_v25 = vld [vmem:[%s10951_s16 + $0x558] sm:$0xff] }
 0x7d9   : > { %7154 = vmatprep.subr.bf16.mxu1 %v7153_v15  ;;  %v4153_v15 = vadd.f32 %v4152_v57, %v4151_v4  ;;  %v7181_v4 = vpack.c.bf16 %v4575_v34, %v4571_v30  ;;  %v4582_v57 = vld [vmem:[%s10951_s16 + $0xd20] sm:$0xff] }
 0x7da   : > { %v4606_v30 = vld [vmem:[%s10951_s16 + $0xde0] sm:$0xff] }
 0x7db   : > { %7268 = vmatpush1.bf16.msra.mxu0 %v7267_v20  ;;  %v7285_v20 = vpack.c.bf16 %v4305_v52, %v4301_v43  ;;  %v4332_v43 = vld [vmem:[%s10951_s16 + $0x550] sm:$0xff] }
 0x7dc   : > { %7270 = vmatprep.subr.bf16.mxu0 %v7269_v21  ;;  %7156 = vmatpush1.bf16.msra.mxu1 %v7155_v11  ;;  %v7171_v21 = vpack.c.bf16 %v4550_v60, %v4546_v32  ;;  %v10264_v11 = vmul.f32 0.015625, %v4106_v47  ;;  %v4336_v52 = vld [vmem:[%s10951_s16 + $0x570] sm:$0xff]  ;;  %v7187_v47 = vpack.c.bf16 %v4582_v57, %v4578_v7  ;;  %v4345_v32 = vld [vmem:[%s10951_s16 + $0x5b8] sm:$0xff]  ;;  %v7189_v60 = vpack.c.bf16 %v4591_v49, %v4587_v2  ;;  %v4618_v2 = vld [vmem:[%s10951_s16 + $0xe40] sm:$0xff] }
 0x7dd   : > { %7158 = vmatprep.subr.bf16.mxu1 %v7157_v50  ;;  %v10273_v50 = vmul.f32 0.015625, %v4153_v15  ;;  %v4586_v15 = vld [vmem:[%s10951_s16 + $0xd40] sm:$0xff]  ;;  %v7303_v42 = vpack.c.bf16 %v4336_v52, %v4332_v43  ;;  %v4377_v7 = vld [vmem:[%s10951_s16 + $0x6b8] sm:$0xff]  ;;  %v4627_v43 = vld [vmem:[%s10951_s16 + $0xe88] sm:$0xff] }
 0x7de   : > { %v4622_v49 = vld [vmem:[%s10951_s16 + $0xe60] sm:$0xff]  ;;  %v4631_v52 = vld [vmem:[%s10951_s16 + $0xea8] sm:$0xff] }
 0x7df   : > { %7272 = vmatpush1.bf16.msra.mxu0 %v7271_v29  ;;  %v4308_v29 = vld [vmem:[%s10951_s16 + $0x490] sm:$0xff] }
 0x7e0   : > { %7274 = vmatprep.subr.bf16.mxu0 %v7273_v54  ;;  %7160 = vmatpush1.bf16.msra.mxu1 %v7159_v46  ;;  %v4321_v54 = vld [vmem:[%s10951_s16 + $0x4f8] sm:$0xff]  ;;  %v4566_v46 = vld [vmem:[%s10951_s16 + $0xca0] sm:$0xff] }
 0x7e1   : > { %7162 = vmatprep.subr.bf16.mxu1 %v7161_v10  ;;  %v7293_v10 = vpack.c.bf16 %v4321_v54, %v4317_v18  ;;  %v4357_v54 = vld [vmem:[%s10951_s16 + $0x618] sm:$0xff] }
 0x7e3   : > { %7276 = vmatpush1.bf16.msra.mxu0 %v7275_v23  ;;  %v7179_v23 = vpack.c.bf16 %v4566_v46, %v4562_v53  ;;  %v4127_v53 = vrot.slane %v9889_v14, 4 }
 0x7e4   : > { %7278 = vmatprep.subr.bf16.mxu0 %v7277_v58  ;;  %7164 = vmatpush1.bf16.msra.mxu1 %v7163_v1  ;;  %v4570_v58 = vld [vmem:[%s10951_s16 + $0xcc0] sm:$0xff]  ;;  %v4579_v1 = vld [vmem:[%s10951_s16 + $0xd08] sm:$0xff] }
 0x7e5   : > { %7166 = vmatprep.subr.bf16.mxu1 %v7165_v51  ;;  %v4324_v51 = vld [vmem:[%s10951_s16 + $0x510] sm:$0xff]  ;;  %v7183_v48 = vpack.c.bf16 %v4574_v45, %v4570_v58  ;;  %v7185_v5 = vpack.c.bf16 %v4583_v19, %v4579_v1  ;;  %v4369_v58 = vld [vmem:[%s10951_s16 + $0x678] sm:$0xff]  ;;  %v4128_v45 = vadd.f32 %v4127_v53, %v9889_v14  ;;  %v4610_v1 = vld [vmem:[%s10951_s16 + $0xe00] sm:$0xff] }
 0x7e6   : > { %v4614_v19 = vld [vmem:[%s10951_s16 + $0xe20] sm:$0xff]  ;;  %v4623_v14 = vld [vmem:[%s10951_s16 + $0xe68] sm:$0xff] }
 0x7e7   : > { %7280 = vmatpush1.bf16.msra.mxu0 %v7279_v41  ;;  %v4337_v41 = vld [vmem:[%s10951_s16 + $0x578] sm:$0xff]  ;;  %v4129_v57 = vrot.slane %v4128_v45, 2 }
 0x7e8   : > { %7282 = vmatprep.subr.bf16.mxu0 %v7281_v55  ;;  %7168 = vmatpush1.bf16.msra.mxu1 %v7167_v9  ;;  %v7299_v55 = vpack.c.bf16 %v4328_v33, %v4324_v51  ;;  %v7301_v9 = vpack.c.bf16 %v4337_v41, %v4333_v25  ;;  %v4619_v51 = vld [vmem:[%s10951_s16 + $0xe48] sm:$0xff]  ;;  %v4368_v25 = vld [vmem:[%s10951_s16 + $0x670] sm:$0xff]  ;;  %v7203_v41 = vpack.c.bf16 %v4614_v19, %v4610_v1  ;;  %v5239_v1 = vld [vmem:[#allocation2] sm:$0xff] }
 0x7e9   : > { %7170 = vmatprep.subr.bf16.mxu1 %v7169_v26  ;;  %v4341_v26 = vld [vmem:[%s10951_s16 + $0x598] sm:$0xff] }
 0x7ea   : > { %5016 = vmatmul.mubr.f32.vlgmr.msra.gmra.mrb[140].mxu0 %v9767_v12  ;;  %v4567_v12 = vld [vmem:[%s10951_s16 + $0xca8] sm:$0xff]  ;;  %v7305_v37 = vpack.c.bf16 %v4345_v32, %v4341_v26  ;;  %v4372_v26 = vld [vmem:[%s10951_s16 + $0x690] sm:$0xff] }
 0x7eb   : > { %7284 = vmatpush1.bf16.msra.mxu0 %v7283_v28  ;;  %5086 = vmatprep.mubr.f32.mxu0 %v9841_v39  ;;  %v4312_v39 = vld [vmem:[%s10951_s16 + $0x4b0] sm:$0xff]  ;;  %v7177_v38 = vpack.c.bf16 %v4567_v12, %v4563_v56  ;;  %v4590_v28 = vld [vmem:[%s10951_s16 + $0xd60] sm:$0xff]  ;;  %v4603_v12 = vld [vmem:[%s10951_s16 + $0xdc8] sm:$0xff] }
 0x7ec   : > { %4874 = vmatmul.mubr.f32.vlgmr.msra.gmra.mrb[146].mxu1 %v10264_v11  ;;  %7286 = vmatprep.subr.bf16.mxu0 %v7285_v20  ;;  %v7291_v62 = vpack.c.bf16 %v4312_v39, %v4308_v29  ;;  %v4599_v20 = vld [vmem:[%s10951_s16 + $0xda8] sm:$0xff]  ;;  %v7191_v44 = vpack.c.bf16 %v4590_v28, %v4586_v15  ;;  %v4348_v39 = vld [vmem:[%s10951_s16 + $0x5d0] sm:$0xff]  ;;  %v4381_v15 = vld [vmem:[%s10951_s16 + $0x6d8] sm:$0xff] }
 0x7ed   : > { %7172 = vmatpush1.bf16.msra.mxu1 %v7171_v21  ;;  %5859 = vmatprep.mubr.msk.f32.mxu1 %vm2837_vm6, %v10273_v50  ;;  %v4344_v21 = vld [vmem:[%s10951_s16 + $0x5b0] sm:$0xff]  ;;  %v7193_v0 = vpack.c.bf16 %v4599_v20, %v4595_v61  ;;  %v4385_v28 = vld [vmem:[%s10951_s16 + $0x6f8] sm:$0xff]  ;;  %v7209_v61 = vpack.c.bf16 %v4631_v52, %v4627_v43  ;;  %v4626_v20 = vld [vmem:[%s10951_s16 + $0xe80] sm:$0xff] }
 0x7ee   : > { %7174 = vmatprep.subr.bf16.mxu1 %v7173_v6  ;;  %v4353_v6 = vld [vmem:[%s10951_s16 + $0x5f8] sm:$0xff]  ;;  %v7307_v56 = vpack.c.bf16 %v4344_v21, %v4340_v35  ;;  %v4376_v32 = vld [vmem:[%s10951_s16 + $0x6b0] sm:$0xff]  ;;  %v4635_v21 = vld [vmem:[%s10951_s16 + $0xec8] sm:$0xff] }
 0x7ef   : > { %7288 = vmatpush1.bf16.msra.mxu0 %v7287_v36  ;;  %v4598_v36 = vld [vmem:[%s10951_s16 + $0xda0] sm:$0xff]  ;;  %v7309_v29 = vpack.c.bf16 %v4353_v6, %v4349_v3  ;;  %v7323_v35 = vpack.c.bf16 %v4376_v32, %v4372_v26  ;;  %v7325_v3 = vpack.c.bf16 %v4385_v28, %v4381_v15  ;;  %v4380_v6 = vld [vmem:[%s10951_s16 + $0x6d0] sm:$0xff]  ;;  %v5252_v28 = vld [vmem:[#allocation2 + $0x68] sm:$0xff] }
 0x7f0   : > { %7290 = vmatprep.subr.bf16.mxu0 %v7289_v16  ;;  %v4607_v16 = vld [vmem:[%s10951_s16 + $0xde8] sm:$0xff]  ;;  %v7195_v18 = vpack.c.bf16 %v4598_v36, %v4594_v31  ;;  %v4389_v36 = vld [vmem:[%s10951_s16 + $0x718] sm:$0xff]  ;;  %v4412_v52 = vld [vmem:[%s10951_s16 + $0x7d0] sm:$0xff] }
 0x7f1   : > { %7176 = vmatpush1.bf16.msra.mxu1 %v7175_v59  ;;  %v4352_v59 = vld [vmem:[%s10951_s16 + $0x5f0] sm:$0xff]  ;;  %v7197_v46 = vpack.c.bf16 %v4607_v16, %v4603_v12  ;;  %v4634_v16 = vld [vmem:[%s10951_s16 + $0xec0] sm:$0xff] }
 0x7f2   : > { %7178 = vmatprep.subr.bf16.mxu1 %v7177_v38  ;;  %v4361_v38 = vld [vmem:[%s10951_s16 + $0x638] sm:$0xff]  ;;  %v7311_v34 = vpack.c.bf16 %v4352_v59, %v4348_v39  ;;  %v5247_v26 = vld [vmem:[#allocation2 + $0x40] sm:$0xff]  ;;  %v5249_v32 = vld [vmem:[#allocation2 + $0x50] sm:$0xff] }
 0x7f3   : > { %7292 = vmatpush1.bf16.msra.mxu0 %v7291_v62  ;;  %v4602_v62 = vld [vmem:[%s10951_s16 + $0xdc0] sm:$0xff]  ;;  %v7313_v17 = vpack.c.bf16 %v4361_v38, %v4357_v54  ;;  %v4388_v54 = vld [vmem:[%s10951_s16 + $0x710] sm:$0xff] }
 0x7f4   : > { %7294 = vmatprep.subr.bf16.mxu0 %v7293_v10  ;;  %v4611_v10 = vld [vmem:[%s10951_s16 + $0xe08] sm:$0xff]  ;;  %v7199_v22 = vpack.c.bf16 %v4606_v30, %v4602_v62  ;;  %v4392_v38 = vld [vmem:[%s10951_s16 + $0x730] sm:$0xff]  ;;  %v4401_v62 = vld [vmem:[%s10951_s16 + $0x778] sm:$0xff] }
 0x7f5   : > { %7180 = vmatpush1.bf16.msra.mxu1 %v7179_v23  ;;  %v4356_v23 = vld [vmem:[%s10951_s16 + $0x610] sm:$0xff] }
 0x7f6   : > { %7182 = vmatprep.subr.bf16.mxu1 %v7181_v4  ;;  %v4365_v4 = vld [vmem:[%s10951_s16 + $0x658] sm:$0xff]  ;;  %v4416_v15 = vld [vmem:[%s10951_s16 + $0x7f0] sm:$0xff] }
 0x7f7   : > { %7296 = vmatpush1.bf16.msra.mxu0 %v7295_v63  ;;  %v7201_v63 = vpack.c.bf16 %v4615_v8, %v4611_v10  ;;  %v7317_v33 = vpack.c.bf16 %v4369_v58, %v4365_v4  ;;  %v4396_v8 = vld [vmem:[%s10951_s16 + $0x750] sm:$0xff] }
 0x7f8   : > { %7298 = vmatprep.subr.bf16.mxu0 %v7297_v13  ;;  %v7315_v13 = vpack.c.bf16 %v4360_v24, %v4356_v23  ;;  %v4405_v23 = vld [vmem:[%s10951_s16 + $0x798] sm:$0xff]  ;;  %v4404_v4 = vld [vmem:[%s10951_s16 + $0x790] sm:$0xff] }
 0x7f9   : > { %7184 = vmatpush1.bf16.msra.mxu1 %v7183_v48  ;;  %v4364_v48 = vld [vmem:[%s10951_s16 + $0x650] sm:$0xff]  ;;  %v4409_v24 = vld [vmem:[%s10951_s16 + $0x7b8] sm:$0xff] }
 0x7fa   : > { %7186 = vmatprep.subr.bf16.mxu1 %v7185_v5  ;;  %v4373_v5 = vld [vmem:[%s10951_s16 + $0x698] sm:$0xff]  ;;  %v4408_v58 = vld [vmem:[%s10951_s16 + $0x7b0] sm:$0xff] }
 0x7fb   : > { %7300 = vmatpush1.bf16.msra.mxu0 %v7299_v55  ;;  %v7205_v55 = vpack.c.bf16 %v4623_v14, %v4619_v51  ;;  %v5241_v51 = vld [vmem:[#allocation2 + $0x10] sm:$0xff]  ;;  %v5244_v14 = vld [vmem:[#allocation2 + $0x28] sm:$0xff]  ;;  %v7339_v43 = vpack.c.bf16 %v4408_v58, %v4404_v4  ;;  %v5259_v4 = vld [vmem:[#allocation2 + $0xa0] sm:$0xff] }
 0x7fc   : > { %7302 = vmatprep.subr.bf16.mxu0 %v7301_v9  ;;  %v7319_v9 = vpack.c.bf16 %v4368_v25, %v4364_v48  ;;  %v7337_v48 = vpack.c.bf16 %v4409_v24, %v4405_v23  ;;  %v7459_v25 = vpack.c.bf16 %v5241_v51, %v5239_v1  ;;  %v4436_v23 = vld [vmem:[%s10951_s16 + $0x890] sm:$0xff]  ;;  %v5266_v1 = vld [vmem:[#allocation2 + $0xd8] sm:$0xff] }
 0x7fd   : > { %7188 = vmatpush1.bf16.msra.mxu1 %v7187_v47  ;;  %v7321_v47 = vpack.c.bf16 %v4377_v7, %v4373_v5  ;;  %v5243_v5 = vld [vmem:[#allocation2 + $0x20] sm:$0xff]  ;;  %v5245_v7 = vld [vmem:[#allocation2 + $0x30] sm:$0xff] }
 0x7fe   : > { %7190 = vmatprep.subr.bf16.mxu1 %v7189_v60  ;;  %v7207_v60 = vpack.c.bf16 %v4622_v49, %v4618_v2  ;;  %v4417_v2 = vld [vmem:[%s10951_s16 + $0x7f8] sm:$0xff]  ;;  %v5261_v58 = vld [vmem:[#allocation2 + $0xb0] sm:$0xff] }
 0x7ff   : > { %7304 = vmatpush1.bf16.msra.mxu0 %v7303_v42  ;;  %v4130_v42 = vadd.f32 %v4129_v57, %v4128_v45  ;;  %v5240_v45 = vld [vmem:[#allocation2 + $0x8] sm:$0xff]  ;;  %v5250_v49 = vld [vmem:[#allocation2 + $0x58] sm:$0xff] }
 0x800   : > { %7306 = vmatprep.subr.bf16.mxu0 %v7305_v37  ;;  %v4630_v37 = vld [vmem:[%s10951_s16 + $0xea0] sm:$0xff]  ;;  %v5248_v57 = vld [vmem:[#allocation2 + $0x48] sm:$0xff] }
 0x801   : > { %7192 = vmatpush1.bf16.msra.mxu1 %v7191_v44  ;;  %v4639_v44 = vld [vmem:[%s10951_s16 + $0xee8] sm:$0xff]  ;;  %v7211_v31 = vpack.c.bf16 %v4630_v37, %v4626_v20  ;;  %v4131_v39 = vrot.slane %v4130_v42, 1  ;;  %v4425_v20 = vld [vmem:[%s10951_s16 + $0x838] sm:$0xff]  ;;  %v7467_v37 = vpack.c.bf16 %v5249_v32, %v5247_v26  ;;  %v5269_v26 = vld [vmem:[#allocation2 + $0xf0] sm:$0xff] }
 0x802   : > { %7194 = vmatprep.subr.bf16.mxu1 %v7193_v0  ;;  %v4384_v0 = vld [vmem:[%s10951_s16 + $0x6f0] sm:$0xff]  ;;  %v7213_v12 = vpack.c.bf16 %v4639_v44, %v4635_v21  ;;  %v5251_v44 = vld [vmem:[#allocation2 + $0x60] sm:$0xff] }
 0x803   : > { %7308 = vmatpush1.bf16.msra.mxu0 %v7307_v56  ;;  %v4393_v56 = vld [vmem:[%s10951_s16 + $0x738] sm:$0xff]  ;;  %v7327_v59 = vpack.c.bf16 %v4384_v0, %v4380_v6  ;;  %v4132_v30 = vadd.f32 %v4131_v39, %v4130_v42  ;;  %v4420_v0 = vld [vmem:[%s10951_s16 + $0x810] sm:$0xff] }
 0x804   : > { %7310 = vmatprep.subr.bf16.mxu0 %v7309_v29  ;;  %v4638_v29 = vld [vmem:[%s10951_s16 + $0xee0] sm:$0xff]  ;;  %v5254_v42 = vld [vmem:[#allocation2 + $0x78] sm:$0xff] }
 0x805   : > { %7196 = vmatpush1.bf16.msra.mxu1 %v7195_v18  ;;  %v7329_v18 = vpack.c.bf16 %v4393_v56, %v4389_v36  ;;  %v7215_v53 = vpack.c.bf16 %v4638_v29, %v4634_v16  ;;  %v7469_v21 = vpack.c.bf16 %v5254_v42, %v5252_v28  ;;  %v4429_v36 = vld [vmem:[%s10951_s16 + $0x858] sm:$0xff] }
 0x806   : > { %7198 = vmatprep.subr.bf16.mxu1 %v7197_v46  ;;  %v4397_v46 = vld [vmem:[%s10951_s16 + $0x758] sm:$0xff] }
 0x807   : > { %7312 = vmatpush1.bf16.msra.mxu0 %v7311_v34  ;;  %v7331_v34 = vpack.c.bf16 %v4392_v38, %v4388_v54  ;;  %v7333_v10 = vpack.c.bf16 %v4401_v62, %v4397_v46  ;;  %v4433_v56 = vld [vmem:[%s10951_s16 + $0x878] sm:$0xff]  ;;  %v5257_v54 = vld [vmem:[#allocation2 + $0x90] sm:$0xff]  ;;  %v5260_v62 = vld [vmem:[#allocation2 + $0xa8] sm:$0xff] }
 0x808   : > { %7314 = vmatprep.subr.bf16.mxu0 %v7313_v17  ;;  %v4400_v17 = vld [vmem:[%s10951_s16 + $0x770] sm:$0xff]  ;;  %v5258_v16 = vld [vmem:[#allocation2 + $0x98] sm:$0xff]  ;;  %v7349_v38 = vpack.c.bf16 %v4433_v56, %v4429_v36 }
 0x809   : > { %7200 = vmatpush1.bf16.msra.mxu1 %v7199_v22  ;;  %v10545_v22 = vmul.f32 0.015625, %v4132_v30  ;;  %v7335_v19 = vpack.c.bf16 %v4400_v17, %v4396_v8  ;;  %v5262_v30 = vld [vmem:[#allocation2 + $0xb8] sm:$0xff] }
 0x80a   : > { %7202 = vmatprep.subr.bf16.mxu1 %v7201_v63  ;;  %v5242_v63 = vld [vmem:[#allocation2 + $0x18] sm:$0xff]  ;;  %v7477_v24 = vpack.c.bf16 %v5262_v30, %v5260_v62 }
 0x80b   : > { %7316 = vmatpush1.bf16.msra.mxu0 %v7315_v13  ;;  %v7457_v13 = vpack.c.bf16 %v5242_v63, %v5240_v45  ;;  %v4440_v63 = vld [vmem:[%s10951_s16 + $0x8b0] sm:$0xff]  ;;  %v5274_v28 = vld [vmem:[#allocation2 + $0x118] sm:$0xff] }
 0x80c   : > { %7318 = vmatprep.subr.bf16.mxu0 %v7317_v33  ;;  %v5246_v33 = vld [vmem:[#allocation2 + $0x38] sm:$0xff]  ;;  %v7355_v51 = vpack.c.bf16 %v4440_v63, %v4436_v23  ;;  %v5284_v63 = vld [vmem:[#allocation2 + $0x168] sm:$0xff] }
 0x80d   : > { %7204 = vmatpush1.bf16.msra.mxu1 %v7203_v41  ;;  %v7461_v41 = vpack.c.bf16 %v5246_v33, %v5244_v14  ;;  %v4444_v14 = vld [vmem:[%s10951_s16 + $0x8d0] sm:$0xff]  ;;  %v4461_v42 = vld [vmem:[%s10951_s16 + $0x958] sm:$0xff] }
 0x80e   : > { %7206 = vmatprep.subr.bf16.mxu1 %v7205_v55  ;;  %v4413_v55 = vld [vmem:[%s10951_s16 + $0x7d8] sm:$0xff] }
 0x80f   : > { %7320 = vmatpush1.bf16.msra.mxu0 %v7319_v9  ;;  %v7463_v9 = vpack.c.bf16 %v5245_v7, %v5243_v5  ;;  %v4448_v5 = vld [vmem:[%s10951_s16 + $0x8f0] sm:$0xff]  ;;  %v5268_v7 = vld [vmem:[#allocation2 + $0xe8] sm:$0xff]  ;;  %v5278_v36 = vld [vmem:[#allocation2 + $0x138] sm:$0xff] }
 0x810   : > { %7322 = vmatprep.subr.bf16.mxu0 %v7321_v47  ;;  %v7465_v47 = vpack.c.bf16 %v5250_v49, %v5248_v57  ;;  %v5270_v57 = vld [vmem:[#allocation2 + $0xf8] sm:$0xff] }
 0x811   : > { %7208 = vmatpush1.bf16.msra.mxu1 %v7207_v60  ;;  %v7341_v60 = vpack.c.bf16 %v4417_v2, %v4413_v55  ;;  %v4453_v55 = vld [vmem:[%s10951_s16 + $0x918] sm:$0xff] }
 0x812   : > { %7210 = vmatprep.subr.bf16.mxu1 %v7209_v61  ;;  %v4421_v61 = vld [vmem:[%s10951_s16 + $0x818] sm:$0xff] }
 0x813   : > { %7324 = vmatpush1.bf16.msra.mxu0 %v7323_v35  ;;  %v7343_v35 = vpack.c.bf16 %v4416_v15, %v4412_v52  ;;  %v7345_v6 = vpack.c.bf16 %v4425_v20, %v4421_v61  ;;  %v4457_v2 = vld [vmem:[%s10951_s16 + $0x938] sm:$0xff]  ;;  %v7485_v52 = vpack.c.bf16 %v5270_v57, %v5268_v7  ;;  %v5272_v15 = vld [vmem:[#allocation2 + $0x108] sm:$0xff] }
 0x814   : > { %7326 = vmatprep.subr.bf16.mxu0 %v7325_v3  ;;  %v5253_v3 = vld [vmem:[#allocation2 + $0x70] sm:$0xff]  ;;  %v7361_v32 = vpack.c.bf16 %v4457_v2, %v4453_v55  ;;  %v4465_v61 = vld [vmem:[%s10951_s16 + $0x978] sm:$0xff] }
 0x815   : > { %7212 = vmatpush1.bf16.msra.mxu1 %v7211_v31  ;;  %v4424_v31 = vld [vmem:[%s10951_s16 + $0x830] sm:$0xff]  ;;  %v7471_v29 = vpack.c.bf16 %v5253_v3, %v5251_v44  ;;  %v5271_v44 = vld [vmem:[#allocation2 + $0x100] sm:$0xff]  ;;  %v4469_v56 = vld [vmem:[%s10951_s16 + $0x998] sm:$0xff] }
 0x816   : > { %7214 = vmatprep.subr.bf16.mxu1 %v7213_v12  ;;  %v5256_v12 = vld [vmem:[#allocation2 + $0x88] sm:$0xff]  ;;  %v7347_v39 = vpack.c.bf16 %v4424_v31, %v4420_v0  ;;  %v5273_v3 = vld [vmem:[#allocation2 + $0x110] sm:$0xff]  ;;  %v5282_v62 = vld [vmem:[#allocation2 + $0x158] sm:$0xff] }
 0x817   : > { %7328 = vmatpush1.bf16.msra.mxu0 %v7327_v59  ;;  %v4428_v59 = vld [vmem:[%s10951_s16 + $0x850] sm:$0xff]  ;;  %v7473_v46 = vpack.c.bf16 %v5258_v16, %v5256_v12  ;;  %v5276_v31 = vld [vmem:[#allocation2 + $0x128] sm:$0xff]  ;;  %v4473_v12 = vld [vmem:[%s10951_s16 + $0x9b8] sm:$0xff]  ;;  %v7491_v16 = vpack.c.bf16 %v5273_v3, %v5271_v44 }
 0x818   : > { %7330 = vmatprep.subr.bf16.mxu0 %v7329_v18  ;;  %v5255_v18 = vld [vmem:[#allocation2 + $0x80] sm:$0xff]  ;;  %v4464_v0 = vld [vmem:[%s10951_s16 + $0x970] sm:$0xff]  ;;  %v4477_v30 = vld [vmem:[%s10951_s16 + $0x9d8] sm:$0xff] }
 0x819   : > { %7216 = vmatpush1.bf16.msra.mxu1 %v7215_v53  ;;  %v4432_v53 = vld [vmem:[%s10951_s16 + $0x870] sm:$0xff]  ;;  %v7475_v8 = vpack.c.bf16 %v5257_v54, %v5255_v18  ;;  %v5275_v18 = vld [vmem:[#allocation2 + $0x120] sm:$0xff]  ;;  %v5290_v7 = vld [vmem:[#allocation2 + $0x198] sm:$0xff] }
 0x81a   : > { %7458 = vmatprep.subr.bf16.mxu1 %v7457_v13  ;;  %v7351_v17 = vpack.c.bf16 %v4432_v53, %v4428_v59  ;;  %v7479_v13 = vpack.c.bf16 %v5261_v58, %v5259_v4  ;;  %v7493_v59 = vpack.c.bf16 %v5278_v36, %v5276_v31  ;;  %v5277_v54 = vld [vmem:[#allocation2 + $0x130] sm:$0xff]  ;;  %v4493_v57 = vld [vmem:[%s10951_s16 + $0xa58] sm:$0xff] }
 0x81b   : > { %7332 = vmatpush1.bf16.msra.mxu0 %v7331_v34  ;;  %v4437_v34 = vld [vmem:[%s10951_s16 + $0x898] sm:$0xff]  ;;  %v4472_v53 = vld [vmem:[%s10951_s16 + $0x9b0] sm:$0xff] }
 0x81c   : > { %4945 = vmatmul.mubr.f32.vlgmr.msra.gmra.mrb[146].mxu1 %v10545_v22  ;;  %7334 = vmatprep.subr.bf16.mxu0 %v7333_v10  ;;  %v4441_v10 = vld [vmem:[%s10951_s16 + $0x8b8] sm:$0xff]  ;;  %v5281_v4 = vld [vmem:[#allocation2 + $0x150] sm:$0xff] }
 0x81d   : > { %7460 = vmatpush1.bf16.msra.mxu1 %v7459_v25  ;;  %v7353_v45 = vpack.c.bf16 %v4441_v10, %v4437_v34  ;;  %v5265_v25 = vld [vmem:[#allocation2 + $0xd0] sm:$0xff]  ;;  %v4481_v34 = vld [vmem:[%s10951_s16 + $0x9f8] sm:$0xff]  ;;  %v7495_v10 = vpack.c.bf16 %v5277_v54, %v5275_v18 }
 0x81e   : > { %7462 = vmatprep.subr.bf16.mxu1 %v7461_v41  ;;  %v7373_v58 = vpack.c.bf16 %v4481_v34, %v4477_v30  ;;  %v4497_v55 = vld [vmem:[%s10951_s16 + $0xa78] sm:$0xff]  ;;  %v5293_v44 = vld [vmem:[#allocation2 + $0x1b0] sm:$0xff] }
 0x81f   : > { %7336 = vmatpush1.bf16.msra.mxu0 %v7335_v19  ;;  %v4449_v19 = vld [vmem:[%s10951_s16 + $0x8f8] sm:$0xff]  ;;  %v4512_v18 = vld [vmem:[%s10951_s16 + $0xaf0] sm:$0xff] }
 0x820   : > { %7338 = vmatprep.subr.bf16.mxu0 %v7337_v48  ;;  %v5263_v48 = vld [vmem:[#allocation2 + $0xc0] sm:$0xff]  ;;  %v5298_v31 = vld [vmem:[#allocation2 + $0x1d8] sm:$0xff]  ;;  %v4520_v30 = vld [vmem:[%s10951_s16 + $0xb30] sm:$0xff] }
 0x821   : > { %7464 = vmatpush1.bf16.msra.mxu1 %v7463_v9  ;;  %v7483_v49 = vpack.c.bf16 %v5265_v25, %v5263_v48  ;;  %v7359_v9 = vpack.c.bf16 %v4448_v5, %v4444_v14  ;;  %v5285_v48 = vld [vmem:[#allocation2 + $0x170] sm:$0xff]  ;;  %v5288_v5 = vld [vmem:[#allocation2 + $0x188] sm:$0xff]  ;;  %v4509_v36 = vld [vmem:[%s10951_s16 + $0xad8] sm:$0xff] }
 0x822   : > { %7466 = vmatprep.subr.bf16.mxu1 %v7465_v47  ;;  %v5267_v47 = vld [vmem:[#allocation2 + $0xe0] sm:$0xff]  ;;  %v4517_v54 = vld [vmem:[%s10951_s16 + $0xb18] sm:$0xff] }
 0x823   : > { %7340 = vmatpush1.bf16.msra.mxu0 %v7339_v43  ;;  %v4452_v43 = vld [vmem:[%s10951_s16 + $0x910] sm:$0xff]  ;;  %v7487_v20 = vpack.c.bf16 %v5269_v26, %v5267_v47  ;;  %v7381_v26 = vpack.c.bf16 %v4497_v55, %v4493_v57  ;;  %v4525_v34 = vld [vmem:[%s10951_s16 + $0xb58] sm:$0xff] }
 0x824   : > { %7342 = vmatprep.subr.bf16.mxu0 %v7341_v60  ;;  %v4456_v60 = vld [vmem:[%s10951_s16 + $0x930] sm:$0xff]  ;;  %v4557_v55 = vld [vmem:[%s10951_s16 + $0xc58] sm:$0xff] }
 0x825   : > { %7468 = vmatpush1.bf16.msra.mxu1 %v7467_v37  ;;  %v7363_v37 = vpack.c.bf16 %v4456_v60, %v4452_v43  ;;  %v7505_v43 = vpack.c.bf16 %v5290_v7, %v5288_v5  ;;  %v5289_v47 = vld [vmem:[#allocation2 + $0x190] sm:$0xff]  ;;  %v5292_v60 = vld [vmem:[#allocation2 + $0x1a8] sm:$0xff] }
 0x826   : > { %7470 = vmatprep.subr.bf16.mxu1 %v7469_v21  ;;  %v7489_v21 = vpack.c.bf16 %v5274_v28, %v5272_v15  ;;  %v5294_v15 = vld [vmem:[#allocation2 + $0x1b8] sm:$0xff]  ;;  %v4548_v7 = vld [vmem:[%s10951_s16 + $0xc10] sm:$0xff] }
 0x827   : > { %7344 = vmatpush1.bf16.msra.mxu0 %v7343_v35  ;;  %v4460_v35 = vld [vmem:[%s10951_s16 + $0x950] sm:$0xff]  ;;  %v4501_v28 = vld [vmem:[%s10951_s16 + $0xa98] sm:$0xff] }
 0x828   : > { %7346 = vmatprep.subr.bf16.mxu0 %v7345_v6  ;;  %v7365_v6 = vpack.c.bf16 %v4465_v61, %v4461_v42  ;;  %v4505_v42 = vld [vmem:[%s10951_s16 + $0xab8] sm:$0xff]  ;;  %v4552_v57 = vld [vmem:[%s10951_s16 + $0xc30] sm:$0xff] }
 0x829   : > { %7472 = vmatpush1.bf16.msra.mxu1 %v7471_v29  ;;  %v7367_v29 = vpack.c.bf16 %v4464_v0, %v4460_v35  ;;  %v7509_v35 = vpack.c.bf16 %v5294_v15, %v5292_v60  ;;  %v7385_v3 = vpack.c.bf16 %v4505_v42, %v4501_v28  ;;  %v5296_v0 = vld [vmem:[#allocation2 + $0x1c8] sm:$0xff]  ;;  %v4564_v15 = vld [vmem:[%s10951_s16 + $0xc90] sm:$0xff]  ;;  %v4573_v42 = vld [vmem:[%s10951_s16 + $0xcd8] sm:$0xff] }
 0x82a   : > { %5087 = vmatmul.mubr.f32.vlgmr.msra.gmra.mrb[140].mxu0 %v9850_v40  ;;  %7474 = vmatprep.subr.bf16.mxu1 %v7473_v46  ;;  %v5264_v40 = vld [vmem:[#allocation2 + $0xc8] sm:$0xff]  ;;  %v4568_v28 = vld [vmem:[%s10951_s16 + $0xcb0] sm:$0xff] }
 0x82b   : > { %7348 = vmatpush1.bf16.msra.mxu0 %v7347_v39  ;;  %5157 = vmatprep.mubr.f32.mxu0 %v9987_v27  ;;  %v4445_v27 = vld [vmem:[%s10951_s16 + $0x8d8] sm:$0xff]  ;;  %v7481_v33 = vpack.c.bf16 %v5266_v1, %v5264_v40  ;;  %v4468_v39 = vld [vmem:[%s10951_s16 + $0x990] sm:$0xff]  ;;  %v5280_v46 = vld [vmem:[#allocation2 + $0x148] sm:$0xff] }
 0x82c   : > { %7350 = vmatprep.subr.bf16.mxu0 %v7349_v38  ;;  %v7357_v41 = vpack.c.bf16 %v4449_v19, %v4445_v27  ;;  %v7369_v38 = vpack.c.bf16 %v4473_v12, %v4469_v56  ;;  %v7497_v23 = vpack.c.bf16 %v5282_v62, %v5280_v46  ;;  %v5286_v40 = vld [vmem:[#allocation2 + $0x178] sm:$0xff]  ;;  %v4516_v62 = vld [vmem:[%s10951_s16 + $0xb10] sm:$0xff] }
 0x82d   : > { %7476 = vmatpush1.bf16.msra.mxu1 %v7475_v8  ;;  %v7371_v8 = vpack.c.bf16 %v4472_v53, %v4468_v39  ;;  %v4485_v1 = vld [vmem:[%s10951_s16 + $0xa18] sm:$0xff]  ;;  %v7501_v14 = vpack.c.bf16 %v5286_v40, %v5284_v63  ;;  %v4532_v40 = vld [vmem:[%s10951_s16 + $0xb90] sm:$0xff] }
 0x82e   : > { %7478 = vmatprep.subr.bf16.mxu1 %v7477_v24  ;;  %v5279_v24 = vld [vmem:[#allocation2 + $0x140] sm:$0xff]  ;;  %v4489_v27 = vld [vmem:[%s10951_s16 + $0xa38] sm:$0xff] }
 0x82f   : > { %7352 = vmatpush1.bf16.msra.mxu0 %v7351_v17  ;;  %v4476_v17 = vld [vmem:[%s10951_s16 + $0x9d0] sm:$0xff]  ;;  %v7499_v19 = vpack.c.bf16 %v5281_v4, %v5279_v24  ;;  %v7377_v25 = vpack.c.bf16 %v4489_v27, %v4485_v1  ;;  %v4513_v56 = vld [vmem:[%s10951_s16 + $0xaf8] sm:$0xff] }
 0x830   : > { %7354 = vmatprep.subr.bf16.mxu0 %v7353_v45  ;;  %v4480_v45 = vld [vmem:[%s10951_s16 + $0x9f0] sm:$0xff]  ;;  %v7389_v39 = vpack.c.bf16 %v4513_v56, %v4509_v36  ;;  %v4533_v4 = vld [vmem:[%s10951_s16 + $0xb98] sm:$0xff]  ;;  %v5299_v56 = vld [vmem:[#allocation2 + $0x1e0] sm:$0xff] }
 0x831   : > { %7480 = vmatpush1.bf16.msra.mxu1 %v7479_v13  ;;  %v7375_v13 = vpack.c.bf16 %v4480_v45, %v4476_v17  ;;  %v4528_v24 = vld [vmem:[%s10951_s16 + $0xb70] sm:$0xff]  ;;  %v4541_v27 = vld [vmem:[%s10951_s16 + $0xbd8] sm:$0xff] }
 0x832   : > { %7482 = vmatprep.subr.bf16.mxu1 %v7481_v33  ;;  %v5283_v33 = vld [vmem:[#allocation2 + $0x160] sm:$0xff]  ;;  %v4536_v1 = vld [vmem:[%s10951_s16 + $0xbb0] sm:$0xff]  ;;  %v5302_v36 = vld [vmem:[#allocation2 + $0x1f8] sm:$0xff] }
 0x833   : > { %7356 = vmatpush1.bf16.msra.mxu0 %v7355_v51  ;;  %v4484_v51 = vld [vmem:[%s10951_s16 + $0xa10] sm:$0xff]  ;;  %v7503_v2 = vpack.c.bf16 %v5285_v48, %v5283_v33  ;;  %v4549_v48 = vld [vmem:[%s10951_s16 + $0xc18] sm:$0xff] }
 0x834   : > { %7358 = vmatprep.subr.bf16.mxu0 %v7357_v41  ;;  %v4488_v41 = vld [vmem:[%s10951_s16 + $0xa30] sm:$0xff] }
 0x835   : > { %7484 = vmatpush1.bf16.msra.mxu1 %v7483_v49  ;;  %v7379_v49 = vpack.c.bf16 %v4488_v41, %v4484_v51  ;;  %v4544_v33 = vld [vmem:[%s10951_s16 + $0xbf0] sm:$0xff] }
 0x836   : > { %7486 = vmatprep.subr.bf16.mxu1 %v7485_v52  ;;  %v5287_v52 = vld [vmem:[#allocation2 + $0x180] sm:$0xff] }
 0x837   : > { %7360 = vmatpush1.bf16.msra.mxu0 %v7359_v9  ;;  %v4492_v9 = vld [vmem:[%s10951_s16 + $0xa50] sm:$0xff]  ;;  %v7507_v61 = vpack.c.bf16 %v5289_v47, %v5287_v52  ;;  %v4565_v47 = vld [vmem:[%s10951_s16 + $0xc98] sm:$0xff] }
 0x838   : > { %7362 = vmatprep.subr.bf16.mxu0 %v7361_v32  ;;  %v4496_v32 = vld [vmem:[%s10951_s16 + $0xa70] sm:$0xff] }
 0x839   : > { %7488 = vmatpush1.bf16.msra.mxu1 %v7487_v20  ;;  %v7383_v20 = vpack.c.bf16 %v4496_v32, %v4492_v9  ;;  %v4560_v52 = vld [vmem:[%s10951_s16 + $0xc70] sm:$0xff] }
 0x83a   : > { %7490 = vmatprep.subr.bf16.mxu1 %v7489_v21  ;;  %v5291_v21 = vld [vmem:[#allocation2 + $0x1a0] sm:$0xff] }
 0x83b   : > { %7364 = vmatpush1.bf16.msra.mxu0 %v7363_v37  ;;  %v4500_v37 = vld [vmem:[%s10951_s16 + $0xa90] sm:$0xff]  ;;  %v7511_v12 = vpack.c.bf16 %v5293_v44, %v5291_v21  ;;  %v4585_v21 = vld [vmem:[%s10951_s16 + $0xd38] sm:$0xff]  ;;  %v5295_v44 = vld [vmem:[#allocation2 + $0x1c0] sm:$0xff] }
 0x83c   : > { %7366 = vmatprep.subr.bf16.mxu0 %v7365_v6  ;;  %v4504_v6 = vld [vmem:[%s10951_s16 + $0xab0] sm:$0xff] }
 0x83d   : > { %7492 = vmatpush1.bf16.msra.mxu1 %v7491_v16  ;;  %v7387_v16 = vpack.c.bf16 %v4504_v6, %v4500_v37  ;;  %v4576_v37 = vld [vmem:[%s10951_s16 + $0xcf0] sm:$0xff] }
 0x83e   : > { %7494 = vmatprep.subr.bf16.mxu1 %v7493_v59  ;;  %v4508_v59 = vld [vmem:[%s10951_s16 + $0xad0] sm:$0xff] }
 0x83f   : > { %7368 = vmatpush1.bf16.msra.mxu0 %v7367_v29  ;;  %v7513_v29 = vpack.c.bf16 %v5298_v31, %v5296_v0  ;;  %v7391_v53 = vpack.c.bf16 %v4512_v18, %v4508_v59  ;;  %v5300_v31 = vld [vmem:[#allocation2 + $0x1e8] sm:$0xff]  ;;  %v5301_v59 = vld [vmem:[#allocation2 + $0x1f0] sm:$0xff]  ;;  %v4589_v18 = vld [vmem:[%s10951_s16 + $0xd58] sm:$0xff] }
 0x840   : > { %7370 = vmatprep.subr.bf16.mxu0 %v7369_v38  ;;  %v4521_v38 = vld [vmem:[%s10951_s16 + $0xb38] sm:$0xff] }
 0x841   : > { %7496 = vmatpush1.bf16.msra.mxu1 %v7495_v10  ;;  %v7393_v46 = vpack.c.bf16 %v4521_v38, %v4517_v54  ;;  %v4529_v10 = vld [vmem:[%s10951_s16 + $0xb78] sm:$0xff]  ;;  %v7519_v38 = vpack.c.bf16 %v5301_v59, %v5299_v56 }
 0x842   : > { %7498 = vmatprep.subr.bf16.mxu1 %v7497_v23  ;;  %v7397_v17 = vpack.c.bf16 %v4529_v10, %v4525_v34  ;;  %v4524_v23 = vld [vmem:[%s10951_s16 + $0xb50] sm:$0xff]  ;;  %v4593_v54 = vld [vmem:[%s10951_s16 + $0xd78] sm:$0xff] }
 0x843   : > { %7372 = vmatpush1.bf16.msra.mxu0 %v7371_v8  ;;  %v7395_v8 = vpack.c.bf16 %v4520_v30, %v4516_v62  ;;  %v7399_v45 = vpack.c.bf16 %v4528_v24, %v4524_v23  ;;  %v7429_v34 = vpack.c.bf16 %v4593_v54, %v4589_v18  ;;  %v4588_v10 = vld [vmem:[%s10951_s16 + $0xd50] sm:$0xff]  ;;  %v4601_v23 = vld [vmem:[%s10951_s16 + $0xdb8] sm:$0xff] }
 0x844   : > { %7374 = vmatprep.subr.bf16.mxu0 %v7373_v58  ;;  %v4537_v58 = vld [vmem:[%s10951_s16 + $0xbb8] sm:$0xff] }
 0x845   : > { %7500 = vmatpush1.bf16.msra.mxu1 %v7499_v19  ;;  %v7401_v63 = vpack.c.bf16 %v4537_v58, %v4533_v4  ;;  %v4545_v19 = vld [vmem:[%s10951_s16 + $0xbf8] sm:$0xff]  ;;  %v4596_v58 = vld [vmem:[%s10951_s16 + $0xd90] sm:$0xff] }
 0x846   : > { %7502 = vmatprep.subr.bf16.mxu1 %v7501_v14  ;;  %v7405_v51 = vpack.c.bf16 %v4545_v19, %v4541_v27  ;;  %v4540_v14 = vld [vmem:[%s10951_s16 + $0xbd0] sm:$0xff]  ;;  %v5310_v59 = vld [vmem:[#allocation2 + $0x238] sm:$0xff] }
 0x847   : > { %7376 = vmatpush1.bf16.msra.mxu0 %v7375_v13  ;;  %v7403_v13 = vpack.c.bf16 %v4536_v1, %v4532_v40  ;;  %v7407_v41 = vpack.c.bf16 %v4544_v33, %v4540_v14  ;;  %v4605_v40 = vld [vmem:[%s10951_s16 + $0xdd8] sm:$0xff]  ;;  %v4608_v14 = vld [vmem:[%s10951_s16 + $0xdf0] sm:$0xff] }
 0x848   : > { %7378 = vmatprep.subr.bf16.mxu0 %v7377_v25  ;;  %v4553_v25 = vld [vmem:[%s10951_s16 + $0xc38] sm:$0xff] }
 0x849   : > { %7504 = vmatpush1.bf16.msra.mxu1 %v7503_v2  ;;  %v7409_v5 = vpack.c.bf16 %v4553_v25, %v4549_v48  ;;  %v4561_v2 = vld [vmem:[%s10951_s16 + $0xc78] sm:$0xff] }
 0x84a   : > { %7506 = vmatprep.subr.bf16.mxu1 %v7505_v43  ;;  %v7413_v9 = vpack.c.bf16 %v4561_v2, %v4557_v55  ;;  %v4556_v43 = vld [vmem:[%s10951_s16 + $0xc50] sm:$0xff]  ;;  %v4609_v1 = vld [vmem:[%s10951_s16 + $0xdf8] sm:$0xff] }
 0x84b   : > { %7380 = vmatpush1.bf16.msra.mxu0 %v7379_v49  ;;  %v7411_v49 = vpack.c.bf16 %v4552_v57, %v4548_v7  ;;  %v7415_v32 = vpack.c.bf16 %v4560_v52, %v4556_v43  ;;  %v4613_v33 = vld [vmem:[%s10951_s16 + $0xe18] sm:$0xff]  ;;  %v4616_v7 = vld [vmem:[%s10951_s16 + $0xe30] sm:$0xff] }
 0x84c   : > { %7382 = vmatprep.subr.bf16.mxu0 %v7381_v26  ;;  %v4569_v26 = vld [vmem:[%s10951_s16 + $0xcb8] sm:$0xff]  ;;  %v4624_v43 = vld [vmem:[%s10951_s16 + $0xe70] sm:$0xff] }
 0x84d   : > { %7508 = vmatpush1.bf16.msra.mxu1 %v7507_v61  ;;  %v7417_v60 = vpack.c.bf16 %v4569_v26, %v4565_v47  ;;  %v4617_v48 = vld [vmem:[%s10951_s16 + $0xe38] sm:$0xff] }
 0x84e   : > { %7510 = vmatprep.subr.bf16.mxu1 %v7509_v35  ;;  %v4581_v35 = vld [vmem:[%s10951_s16 + $0xd18] sm:$0xff] }
 0x84f   : > { %7384 = vmatpush1.bf16.msra.mxu0 %v7383_v20  ;;  %v4572_v20 = vld [vmem:[%s10951_s16 + $0xcd0] sm:$0xff]  ;;  %v4621_v57 = vld [vmem:[%s10951_s16 + $0xe58] sm:$0xff] }
 0x850   : > { %7386 = vmatprep.subr.bf16.mxu0 %v7385_v3  ;;  %v5297_v3 = vld [vmem:[#allocation2 + $0x1d0] sm:$0xff]  ;;  %v7423_v6 = vpack.c.bf16 %v4576_v37, %v4572_v20  ;;  %v4625_v55 = vld [vmem:[%s10951_s16 + $0xe78] sm:$0xff] }
 0x851   : > { %7512 = vmatpush1.bf16.msra.mxu1 %v7511_v12  ;;  %v7515_v0 = vpack.c.bf16 %v5297_v3, %v5295_v44  ;;  %v7425_v12 = vpack.c.bf16 %v4585_v21, %v4581_v35  ;;  %v4629_v52 = vld [vmem:[%s10951_s16 + $0xe98] sm:$0xff]  ;;  %v4640_v20 = vld [vmem:[%s10951_s16 + $0xef0] sm:$0xff]  ;;  %v10911_v35 = vld [vmem:[%s10952_s17] sm:$0xf] }
 0x852   : > { %7514 = vmatprep.subr.bf16.mxu1 %v7513_v29  ;;  %v4584_v29 = vld [vmem:[%s10951_s16 + $0xd30] sm:$0xff]  ;;  %v4633_v47 = vld [vmem:[%s10951_s16 + $0xeb8] sm:$0xff]  ;;  %v11009_v21 = vld [vmem:[#allocation6_spill] sm:$0xff] }
 0x853   : > { %7388 = vmatpush1.bf16.msra.mxu0 %v7387_v16  ;;  %v4580_v16 = vld [vmem:[%s10951_s16 + $0xd10] sm:$0xff]  ;;  %v4647_v44 = vrot.slane %v10911_v35, %v11009_v21 }
 0x854   : > { %7390 = vmatprep.subr.bf16.mxu0 %v7389_v39  ;;  %v7517_v39 = vpack.c.bf16 %v5302_v36, %v5300_v31  ;;  %v7427_v62 = vpack.c.bf16 %v4584_v29, %v4580_v16  ;;  %v11010_v3 = vld [vmem:[#allocation7_spill] sm:$0xff]  ;;  %v5303_v16 = vld [vmem:[#allocation2 + $0x200] sm:$0xff] }
 0x855   : > { %7516 = vmatpush1.bf16.msra.mxu1 %v7515_v0  ;;  %v5305_v29 = vld [vmem:[#allocation2 + $0x210] sm:$0xff] }
 0x856   : > { %7518 = vmatprep.subr.bf16.mxu1 %v7517_v39  ;;  %v7523_v54 = vpack.c.bf16 %v5305_v29, %v5303_v16 }
 0x857   : > { %7392 = vmatpush1.bf16.msra.mxu0 %v7391_v53  ;;  %v5304_v53 = vld [vmem:[#allocation2 + $0x208] sm:$0xff] }
 0x858   : > { %7394 = vmatprep.subr.bf16.mxu0 %v7393_v46  ;;  %v5306_v46 = vld [vmem:[#allocation2 + $0x218] sm:$0xff] }
 0x859   : > { %v7521_v30 = vpack.c.bf16 %v5306_v46, %v5304_v53  ;;  %7520 = vmatpush1.bf16.msra.mxu1 %v7519_v38  ;;  %v5307_v46 = vld [vmem:[#allocation2 + $0x220] sm:$0xff] }
 0x85b   : > { %7396 = vmatpush1.bf16.msra.mxu0 %v7395_v8  ;;  %v4592_v8 = vld [vmem:[%s10951_s16 + $0xd70] sm:$0xff]  ;;  %7522 = vmatprep.subr.bf16.mxu1 %v7521_v30  ;;  %v5312_v30 = vld [vmem:[#allocation2 + $0x248] sm:$0xff] }
 0x85c   : > { %7398 = vmatprep.subr.bf16.mxu0 %v7397_v17  ;;  %v4597_v17 = vld [vmem:[%s10951_s16 + $0xd98] sm:$0xff]  ;;  %v7431_v24 = vpack.c.bf16 %v4592_v8, %v4588_v10 }
 0x85d   : > { %v7433_v4 = vpack.c.bf16 %v4601_v23, %v4597_v17  ;;  %v5311_v17 = vld [vmem:[#allocation2 + $0x240] sm:$0xff]  ;;  %v5313_v23 = vld [vmem:[#allocation2 + $0x250] sm:$0xff] }
 0x85f   : > { %7400 = vmatpush1.bf16.msra.mxu0 %v7399_v45  ;;  %v4600_v45 = vld [vmem:[%s10951_s16 + $0xdb0] sm:$0xff] }
 0x860   : > { %7402 = vmatprep.subr.bf16.mxu0 %v7401_v63  ;;  %v7435_v19 = vpack.c.bf16 %v4600_v45, %v4596_v58  ;;  %v7531_v58 = vpack.c.bf16 %v5313_v23, %v5311_v17  ;;  %v5353_v17 = vld [vmem:[#allocation2 + $0x390] sm:$0xff]  ;;  %v5356_v23 = vld [vmem:[#allocation2 + $0x3a8] sm:$0xff] }
 0x863   : > { %7404 = vmatpush1.bf16.msra.mxu0 %v7403_v13  ;;  %v7437_v13 = vpack.c.bf16 %v4609_v1, %v4605_v40  ;;  %v5317_v40 = vld [vmem:[#allocation2 + $0x270] sm:$0xff]  ;;  %v5320_v1 = vld [vmem:[#allocation2 + $0x288] sm:$0xff] }
 0x864   : > { %7406 = vmatprep.subr.bf16.mxu0 %v7405_v51  ;;  %v4604_v51 = vld [vmem:[%s10951_s16 + $0xdd0] sm:$0xff] }
 0x865   : > { %v7439_v25 = vpack.c.bf16 %v4608_v14, %v4604_v51  ;;  %v5319_v51 = vld [vmem:[#allocation2 + $0x280] sm:$0xff]  ;;  %v5321_v14 = vld [vmem:[#allocation2 + $0x290] sm:$0xff] }
 0x867   : > { %7408 = vmatpush1.bf16.msra.mxu0 %v7407_v41  ;;  %v7441_v41 = vpack.c.bf16 %v4617_v48, %v4613_v33  ;;  %v5324_v33 = vld [vmem:[#allocation2 + $0x2a8] sm:$0xff]  ;;  %v5326_v48 = vld [vmem:[#allocation2 + $0x2b8] sm:$0xff] }
 0x868   : > { %7410 = vmatprep.subr.bf16.mxu0 %v7409_v5  ;;  %v4612_v5 = vld [vmem:[%s10951_s16 + $0xe10] sm:$0xff] }
 0x869   : > { %v7443_v2 = vpack.c.bf16 %v4616_v7, %v4612_v5  ;;  %v5323_v5 = vld [vmem:[#allocation2 + $0x2a0] sm:$0xff]  ;;  %v5325_v7 = vld [vmem:[#allocation2 + $0x2b0] sm:$0xff] }
 0x86a   : > { %5158 = vmatmul.mubr.f32.vlgmr.msra.gmra.mrb[140].mxu0 %v10264_v11  ;;  %v4577_v11 = vld [vmem:[%s10951_s16 + $0xcf8] sm:$0xff] }
 0x86b   : > { %7412 = vmatpush1.bf16.msra.mxu0 %v7411_v49  ;;  %5860 = vmatprep.mubr.msk.f32.mxu0 %vm2837_vm6, %v10273_v50  ;;  %v7419_v50 = vpack.c.bf16 %v4568_v28, %v4564_v15  ;;  %v7421_v61 = vpack.c.bf16 %v4577_v11, %v4573_v42  ;;  %v7445_v49 = vpack.c.bf16 %v4625_v55, %v4621_v57  ;;  %v4632_v15 = vld [vmem:[%s10951_s16 + $0xeb0] sm:$0xff]  ;;  %v4637_v28 = vld [vmem:[%s10951_s16 + $0xed8] sm:$0xff]  ;;  %v5328_v57 = vld [vmem:[#allocation2 + $0x2c8] sm:$0xff] }
 0x86c   : > { %7414 = vmatprep.subr.bf16.mxu0 %v7413_v9  ;;  %v4620_v9 = vld [vmem:[%s10951_s16 + $0xe50] sm:$0xff]  ;;  %v4641_v42 = vld [vmem:[%s10951_s16 + $0xef8] sm:$0xff] }
 0x86d   : > { %v7447_v26 = vpack.c.bf16 %v4624_v43, %v4620_v9  ;;  %v5330_v55 = vld [vmem:[#allocation2 + $0x2d8] sm:$0xff]  ;;  %v5327_v9 = vld [vmem:[#allocation2 + $0x2c0] sm:$0xff]  ;;  %v5329_v43 = vld [vmem:[#allocation2 + $0x2d0] sm:$0xff] }
 0x86f   : > { %7416 = vmatpush1.bf16.msra.mxu0 %v7415_v32  ;;  %v7449_v32 = vpack.c.bf16 %v4633_v47, %v4629_v52  ;;  %v5332_v52 = vld [vmem:[#allocation2 + $0x2e8] sm:$0xff]  ;;  %v5334_v47 = vld [vmem:[#allocation2 + $0x2f8] sm:$0xff] }
 0x870   : > { %7418 = vmatprep.subr.bf16.mxu0 %v7417_v60  ;;  %v4628_v60 = vld [vmem:[%s10951_s16 + $0xe90] sm:$0xff] }
 0x871   : > { %v7451_v11 = vpack.c.bf16 %v4632_v15, %v4628_v60  ;;  %v5331_v60 = vld [vmem:[#allocation2 + $0x2e0] sm:$0xff]  ;;  %v5333_v15 = vld [vmem:[#allocation2 + $0x2f0] sm:$0xff] }
 0x873   : > { %7420 = vmatpush1.bf16.msra.mxu0 %v7419_v50  ;;  %v7453_v50 = vpack.c.bf16 %v4641_v42, %v4637_v28  ;;  %v5336_v28 = vld [vmem:[#allocation2 + $0x308] sm:$0xff]  ;;  %v5338_v42 = vld [vmem:[#allocation2 + $0x318] sm:$0xff] }
 0x874   : > { %7422 = vmatprep.subr.bf16.mxu0 %v7421_v61  ;;  %v4636_v61 = vld [vmem:[%s10951_s16 + $0xed0] sm:$0xff] }
 0x875   : > { %v7455_v37 = vpack.c.bf16 %v4640_v20, %v4636_v61  ;;  %v5335_v61 = vld [vmem:[#allocation2 + $0x300] sm:$0xff]  ;;  %v5337_v20 = vld [vmem:[#allocation2 + $0x310] sm:$0xff] }
 0x877   : > { %7424 = vmatpush1.bf16.msra.mxu0 %v7423_v6  ;;  %v4651_v6 = vrot.slane %v10911_v35, %v11010_v3 }
 0x878   : > { %7426 = vmatprep.subr.bf16.mxu0 %v7425_v12 }
 0x87b   : > { %7428 = vmatpush1.bf16.msra.mxu0 %v7427_v62  ;;  %v5309_v62 = vld [vmem:[#allocation2 + $0x230] sm:$0xff] }
 0x87c   : > { %7430 = vmatprep.subr.bf16.mxu0 %v7429_v34  ;;  %v4733_v63 = vpop.f32.mrb[138].mxu0  ;;  %v5314_v34 = vld [vmem:[#allocation2 + $0x258] sm:$0xff]  ;;  %v7527_v10 = vpack.c.bf16 %v5309_v62, %v5307_v46  ;;  %v5349_v46 = vld [vmem:[#allocation2 + $0x370] sm:$0xff]  ;;  %v5352_v62 = vld [vmem:[#allocation2 + $0x388] sm:$0xff] }
 0x87d   : > { %v4735_v27 = vpop.f32.mrb[139].mxu0  ;;  %v4734_v0 = vadd.f32 %v4733_v63, %v4647_v44  ;;  %v7529_v8 = vpack.c.bf16 %v5314_v34, %v5312_v30  ;;  %v5315_v63 = vld [vmem:[#allocation2 + $0x260] sm:$0xff]  ;;  %v5342_v44 = vld [vmem:[#allocation2 + $0x338] sm:$0xff] }
 0x87e   : > { %v4736_v31 = vadd.f32 %v4735_v27, %v4651_v6  ;;  %v5322_v27 = vld [vmem:[#allocation2 + $0x298] sm:$0xff]  ;;  %v7555_v6 = vpack.c.bf16 %v5337_v20, %v5335_v61 }
 0x87f   : > { %7432 = vmatpush1.bf16.msra.mxu0 %v7431_v24  ;;  %v5316_v24 = vld [vmem:[#allocation2 + $0x268] sm:$0xff]  ;;  %v5354_v30 = vld [vmem:[#allocation2 + $0x398] sm:$0xff] }
 0x880   : > { %7434 = vmatprep.subr.bf16.mxu0 %v7433_v4  ;;  %v5318_v4 = vld [vmem:[#allocation2 + $0x278] sm:$0xff] }
 0x881   : > { %v7533_v45 = vpack.c.bf16 %v5318_v4, %v5316_v24  ;;  %v5358_v24 = vld [vmem:[#allocation2 + $0x3b8] sm:$0xff] }
 0x883   : > { %7436 = vmatpush1.bf16.msra.mxu0 %v7435_v19  ;;  %v7535_v19 = vpack.c.bf16 %v5317_v40, %v5315_v63  ;;  %v5357_v63 = vld [vmem:[#allocation2 + $0x3b0] sm:$0xff]  ;;  %v5360_v40 = vld [vmem:[#allocation2 + $0x3c8] sm:$0xff] }
 0x884   : > { %7438 = vmatprep.subr.bf16.mxu0 %v7437_v13  ;;  %v7537_v13 = vpack.c.bf16 %v5322_v27, %v5320_v1  ;;  %v5362_v1 = vld [vmem:[#allocation2 + $0x3d8] sm:$0xff] }
 0x887   : > { %7440 = vmatpush1.bf16.msra.mxu0 %v7439_v25  ;;  %v7539_v25 = vpack.c.bf16 %v5321_v14, %v5319_v51  ;;  %v5361_v51 = vld [vmem:[#allocation2 + $0x3d0] sm:$0xff]  ;;  %v5364_v14 = vld [vmem:[#allocation2 + $0x3e8] sm:$0xff] }
 0x888   : > { %7442 = vmatprep.subr.bf16.mxu0 %v7441_v41  ;;  %v7541_v41 = vpack.c.bf16 %v5326_v48, %v5324_v33  ;;  %v5366_v33 = vld [vmem:[#allocation2 + $0x3f8] sm:$0xff] }
 0x88b   : > { %7444 = vmatpush1.bf16.msra.mxu0 %v7443_v2  ;;  %v7543_v2 = vpack.c.bf16 %v5325_v7, %v5323_v5  ;;  %v5365_v5 = vld [vmem:[#allocation2 + $0x3f0] sm:$0xff] }
 0x88c   : > { %7446 = vmatprep.subr.bf16.mxu0 %v7445_v49  ;;  %v7545_v49 = vpack.c.bf16 %v5330_v55, %v5328_v57  ;;  %v11011_v57 = vld [vmem:[#allocation8_spill] sm:$0xff] }
 0x88d   : > { %v4655_v55 = vrot.slane %v10911_v35, %v11011_v57 }
 0x88f   : > { %7448 = vmatpush1.bf16.msra.mxu0 %v7447_v26  ;;  %v7547_v26 = vpack.c.bf16 %v5329_v43, %v5327_v9 }
 0x890   : > { %7450 = vmatprep.subr.bf16.mxu0 %v7449_v32  ;;  %v7549_v32 = vpack.c.bf16 %v5334_v47, %v5332_v52 }
 0x893   : > { %7452 = vmatpush1.bf16.msra.mxu0 %v7451_v11  ;;  %v7551_v11 = vpack.c.bf16 %v5333_v15, %v5331_v60  ;;  %v5367_v60 = vld [vmem:[%s10954_s19] sm:$0x3]  ;;  %v7678_v15 = vmov 1966171168  }
 0x894   : > { %7454 = vmatprep.subr.bf16.mxu0 %v7453_v50  ;;  %v7553_v50 = vpack.c.bf16 %v5338_v42, %v5336_v28  ;;  %v5525_v28 = vunpack.c.l.s4 %v7678_v15  ;;  %v5372_v42 = vrot.slane %v5367_v60, %v11009_v21 }
 0x897   : > { %7456 = vmatpush1.bf16.msra.mxu0 %v7455_v37  ;;  %v5340_v37 = vld [vmem:[#allocation2 + $0x328] sm:$0xff] }
 0x89a   : > { %5229 = vmatmul.mubr.f32.vlgmr.msra.gmra.mrb[140].mxu0 %v10545_v22  ;;  %v5308_v22 = vld [vmem:[#allocation2 + $0x228] sm:$0xff] }
 0x89b   : > { %v7525_v53 = vpack.c.bf16 %v5310_v59, %v5308_v22  ;;  %v5345_v22 = vld [vmem:[#allocation2 + $0x350] sm:$0xff]  ;;  %v5348_v59 = vld [vmem:[#allocation2 + $0x368] sm:$0xff] }
 0x8ef   : > { %v4946_v36 = vpop.f32.mrb[146].mxu1 }
 0x8f0   : > { %v7586_v56 = vadd.f32 %v4946_v36, %v4734_v0  ;;  %v4948_v12 = vpop.f32.mrb[147].mxu1  ;;  %v7557_v0 = vpack.c.bf16 %v5342_v44, %v5340_v37  ;;  %v5341_v36 = vld [vmem:[#allocation2 + $0x330] sm:$0xff]  ;;  %v11013_v44 = vld [vmem:[#allocation5_spill] sm:$0xff] }
 0x8f1   : > { %v7588_v39 = vadd.f32 %v4948_v12, %v4736_v31  ;;  %v5339_v31 = vld [vmem:[#allocation2 + $0x320] sm:$0xff]  ;;  %v5346_v12 = vld [vmem:[#allocation2 + $0x358] sm:$0xff] }
 0x8f2   : > { %v5235_v38 = vmax.f32 %v7586_v56, 0.0  ;;  %v5344_v56 = vld [vmem:[#allocation2 + $0x348] sm:$0xff]  ;;  %v7559_v16 = vpack.c.bf16 %v5341_v36, %v5339_v31  ;;  %v11014_v36 = vlaneseq }
 0x8f3   : > { %v5236_v18 = vmax.f32 %v7588_v39, 0.0  ;;  %v7561_v29 = vpack.c.bf16 %v5346_v12, %v5344_v56  ;;  %v5343_v39 = vld [vmem:[#allocation2 + $0x340] sm:$0xff] }
 0x8f4   : > { %vm5541_vm8 = vcmp.lt.s32.totalorder %v11014_v36, 256 }
 0x8f5   : > { %5443 = vmatprep.mubr.f32.mxu1 %v5236_v18  ;;  %v5350_v18 = vld [vmem:[#allocation2 + $0x378] sm:$0xff] }
 0x8f6   : > { %5444 = vmatmul.mubr.f32.vlgmr.msra.gmra.mrb[148].mxu1 %v5235_v38  ;;  %v7565_v38 = vpack.c.bf16 %v5350_v18, %v5348_v59 }
 0x8f7   : > { %7524 = vmatpush1.bf16.msra.mxu1 %v7523_v54  ;;  %v7563_v54 = vpack.c.bf16 %v5345_v22, %v5343_v39 }
 0x8f8   : > { %7526 = vmatprep.subr.bf16.mxu1 %v7525_v53  ;;  %v5347_v53 = vld [vmem:[#allocation2 + $0x360] sm:$0xff] }
 0x8f9   : > { %v7567_v34 = vpack.c.bf16 %v5349_v46, %v5347_v53 }
 0x8fb   : > { %7528 = vmatpush1.bf16.msra.mxu1 %v7527_v10  ;;  %v7569_v10 = vpack.c.bf16 %v5354_v30, %v5352_v62 }
 0x8fc   : > { %7530 = vmatprep.subr.bf16.mxu1 %v7529_v8  ;;  %v5351_v8 = vld [vmem:[#allocation2 + $0x380] sm:$0xff] }
 0x8fd   : > { %v7571_v4 = vpack.c.bf16 %v5353_v17, %v5351_v8 }
 0x8ff   : > { %7532 = vmatpush1.bf16.msra.mxu1 %v7531_v58  ;;  %v7573_v58 = vpack.c.bf16 %v5358_v24, %v5356_v23 }
 0x900   : > { %7534 = vmatprep.subr.bf16.mxu1 %v7533_v45  ;;  %v5355_v45 = vld [vmem:[#allocation2 + $0x3a0] sm:$0xff] }
 0x901   : > { %v7575_v27 = vpack.c.bf16 %v5357_v63, %v5355_v45 }
 0x903   : > { %7536 = vmatpush1.bf16.msra.mxu1 %v7535_v19  ;;  %v7577_v19 = vpack.c.bf16 %v5362_v1, %v5360_v40 }
 0x904   : > { %7538 = vmatprep.subr.bf16.mxu1 %v7537_v13  ;;  %v5359_v13 = vld [vmem:[#allocation2 + $0x3c0] sm:$0xff] }
 0x905   : > { %v7579_v48 = vpack.c.bf16 %v5361_v51, %v5359_v13 }
 0x907   : > { %7540 = vmatpush1.bf16.msra.mxu1 %v7539_v25  ;;  %v7581_v25 = vpack.c.bf16 %v5366_v33, %v5364_v14 }
 0x908   : > { %7542 = vmatprep.subr.bf16.mxu1 %v7541_v41  ;;  %v5363_v41 = vld [vmem:[#allocation2 + $0x3e0] sm:$0xff] }
 0x909   : > { %v7583_v7 = vpack.c.bf16 %v5365_v5, %v5363_v41 }
 0x90b   : > { %7544 = vmatpush1.bf16.msra.mxu1 %v7543_v2  ;;  %v11012_v2 = vld [vmem:[#allocation9_spill] sm:$0xff] }
 0x90c   : > { %7546 = vmatprep.subr.bf16.mxu1 %v7545_v49  ;;  %v4659_v49 = vrot.slane %v10911_v35, %v11012_v2  ;;  %v5526_v35 = vunpack.c.0.s8 %v5525_v28 }
 0x90f   : > { %7548 = vmatpush1.bf16.msra.mxu1 %v7547_v26 }
 0x910   : > { %7550 = vmatprep.subr.bf16.mxu1 %v7549_v32 }
 0x913   : > { %7552 = vmatpush1.bf16.msra.mxu1 %v7551_v11  ;;  %v5376_v11 = vrot.slane %v5367_v60, %v11010_v3 }
 0x914   : > { %7554 = vmatprep.subr.bf16.mxu1 %v7553_v50 }
 0x917   : > { %7556 = vmatpush1.bf16.msra.mxu1 %v7555_v6  ;;  %v5529_v6 = vsub.s32 %v5526_v35, %v11013_v44 }
 0x918   : > { %7558 = vmatprep.subr.bf16.mxu1 %v7557_v0 }
 0x91b   : > { %7560 = vmatpush1.bf16.msra.mxu1 %v7559_v16 }
 0x91c   : > { %7562 = vmatprep.subr.bf16.mxu1 %v7561_v29 }
 0x91f   : > { %7564 = vmatpush1.bf16.msra.mxu1 %v7563_v54 }
 0x920   : > { %7566 = vmatprep.subr.bf16.mxu1 %v7565_v38 }
 0x923   : > { %7568 = vmatpush1.bf16.msra.mxu1 %v7567_v34 }
 0x924   : > { %7570 = vmatprep.subr.bf16.mxu1 %v7569_v10 }
 0x927   : > { %7572 = vmatpush1.bf16.msra.mxu1 %v7571_v4 }
 0x928   : > { %7574 = vmatprep.subr.bf16.mxu1 %v7573_v58 }
 0x92b   : > { %7576 = vmatpush1.bf16.msra.mxu1 %v7575_v27 }
 0x92c   : > { %7578 = vmatprep.subr.bf16.mxu1 %v7577_v19 }
 0x92f   : > { %7580 = vmatpush1.bf16.msra.mxu1 %v7579_v48 }
 0x930   : > { %7582 = vmatprep.subr.bf16.mxu1 %v7581_v25 }
 0x933   : > { %7584 = vmatpush1.bf16.msra.mxu1 %v7583_v7 }
 0x96d   : > { %v5230_v9 = vpop.f32.mrb[140].mxu0 }
 0x96e   : > { %v7589_v43 = vadd.f32 %v5230_v9, %v4655_v55  ;;  %v5232_v52 = vpop.f32.mrb[141].mxu0 }
 0x96f   : > { %v7590_v47 = vadd.f32 %v5232_v52, %v4659_v49 }
 0x970   : > { %v5237_v32 = vmax.f32 %v7589_v43, 0.0 }
 0x971   : > { %v5238_v26 = vmax.f32 %v7590_v47, 0.0 }
 0x973   : > { %5514 = vmatprep.mubr.f32.mxu1 %v5238_v26 }
 0x974   : > { %5515 = vmatmul.mubr.f32.vlgmr.msra.gmra.mrb[148].mxu1 %v5237_v32 }
 0xa47   : > { %v5516_v50 = vpop.f32.mrb[148].mxu1 }
 0xa48   : > { %v7591_v61 = vadd.f32 %v5516_v50, %v5372_v42  ;;  %v5518_v20 = vpop.f32.mrb[149].mxu1 }
 0xa49   : > { %v7592_v37 = vadd.f32 %v5518_v20, %v5376_v11 }
 0xa4b   : > { %v5523_v0 = vcombine.low %v7591_v61, %v7592_v37 }
 0xa4d   : > { %v5530_v31 = vrot.slane %v5523_v0, %v5529_v6 }
 0xa4f   : > { %v5537_v56 = vrot.slane %v5530_v31, %v5529_v6 }
 0xa51   : > { %5543 = vst.msk [vmem:[%s642_s25] sm:$0x3] %vm5541_vm8, %v5537_v56 }
 0xa52 PF: > { %s31_s1 = sadd.s32 1, %s7669_s1  }
 0xa53   : > { %p28_p3 = scmp.ge.s32.totalorder %s31_s1, 4  }
 0xa55   :  { %30 = sbr.rel (!%p28_p3) target bundleno = 7 (0x7), region = 143 }
 0xa5c   :  { %5563 = vsyncpa [#allocation3], 1 }
 0xa5d   :  { %5565 = vsyncpa [#allocation3 + $0x1], 1 }

</bundles_post_ra>
